<compile_context>
chip_gen: v5e
topology: v5e:2x2
jax: 0.10.0
libtpu: 0.0.40
codegen_flags: <defaults>
</compile_context>

<pallas_src>
import math

import jax
import jax.numpy as jnp
from jax.experimental import pallas as pl
from jax.experimental.pallas import tpu as pltpu

DIM = 64
DEPTH = 5
HEADS = 4
HEAD_DIM = DIM // HEADS
MLP_DIM = 8
LN_EPS = 1e-5


def _erf(x):
    # Abramowitz & Stegun 7.1.26 polynomial (|err| < 1.5e-7); uses only exp so it lowers
    # cleanly on the TPU EUP.  Matches PyTorch's exact-erf GELU at f32 to ~1e-7.
    a1, a2, a3, a4, a5 = 0.254829592, -0.284496736, 1.421413741, -1.453152027, 1.061405429
    p = 0.3275911
    sgn = jnp.where(x >= 0.0, 1.0, -1.0)
    ax = jnp.abs(x)
    t = 1.0 / (1.0 + p * ax)
    poly = ((((a5 * t + a4) * t + a3) * t + a2) * t + a1) * t
    return sgn * (1.0 - poly * jnp.exp(-ax * ax))


def _gelu(x):
    return 0.5 * x * (1.0 + _erf(x * (1.0 / math.sqrt(2.0))))


def _layernorm(x, w, b):
    mu = jnp.mean(x, axis=-1, keepdims=True)
    xc = x - mu
    var = jnp.mean(xc * xc, axis=-1, keepdims=True)
    inv = jax.lax.rsqrt(var + LN_EPS)
    return xc * inv * w + b


def encoder_kernel(x_ref, wqkv_ref, bqkv_ref, wout_ref, bout_ref,
                   w1_ref, b1_ref, w2_ref, b2_ref,
                   ln1w_ref, ln1b_ref, ln2w_ref, ln2b_ref,
                   out_ref):
    depth = wqkv_ref.shape[0]
    s_len, d_model = x_ref.shape            # one batch element's (S, D) token block
    heads = HEADS
    hd = d_model // heads
    scale = 1.0 / math.sqrt(hd)

    x = x_ref[...].astype(jnp.float32)      # (S, D)

    for layer in range(depth):              # static unroll; all weights resident in VMEM
        # ---- fused QKV projection: single lane-dense (S,D)@(D,3D) MXU op ----
        qkv = (jnp.dot(x, wqkv_ref[layer], preferred_element_type=jnp.float32)
               + bqkv_ref[layer])                                          # (S, 3D)

        # split heads: columns [q | k | v], head h owns a contiguous hd-wide slice
        qh = jnp.stack([qkv[:, h * hd:(h + 1) * hd]
                        for h in range(heads)], axis=0)                    # (H, S, hd)
        kh = jnp.stack([qkv[:, d_model + h * hd:d_model + (h + 1) * hd]
                        for h in range(heads)], axis=0)
        vh = jnp.stack([qkv[:, 2 * d_model + h * hd:2 * d_model + (h + 1) * hd]
                        for h in range(heads)], axis=0)

        # ---- attention (no mask needed: this block holds exactly one batch element) ----
        s = jnp.einsum('hqf,hkf->hqk', qh, kh,
                       preferred_element_type=jnp.float32) * scale         # (H, S, S)
        s = s - jnp.max(s, axis=-1, keepdims=True)
        e = jnp.exp(s)
        p = e / jnp.sum(e, axis=-1, keepdims=True)      # exact divide (matches PyTorch)
        o = jnp.einsum('hqk,hkf->hqf', p, vh,
                       preferred_element_type=jnp.float32)                 # (H, S, hd)

        # merge heads -> (S, D), then single (S,D)@(D,D) output projection
        o2 = jnp.concatenate([o[h] for h in range(heads)], axis=-1)        # (S, D)
        attn = (jnp.dot(o2, wout_ref[layer], preferred_element_type=jnp.float32)
                + bout_ref[layer])                                         # (S, D)

        # dropout1 is identity in eval mode; post-norm (norm_first=False)
        y = _layernorm(x + attn, ln1w_ref[layer], ln1b_ref[layer])

        # ---- feed-forward ----
        h1 = jnp.dot(y, w1_ref[layer], preferred_element_type=jnp.float32) + b1_ref[layer]
        h1 = _gelu(h1)
        h2 = jnp.dot(h1, w2_ref[layer], preferred_element_type=jnp.float32) + b2_ref[layer]

        # dropout / dropout2 are identity in eval mode
        x = _layernorm(y + h2, ln2w_ref[layer], ln2b_ref[layer])

    out_ref[...] = x.astype(out_ref.dtype)


PARAM_ORDER = ["wqkv", "bqkv", "wout", "bout", "w1", "b1", "w2", "b2",
               "ln1w", "ln1b", "ln2w", "ln2b"]


@jax.jit
def transformer_encoder(x, params):
    """x: (B, S, D), batch_first=True like the PyTorch module."""
    B, S, D = x.shape
    x2 = x.reshape(B * S, D).astype(jnp.float32)
    plist = [params[k] for k in PARAM_ORDER]

    def full_spec(a):
        # whole weight array resident; constant block index -> DMA'd once across the grid
        return pl.BlockSpec(a.shape, lambda b: (0,) * a.ndim)

    in_specs = [pl.BlockSpec((S, D), lambda b: (b, 0))] + [full_spec(a) for a in plist]
    out_specs = pl.BlockSpec((S, D), lambda b: (b, 0))

    # advisory cost estimate for XLA's scheduler
    hd = D // HEADS
    flops_layer = (2 * S * D * 3 * D                  # fused qkv projection
                   + 2 * HEADS * S * S * hd * 2       # scores + prob@v
                   + 2 * S * D * D                    # output projection
                   + 2 * S * D * MLP_DIM * 2)         # feed-forward
    flops = B * DEPTH * flops_layer
    transcendentals = B * DEPTH * (HEADS * S * S + S * MLP_DIM + 2 * S)
    bytes_accessed = (x2.size + sum(a.size for a in plist) + B * S * D) * 4

    out = pl.pallas_call(
        encoder_kernel,
        out_shape=jax.ShapeDtypeStruct((B * S, D), jnp.float32),
        grid=(B,),
        in_specs=in_specs,
        out_specs=out_specs,
        compiler_params=pltpu.CompilerParams(
            dimension_semantics=("parallel",),        # batch elems split across v7x TCs
            vmem_limit_bytes=32 * 1024 * 1024,
        ),
        cost_estimate=pl.CostEstimate(flops=flops,
                                      transcendentals=transcendentals,
                                      bytes_accessed=bytes_accessed),
    )(x2, *plist)
    return out.reshape(B, S, D).astype(x.dtype)


def init_params(key, depth=DEPTH, dim=DIM, heads=HEADS, mlp_dim=MLP_DIM):
    ks = jax.random.split(key, 8)
    std = 0.02

    def rnd(k, shape):
        return std * jax.random.normal(k, shape, jnp.float32)

    # Layouts chosen so the kernel computes y = x @ W + b:
    #   wqkv[l] <-> in_proj_weight.T        (D, 3D)  columns ordered [q | k | v]
    #   wout[l] <-> out_proj.weight.T       (D, D)
    #   w1[l]   <-> linear1.weight.T        (D, mlp)
    #   w2[l]   <-> linear2.weight.T        (mlp, D)
    return {
        "wqkv": rnd(ks[0], (depth, dim, 3 * dim)),
        "bqkv": rnd(ks[1], (depth, 1, 3 * dim)),
        "wout": rnd(ks[2], (depth, dim, dim)),
        "bout": rnd(ks[3], (depth, 1, dim)),
        "w1":   rnd(ks[4], (depth, dim, mlp_dim)),
        "b1":   rnd(ks[5], (depth, 1, mlp_dim)),
        "w2":   rnd(ks[6], (depth, mlp_dim, dim)),
        "b2":   rnd(ks[7], (depth, 1, dim)),
        "ln1w": jnp.ones((depth, 1, dim), jnp.float32),
        "ln1b": jnp.zeros((depth, 1, dim), jnp.float32),
        "ln2w": jnp.ones((depth, 1, dim), jnp.float32),
        "ln2b": jnp.zeros((depth, 1, dim), jnp.float32),
    }


if __name__ == "__main__":
    key = jax.random.PRNGKey(0)
    kx, kp = jax.random.split(key)
    B, S = 2, 8
    x = jax.random.normal(kx, (B, S, DIM), jnp.float32)   # (batch, seq, d_model)
    params = init_params(kp)

    out = transformer_encoder(x, params)
    out = jax.block_until_ready(out)
    assert out.shape == (B, S, DIM) and out.dtype == jnp.float32
    assert bool(jnp.all(jnp.isfinite(out)))
    print("KERNEL_OK")
</pallas_src>

<mosaic_0001>
module attributes {stable_mosaic.version = 11 : i64} {
  func.func @encoder_kernel(%arg0: i32, %arg1: memref<8x64xf32, #tpu.memory_space<vmem>>, %arg2: memref<5x64x192xf32, #tpu.memory_space<vmem>>, %arg3: memref<5x1x192xf32, #tpu.memory_space<vmem>>, %arg4: memref<5x64x64xf32, #tpu.memory_space<vmem>>, %arg5: memref<5x1x64xf32, #tpu.memory_space<vmem>>, %arg6: memref<5x64x8xf32, #tpu.memory_space<vmem>>, %arg7: memref<5x1x8xf32, #tpu.memory_space<vmem>>, %arg8: memref<5x8x64xf32, #tpu.memory_space<vmem>>, %arg9: memref<5x1x64xf32, #tpu.memory_space<vmem>>, %arg10: memref<5x1x64xf32, #tpu.memory_space<vmem>>, %arg11: memref<5x1x64xf32, #tpu.memory_space<vmem>>, %arg12: memref<5x1x64xf32, #tpu.memory_space<vmem>>, %arg13: memref<5x1x64xf32, #tpu.memory_space<vmem>>, %arg14: memref<8x64xf32, #tpu.memory_space<vmem>>) attributes {dimension_semantics = [#tpu.dimension_semantics<parallel>], iteration_bounds = array<i64: 2>, scalar_prefetch = 0 : i64, scratch_operands = 0 : i64, tpu.core_type = #tpu.core_type<tc>, window_params = [{transform_indices = @transform_0, window_bounds = array<i64: 8, 64>}, {pipeline_mode = #tpu.pipeline_mode<synchronous>, transform_indices = @transform_1, window_bounds = array<i64: 5, 64, 192>}, {pipeline_mode = #tpu.pipeline_mode<synchronous>, transform_indices = @transform_2, window_bounds = array<i64: 5, 1, 192>}, {pipeline_mode = #tpu.pipeline_mode<synchronous>, transform_indices = @transform_3, window_bounds = array<i64: 5, 64, 64>}, {pipeline_mode = #tpu.pipeline_mode<synchronous>, transform_indices = @transform_4, window_bounds = array<i64: 5, 1, 64>}, {pipeline_mode = #tpu.pipeline_mode<synchronous>, transform_indices = @transform_5, window_bounds = array<i64: 5, 64, 8>}, {pipeline_mode = #tpu.pipeline_mode<synchronous>, transform_indices = @transform_6, window_bounds = array<i64: 5, 1, 8>}, {pipeline_mode = #tpu.pipeline_mode<synchronous>, transform_indices = @transform_7, window_bounds = array<i64: 5, 8, 64>}, {pipeline_mode = #tpu.pipeline_mode<synchronous>, transform_indices = @transform_8, window_bounds = array<i64: 5, 1, 64>}, {pipeline_mode = #tpu.pipeline_mode<synchronous>, transform_indices = @transform_9, window_bounds = array<i64: 5, 1, 64>}, {pipeline_mode = #tpu.pipeline_mode<synchronous>, transform_indices = @transform_10, window_bounds = array<i64: 5, 1, 64>}, {pipeline_mode = #tpu.pipeline_mode<synchronous>, transform_indices = @transform_11, window_bounds = array<i64: 5, 1, 64>}, {pipeline_mode = #tpu.pipeline_mode<synchronous>, transform_indices = @transform_12, window_bounds = array<i64: 5, 1, 64>}, {transform_indices = @transform_13, window_bounds = array<i64: 8, 64>}]} {
    %c0 = arith.constant 0 : index
    %c0_0 = arith.constant 0 : index
    %0 = vector.load %arg1[%c0, %c0_0] : memref<8x64xf32, #tpu.memory_space<vmem>>, vector<8x64xf32>
    %c0_1 = arith.constant 0 : index
    %c0_2 = arith.constant 0 : index
    %c0_3 = arith.constant 0 : index
    %1 = vector.load %arg2[%c0_1, %c0_2, %c0_3] : memref<5x64x192xf32, #tpu.memory_space<vmem>>, vector<1x64x192xf32>
    %2 = vector.shape_cast %1 : vector<1x64x192xf32> to vector<64x192xf32>
    %cst = arith.constant dense<0.000000e+00> : vector<8x192xf32>
    %3 = tpu.matmul %0, %2, %cst {dimension_numbers = #tpu.dot_dimension_numbers<[1], [0], [0], [1], [0, 0, 1, 1], [], []>} : vector<8x64xf32>, vector<64x192xf32>, vector<8x192xf32> -> vector<8x192xf32>
    %c0_4 = arith.constant 0 : index
    %c0_5 = arith.constant 0 : index
    %c0_6 = arith.constant 0 : index
    %4 = vector.load %arg3[%c0_4, %c0_5, %c0_6] : memref<5x1x192xf32, #tpu.memory_space<vmem>>, vector<1x1x192xf32>
    %5 = vector.shape_cast %4 : vector<1x1x192xf32> to vector<1x192xf32>
    %6 = vector.broadcast %5 : vector<1x192xf32> to vector<8x192xf32>
    %7 = arith.addf %3, %6 : vector<8x192xf32>
    %8 = vector.extract_strided_slice %7 {offsets = [0, 0], sizes = [8, 16], strides = [1, 1]} : vector<8x192xf32> to vector<8x16xf32>
    %9 = vector.extract_strided_slice %7 {offsets = [0, 16], sizes = [8, 16], strides = [1, 1]} : vector<8x192xf32> to vector<8x16xf32>
    %10 = vector.extract_strided_slice %7 {offsets = [0, 32], sizes = [8, 16], strides = [1, 1]} : vector<8x192xf32> to vector<8x16xf32>
    %11 = vector.extract_strided_slice %7 {offsets = [0, 48], sizes = [8, 16], strides = [1, 1]} : vector<8x192xf32> to vector<8x16xf32>
    %12 = vector.shape_cast %8 : vector<8x16xf32> to vector<1x8x16xf32>
    %13 = vector.shape_cast %9 : vector<8x16xf32> to vector<1x8x16xf32>
    %14 = vector.shape_cast %10 : vector<8x16xf32> to vector<1x8x16xf32>
    %15 = vector.shape_cast %11 : vector<8x16xf32> to vector<1x8x16xf32>
    %16 = tpu.concatenate %12, %13, %14, %15 in 0 : vector<1x8x16xf32>, vector<1x8x16xf32>, vector<1x8x16xf32>, vector<1x8x16xf32> -> vector<4x8x16xf32>
    %17 = vector.extract_strided_slice %7 {offsets = [0, 64], sizes = [8, 16], strides = [1, 1]} : vector<8x192xf32> to vector<8x16xf32>
    %18 = vector.extract_strided_slice %7 {offsets = [0, 80], sizes = [8, 16], strides = [1, 1]} : vector<8x192xf32> to vector<8x16xf32>
    %19 = vector.extract_strided_slice %7 {offsets = [0, 96], sizes = [8, 16], strides = [1, 1]} : vector<8x192xf32> to vector<8x16xf32>
    %20 = vector.extract_strided_slice %7 {offsets = [0, 112], sizes = [8, 16], strides = [1, 1]} : vector<8x192xf32> to vector<8x16xf32>
    %21 = vector.shape_cast %17 : vector<8x16xf32> to vector<1x8x16xf32>
    %22 = vector.shape_cast %18 : vector<8x16xf32> to vector<1x8x16xf32>
    %23 = vector.shape_cast %19 : vector<8x16xf32> to vector<1x8x16xf32>
    %24 = vector.shape_cast %20 : vector<8x16xf32> to vector<1x8x16xf32>
    %25 = tpu.concatenate %21, %22, %23, %24 in 0 : vector<1x8x16xf32>, vector<1x8x16xf32>, vector<1x8x16xf32>, vector<1x8x16xf32> -> vector<4x8x16xf32>
    %26 = vector.extract_strided_slice %7 {offsets = [0, 128], sizes = [8, 16], strides = [1, 1]} : vector<8x192xf32> to vector<8x16xf32>
    %27 = vector.extract_strided_slice %7 {offsets = [0, 144], sizes = [8, 16], strides = [1, 1]} : vector<8x192xf32> to vector<8x16xf32>
    %28 = vector.extract_strided_slice %7 {offsets = [0, 160], sizes = [8, 16], strides = [1, 1]} : vector<8x192xf32> to vector<8x16xf32>
    %29 = vector.extract_strided_slice %7 {offsets = [0, 176], sizes = [8, 16], strides = [1, 1]} : vector<8x192xf32> to vector<8x16xf32>
    %30 = vector.shape_cast %26 : vector<8x16xf32> to vector<1x8x16xf32>
    %31 = vector.shape_cast %27 : vector<8x16xf32> to vector<1x8x16xf32>
    %32 = vector.shape_cast %28 : vector<8x16xf32> to vector<1x8x16xf32>
    %33 = vector.shape_cast %29 : vector<8x16xf32> to vector<1x8x16xf32>
    %34 = tpu.concatenate %30, %31, %32, %33 in 0 : vector<1x8x16xf32>, vector<1x8x16xf32>, vector<1x8x16xf32>, vector<1x8x16xf32> -> vector<4x8x16xf32>
    "tpu.trace_start"() <{level = 10 : i32, message = "hqf,hkf->hqk"}> : () -> ()
    %cst_7 = arith.constant dense<0.000000e+00> : vector<4x8x8xf32>
    %35 = tpu.matmul %16, %25, %cst_7 {dimension_numbers = #tpu.dot_dimension_numbers<[2], [2], [1], [1], [0, 0, 0, 1, 1, 1], [0], [0]>} : vector<4x8x16xf32>, vector<4x8x16xf32>, vector<4x8x8xf32> -> vector<4x8x8xf32>
    "tpu.trace_stop"() : () -> ()
    %cst_8 = arith.constant 2.500000e-01 : f32
    %36 = vector.broadcast %cst_8 : f32 to vector<4x8x8xf32>
    %37 = arith.mulf %35, %36 : vector<4x8x8xf32>
    %cst_9 = arith.constant dense<0xFF800000> : vector<4x8xf32>
    %38 = vector.multi_reduction <maximumf>, %37, %cst_9 [2] : vector<4x8x8xf32> to vector<4x8xf32>
    %39 = vector.shape_cast %38 : vector<4x8xf32> to vector<4x8x1xf32>
    %40 = vector.broadcast %39 : vector<4x8x1xf32> to vector<4x8x8xf32>
    %41 = arith.subf %37, %40 : vector<4x8x8xf32>
    %42 = math.exp %41 : vector<4x8x8xf32>
    %cst_10 = arith.constant dense<0.000000e+00> : vector<4x8xf32>
    %43 = vector.multi_reduction <add>, %42, %cst_10 [2] : vector<4x8x8xf32> to vector<4x8xf32>
    %44 = vector.shape_cast %43 : vector<4x8xf32> to vector<4x8x1xf32>
    %45 = vector.broadcast %44 : vector<4x8x1xf32> to vector<4x8x8xf32>
    %46 = arith.divf %42, %45 : vector<4x8x8xf32>
    "tpu.trace_start"() <{level = 10 : i32, message = "hqk,hkf->hqf"}> : () -> ()
    %cst_11 = arith.constant dense<0.000000e+00> : vector<4x8x16xf32>
    %47 = tpu.matmul %46, %34, %cst_11 {dimension_numbers = #tpu.dot_dimension_numbers<[2], [1], [1], [2], [0, 0, 0, 1, 1, 2], [0], [0]>} : vector<4x8x8xf32>, vector<4x8x16xf32>, vector<4x8x16xf32> -> vector<4x8x16xf32>
    "tpu.trace_stop"() : () -> ()
    %48 = vector.extract_strided_slice %47 {offsets = [0, 0, 0], sizes = [1, 8, 16], strides = [1, 1, 1]} : vector<4x8x16xf32> to vector<1x8x16xf32>
    %49 = vector.shape_cast %48 : vector<1x8x16xf32> to vector<8x16xf32>
    %50 = vector.extract_strided_slice %47 {offsets = [1, 0, 0], sizes = [1, 8, 16], strides = [1, 1, 1]} : vector<4x8x16xf32> to vector<1x8x16xf32>
    %51 = vector.shape_cast %50 : vector<1x8x16xf32> to vector<8x16xf32>
    %52 = vector.extract_strided_slice %47 {offsets = [2, 0, 0], sizes = [1, 8, 16], strides = [1, 1, 1]} : vector<4x8x16xf32> to vector<1x8x16xf32>
    %53 = vector.shape_cast %52 : vector<1x8x16xf32> to vector<8x16xf32>
    %54 = vector.extract_strided_slice %47 {offsets = [3, 0, 0], sizes = [1, 8, 16], strides = [1, 1, 1]} : vector<4x8x16xf32> to vector<1x8x16xf32>
    %55 = vector.shape_cast %54 : vector<1x8x16xf32> to vector<8x16xf32>
    %56 = tpu.concatenate %49, %51, %53, %55 in 1 : vector<8x16xf32>, vector<8x16xf32>, vector<8x16xf32>, vector<8x16xf32> -> vector<8x64xf32>
    %c0_12 = arith.constant 0 : index
    %c0_13 = arith.constant 0 : index
    %c0_14 = arith.constant 0 : index
    %57 = vector.load %arg4[%c0_12, %c0_13, %c0_14] : memref<5x64x64xf32, #tpu.memory_space<vmem>>, vector<1x64x64xf32>
    %58 = vector.shape_cast %57 : vector<1x64x64xf32> to vector<64x64xf32>
    %cst_15 = arith.constant dense<0.000000e+00> : vector<8x64xf32>
    %59 = tpu.matmul %56, %58, %cst_15 {dimension_numbers = #tpu.dot_dimension_numbers<[1], [0], [0], [1], [0, 0, 1, 1], [], []>} : vector<8x64xf32>, vector<64x64xf32>, vector<8x64xf32> -> vector<8x64xf32>
    %c0_16 = arith.constant 0 : index
    %c0_17 = arith.constant 0 : index
    %c0_18 = arith.constant 0 : index
    %60 = vector.load %arg5[%c0_16, %c0_17, %c0_18] : memref<5x1x64xf32, #tpu.memory_space<vmem>>, vector<1x1x64xf32>
    %61 = vector.shape_cast %60 : vector<1x1x64xf32> to vector<1x64xf32>
    %62 = vector.broadcast %61 : vector<1x64xf32> to vector<8x64xf32>
    %63 = arith.addf %59, %62 : vector<8x64xf32>
    %64 = arith.addf %0, %63 : vector<8x64xf32>
    %c0_19 = arith.constant 0 : index
    %c0_20 = arith.constant 0 : index
    %c0_21 = arith.constant 0 : index
    %65 = vector.load %arg10[%c0_19, %c0_20, %c0_21] : memref<5x1x64xf32, #tpu.memory_space<vmem>>, vector<1x1x64xf32>
    %66 = vector.shape_cast %65 : vector<1x1x64xf32> to vector<1x64xf32>
    %c0_22 = arith.constant 0 : index
    %c0_23 = arith.constant 0 : index
    %c0_24 = arith.constant 0 : index
    %67 = vector.load %arg11[%c0_22, %c0_23, %c0_24] : memref<5x1x64xf32, #tpu.memory_space<vmem>>, vector<1x1x64xf32>
    %68 = vector.shape_cast %67 : vector<1x1x64xf32> to vector<1x64xf32>
    %cst_25 = arith.constant dense<0.000000e+00> : vector<8xf32>
    %69 = vector.multi_reduction <add>, %64, %cst_25 [1] : vector<8x64xf32> to vector<8xf32>
    %70 = vector.shape_cast %69 : vector<8xf32> to vector<8x1xf32>
    %cst_26 = arith.constant 6.400000e+01 : f32
    %71 = vector.broadcast %cst_26 : f32 to vector<8x1xf32>
    %72 = arith.divf %70, %71 : vector<8x1xf32>
    %73 = vector.broadcast %72 : vector<8x1xf32> to vector<8x64xf32>
    %74 = arith.subf %64, %73 : vector<8x64xf32>
    %75 = arith.mulf %74, %74 : vector<8x64xf32>
    %cst_27 = arith.constant dense<0.000000e+00> : vector<8xf32>
    %76 = vector.multi_reduction <add>, %75, %cst_27 [1] : vector<8x64xf32> to vector<8xf32>
    %77 = vector.shape_cast %76 : vector<8xf32> to vector<8x1xf32>
    %cst_28 = arith.constant 6.400000e+01 : f32
    %78 = vector.broadcast %cst_28 : f32 to vector<8x1xf32>
    %79 = arith.divf %77, %78 : vector<8x1xf32>
    %cst_29 = arith.constant 9.99999974E-6 : f32
    %80 = vector.broadcast %cst_29 : f32 to vector<8x1xf32>
    %81 = arith.addf %79, %80 : vector<8x1xf32>
    %82 = math.rsqrt %81 : vector<8x1xf32>
    %83 = vector.broadcast %82 : vector<8x1xf32> to vector<8x64xf32>
    %84 = arith.mulf %74, %83 : vector<8x64xf32>
    %85 = vector.broadcast %66 : vector<1x64xf32> to vector<8x64xf32>
    %86 = arith.mulf %84, %85 : vector<8x64xf32>
    %87 = vector.broadcast %68 : vector<1x64xf32> to vector<8x64xf32>
    %88 = arith.addf %86, %87 : vector<8x64xf32>
    %c0_30 = arith.constant 0 : index
    %c0_31 = arith.constant 0 : index
    %c0_32 = arith.constant 0 : index
    %89 = vector.load %arg6[%c0_30, %c0_31, %c0_32] : memref<5x64x8xf32, #tpu.memory_space<vmem>>, vector<1x64x8xf32>
    %90 = vector.shape_cast %89 : vector<1x64x8xf32> to vector<64x8xf32>
    %cst_33 = arith.constant dense<0.000000e+00> : vector<8x8xf32>
    %91 = tpu.matmul %88, %90, %cst_33 {dimension_numbers = #tpu.dot_dimension_numbers<[1], [0], [0], [1], [0, 0, 1, 1], [], []>} : vector<8x64xf32>, vector<64x8xf32>, vector<8x8xf32> -> vector<8x8xf32>
    %c0_34 = arith.constant 0 : index
    %c0_35 = arith.constant 0 : index
    %c0_36 = arith.constant 0 : index
    %92 = vector.load %arg7[%c0_34, %c0_35, %c0_36] : memref<5x1x8xf32, #tpu.memory_space<vmem>>, vector<1x1x8xf32>
    %93 = vector.shape_cast %92 : vector<1x1x8xf32> to vector<1x8xf32>
    %94 = vector.broadcast %93 : vector<1x8xf32> to vector<8x8xf32>
    %95 = arith.addf %91, %94 : vector<8x8xf32>
    %cst_37 = arith.constant 5.000000e-01 : f32
    %96 = vector.broadcast %cst_37 : f32 to vector<8x8xf32>
    %97 = arith.mulf %96, %95 : vector<8x8xf32>
    %cst_38 = arith.constant 0.707106769 : f32
    %98 = vector.broadcast %cst_38 : f32 to vector<8x8xf32>
    %99 = arith.mulf %95, %98 : vector<8x8xf32>
    %cst_39 = arith.constant 0.000000e+00 : f32
    %100 = vector.broadcast %cst_39 : f32 to vector<8x8xf32>
    %101 = arith.cmpf oge, %99, %100 : vector<8x8xf32>
    %cst_40 = arith.constant 1.000000e+00 : f32
    %cst_41 = arith.constant -1.000000e+00 : f32
    %102 = vector.broadcast %cst_40 : f32 to vector<8x8xf32>
    %103 = vector.broadcast %cst_41 : f32 to vector<8x8xf32>
    %104 = arith.select %101, %102, %103 : vector<8x8xi1>, vector<8x8xf32>
    %105 = math.absf %99 : vector<8x8xf32>
    %cst_42 = arith.constant 0.327591091 : f32
    %106 = vector.broadcast %cst_42 : f32 to vector<8x8xf32>
    %107 = arith.mulf %106, %105 : vector<8x8xf32>
    %cst_43 = arith.constant 1.000000e+00 : f32
    %108 = vector.broadcast %cst_43 : f32 to vector<8x8xf32>
    %109 = arith.addf %108, %107 : vector<8x8xf32>
    %cst_44 = arith.constant 1.000000e+00 : f32
    %110 = vector.broadcast %cst_44 : f32 to vector<8x8xf32>
    %111 = arith.divf %110, %109 : vector<8x8xf32>
    %cst_45 = arith.constant 1.06140542 : f32
    %112 = vector.broadcast %cst_45 : f32 to vector<8x8xf32>
    %113 = arith.mulf %112, %111 : vector<8x8xf32>
    %cst_46 = arith.constant -1.45315206 : f32
    %114 = vector.broadcast %cst_46 : f32 to vector<8x8xf32>
    %115 = arith.addf %113, %114 : vector<8x8xf32>
    %116 = arith.mulf %115, %111 : vector<8x8xf32>
    %cst_47 = arith.constant 1.42141378 : f32
    %117 = vector.broadcast %cst_47 : f32 to vector<8x8xf32>
    %118 = arith.addf %116, %117 : vector<8x8xf32>
    %119 = arith.mulf %118, %111 : vector<8x8xf32>
    %cst_48 = arith.constant -0.284496725 : f32
    %120 = vector.broadcast %cst_48 : f32 to vector<8x8xf32>
    %121 = arith.addf %119, %120 : vector<8x8xf32>
    %122 = arith.mulf %121, %111 : vector<8x8xf32>
    %cst_49 = arith.constant 0.254829586 : f32
    %123 = vector.broadcast %cst_49 : f32 to vector<8x8xf32>
    %124 = arith.addf %122, %123 : vector<8x8xf32>
    %125 = arith.mulf %124, %111 : vector<8x8xf32>
    %cst_50 = arith.constant 0.000000e+00 : f32
    %126 = vector.broadcast %cst_50 : f32 to vector<8x8xf32>
    %127 = arith.subf %126, %105 : vector<8x8xf32>
    %128 = arith.mulf %127, %105 : vector<8x8xf32>
    %129 = math.exp %128 : vector<8x8xf32>
    %130 = arith.mulf %125, %129 : vector<8x8xf32>
    %cst_51 = arith.constant 1.000000e+00 : f32
    %131 = vector.broadcast %cst_51 : f32 to vector<8x8xf32>
    %132 = arith.subf %131, %130 : vector<8x8xf32>
    %133 = arith.mulf %104, %132 : vector<8x8xf32>
    %cst_52 = arith.constant 1.000000e+00 : f32
    %134 = vector.broadcast %cst_52 : f32 to vector<8x8xf32>
    %135 = arith.addf %134, %133 : vector<8x8xf32>
    %136 = arith.mulf %97, %135 : vector<8x8xf32>
    %c0_53 = arith.constant 0 : index
    %c0_54 = arith.constant 0 : index
    %c0_55 = arith.constant 0 : index
    %137 = vector.load %arg8[%c0_53, %c0_54, %c0_55] : memref<5x8x64xf32, #tpu.memory_space<vmem>>, vector<1x8x64xf32>
    %138 = vector.shape_cast %137 : vector<1x8x64xf32> to vector<8x64xf32>
    %cst_56 = arith.constant dense<0.000000e+00> : vector<8x64xf32>
    %139 = tpu.matmul %136, %138, %cst_56 {dimension_numbers = #tpu.dot_dimension_numbers<[1], [0], [0], [1], [0, 0, 1, 1], [], []>} : vector<8x8xf32>, vector<8x64xf32>, vector<8x64xf32> -> vector<8x64xf32>
    %c0_57 = arith.constant 0 : index
    %c0_58 = arith.constant 0 : index
    %c0_59 = arith.constant 0 : index
    %140 = vector.load %arg9[%c0_57, %c0_58, %c0_59] : memref<5x1x64xf32, #tpu.memory_space<vmem>>, vector<1x1x64xf32>
    %141 = vector.shape_cast %140 : vector<1x1x64xf32> to vector<1x64xf32>
    %142 = vector.broadcast %141 : vector<1x64xf32> to vector<8x64xf32>
    %143 = arith.addf %139, %142 : vector<8x64xf32>
    %144 = arith.addf %88, %143 : vector<8x64xf32>
    %c0_60 = arith.constant 0 : index
    %c0_61 = arith.constant 0 : index
    %c0_62 = arith.constant 0 : index
    %145 = vector.load %arg12[%c0_60, %c0_61, %c0_62] : memref<5x1x64xf32, #tpu.memory_space<vmem>>, vector<1x1x64xf32>
    %146 = vector.shape_cast %145 : vector<1x1x64xf32> to vector<1x64xf32>
    %c0_63 = arith.constant 0 : index
    %c0_64 = arith.constant 0 : index
    %c0_65 = arith.constant 0 : index
    %147 = vector.load %arg13[%c0_63, %c0_64, %c0_65] : memref<5x1x64xf32, #tpu.memory_space<vmem>>, vector<1x1x64xf32>
    %148 = vector.shape_cast %147 : vector<1x1x64xf32> to vector<1x64xf32>
    %cst_66 = arith.constant dense<0.000000e+00> : vector<8xf32>
    %149 = vector.multi_reduction <add>, %144, %cst_66 [1] : vector<8x64xf32> to vector<8xf32>
    %150 = vector.shape_cast %149 : vector<8xf32> to vector<8x1xf32>
    %cst_67 = arith.constant 6.400000e+01 : f32
    %151 = vector.broadcast %cst_67 : f32 to vector<8x1xf32>
    %152 = arith.divf %150, %151 : vector<8x1xf32>
    %153 = vector.broadcast %152 : vector<8x1xf32> to vector<8x64xf32>
    %154 = arith.subf %144, %153 : vector<8x64xf32>
    %155 = arith.mulf %154, %154 : vector<8x64xf32>
    %cst_68 = arith.constant dense<0.000000e+00> : vector<8xf32>
    %156 = vector.multi_reduction <add>, %155, %cst_68 [1] : vector<8x64xf32> to vector<8xf32>
    %157 = vector.shape_cast %156 : vector<8xf32> to vector<8x1xf32>
    %cst_69 = arith.constant 6.400000e+01 : f32
    %158 = vector.broadcast %cst_69 : f32 to vector<8x1xf32>
    %159 = arith.divf %157, %158 : vector<8x1xf32>
    %cst_70 = arith.constant 9.99999974E-6 : f32
    %160 = vector.broadcast %cst_70 : f32 to vector<8x1xf32>
    %161 = arith.addf %159, %160 : vector<8x1xf32>
    %162 = math.rsqrt %161 : vector<8x1xf32>
    %163 = vector.broadcast %162 : vector<8x1xf32> to vector<8x64xf32>
    %164 = arith.mulf %154, %163 : vector<8x64xf32>
    %165 = vector.broadcast %146 : vector<1x64xf32> to vector<8x64xf32>
    %166 = arith.mulf %164, %165 : vector<8x64xf32>
    %167 = vector.broadcast %148 : vector<1x64xf32> to vector<8x64xf32>
    %168 = arith.addf %166, %167 : vector<8x64xf32>
    %c1 = arith.constant 1 : index
    %c0_71 = arith.constant 0 : index
    %c0_72 = arith.constant 0 : index
    %169 = vector.load %arg2[%c1, %c0_71, %c0_72] : memref<5x64x192xf32, #tpu.memory_space<vmem>>, vector<1x64x192xf32>
    %170 = vector.shape_cast %169 : vector<1x64x192xf32> to vector<64x192xf32>
    %cst_73 = arith.constant dense<0.000000e+00> : vector<8x192xf32>
    %171 = tpu.matmul %168, %170, %cst_73 {dimension_numbers = #tpu.dot_dimension_numbers<[1], [0], [0], [1], [0, 0, 1, 1], [], []>} : vector<8x64xf32>, vector<64x192xf32>, vector<8x192xf32> -> vector<8x192xf32>
    %c1_74 = arith.constant 1 : index
    %c0_75 = arith.constant 0 : index
    %c0_76 = arith.constant 0 : index
    %172 = vector.load %arg3[%c1_74, %c0_75, %c0_76] : memref<5x1x192xf32, #tpu.memory_space<vmem>>, vector<1x1x192xf32>
    %173 = vector.shape_cast %172 : vector<1x1x192xf32> to vector<1x192xf32>
    %174 = vector.broadcast %173 : vector<1x192xf32> to vector<8x192xf32>
    %175 = arith.addf %171, %174 : vector<8x192xf32>
    %176 = vector.extract_strided_slice %175 {offsets = [0, 0], sizes = [8, 16], strides = [1, 1]} : vector<8x192xf32> to vector<8x16xf32>
    %177 = vector.extract_strided_slice %175 {offsets = [0, 16], sizes = [8, 16], strides = [1, 1]} : vector<8x192xf32> to vector<8x16xf32>
    %178 = vector.extract_strided_slice %175 {offsets = [0, 32], sizes = [8, 16], strides = [1, 1]} : vector<8x192xf32> to vector<8x16xf32>
    %179 = vector.extract_strided_slice %175 {offsets = [0, 48], sizes = [8, 16], strides = [1, 1]} : vector<8x192xf32> to vector<8x16xf32>
    %180 = vector.shape_cast %176 : vector<8x16xf32> to vector<1x8x16xf32>
    %181 = vector.shape_cast %177 : vector<8x16xf32> to vector<1x8x16xf32>
    %182 = vector.shape_cast %178 : vector<8x16xf32> to vector<1x8x16xf32>
    %183 = vector.shape_cast %179 : vector<8x16xf32> to vector<1x8x16xf32>
    %184 = tpu.concatenate %180, %181, %182, %183 in 0 : vector<1x8x16xf32>, vector<1x8x16xf32>, vector<1x8x16xf32>, vector<1x8x16xf32> -> vector<4x8x16xf32>
    %185 = vector.extract_strided_slice %175 {offsets = [0, 64], sizes = [8, 16], strides = [1, 1]} : vector<8x192xf32> to vector<8x16xf32>
    %186 = vector.extract_strided_slice %175 {offsets = [0, 80], sizes = [8, 16], strides = [1, 1]} : vector<8x192xf32> to vector<8x16xf32>
    %187 = vector.extract_strided_slice %175 {offsets = [0, 96], sizes = [8, 16], strides = [1, 1]} : vector<8x192xf32> to vector<8x16xf32>
    %188 = vector.extract_strided_slice %175 {offsets = [0, 112], sizes = [8, 16], strides = [1, 1]} : vector<8x192xf32> to vector<8x16xf32>
    %189 = vector.shape_cast %185 : vector<8x16xf32> to vector<1x8x16xf32>
    %190 = vector.shape_cast %186 : vector<8x16xf32> to vector<1x8x16xf32>
    %191 = vector.shape_cast %187 : vector<8x16xf32> to vector<1x8x16xf32>
    %192 = vector.shape_cast %188 : vector<8x16xf32> to vector<1x8x16xf32>
    %193 = tpu.concatenate %189, %190, %191, %192 in 0 : vector<1x8x16xf32>, vector<1x8x16xf32>, vector<1x8x16xf32>, vector<1x8x16xf32> -> vector<4x8x16xf32>
    %194 = vector.extract_strided_slice %175 {offsets = [0, 128], sizes = [8, 16], strides = [1, 1]} : vector<8x192xf32> to vector<8x16xf32>
    %195 = vector.extract_strided_slice %175 {offsets = [0, 144], sizes = [8, 16], strides = [1, 1]} : vector<8x192xf32> to vector<8x16xf32>
    %196 = vector.extract_strided_slice %175 {offsets = [0, 160], sizes = [8, 16], strides = [1, 1]} : vector<8x192xf32> to vector<8x16xf32>
    %197 = vector.extract_strided_slice %175 {offsets = [0, 176], sizes = [8, 16], strides = [1, 1]} : vector<8x192xf32> to vector<8x16xf32>
    %198 = vector.shape_cast %194 : vector<8x16xf32> to vector<1x8x16xf32>
    %199 = vector.shape_cast %195 : vector<8x16xf32> to vector<1x8x16xf32>
    %200 = vector.shape_cast %196 : vector<8x16xf32> to vector<1x8x16xf32>
    %201 = vector.shape_cast %197 : vector<8x16xf32> to vector<1x8x16xf32>
    %202 = tpu.concatenate %198, %199, %200, %201 in 0 : vector<1x8x16xf32>, vector<1x8x16xf32>, vector<1x8x16xf32>, vector<1x8x16xf32> -> vector<4x8x16xf32>
    "tpu.trace_start"() <{level = 10 : i32, message = "hqf,hkf->hqk"}> : () -> ()
    %cst_77 = arith.constant dense<0.000000e+00> : vector<4x8x8xf32>
    %203 = tpu.matmul %184, %193, %cst_77 {dimension_numbers = #tpu.dot_dimension_numbers<[2], [2], [1], [1], [0, 0, 0, 1, 1, 1], [0], [0]>} : vector<4x8x16xf32>, vector<4x8x16xf32>, vector<4x8x8xf32> -> vector<4x8x8xf32>
    "tpu.trace_stop"() : () -> ()
    %cst_78 = arith.constant 2.500000e-01 : f32
    %204 = vector.broadcast %cst_78 : f32 to vector<4x8x8xf32>
    %205 = arith.mulf %203, %204 : vector<4x8x8xf32>
    %cst_79 = arith.constant dense<0xFF800000> : vector<4x8xf32>
    %206 = vector.multi_reduction <maximumf>, %205, %cst_79 [2] : vector<4x8x8xf32> to vector<4x8xf32>
    %207 = vector.shape_cast %206 : vector<4x8xf32> to vector<4x8x1xf32>
    %208 = vector.broadcast %207 : vector<4x8x1xf32> to vector<4x8x8xf32>
    %209 = arith.subf %205, %208 : vector<4x8x8xf32>
    %210 = math.exp %209 : vector<4x8x8xf32>
    %cst_80 = arith.constant dense<0.000000e+00> : vector<4x8xf32>
    %211 = vector.multi_reduction <add>, %210, %cst_80 [2] : vector<4x8x8xf32> to vector<4x8xf32>
    %212 = vector.shape_cast %211 : vector<4x8xf32> to vector<4x8x1xf32>
    %213 = vector.broadcast %212 : vector<4x8x1xf32> to vector<4x8x8xf32>
    %214 = arith.divf %210, %213 : vector<4x8x8xf32>
    "tpu.trace_start"() <{level = 10 : i32, message = "hqk,hkf->hqf"}> : () -> ()
    %cst_81 = arith.constant dense<0.000000e+00> : vector<4x8x16xf32>
    %215 = tpu.matmul %214, %202, %cst_81 {dimension_numbers = #tpu.dot_dimension_numbers<[2], [1], [1], [2], [0, 0, 0, 1, 1, 2], [0], [0]>} : vector<4x8x8xf32>, vector<4x8x16xf32>, vector<4x8x16xf32> -> vector<4x8x16xf32>
    "tpu.trace_stop"() : () -> ()
    %216 = vector.extract_strided_slice %215 {offsets = [0, 0, 0], sizes = [1, 8, 16], strides = [1, 1, 1]} : vector<4x8x16xf32> to vector<1x8x16xf32>
    %217 = vector.shape_cast %216 : vector<1x8x16xf32> to vector<8x16xf32>
    %218 = vector.extract_strided_slice %215 {offsets = [1, 0, 0], sizes = [1, 8, 16], strides = [1, 1, 1]} : vector<4x8x16xf32> to vector<1x8x16xf32>
    %219 = vector.shape_cast %218 : vector<1x8x16xf32> to vector<8x16xf32>
    %220 = vector.extract_strided_slice %215 {offsets = [2, 0, 0], sizes = [1, 8, 16], strides = [1, 1, 1]} : vector<4x8x16xf32> to vector<1x8x16xf32>
    %221 = vector.shape_cast %220 : vector<1x8x16xf32> to vector<8x16xf32>
    %222 = vector.extract_strided_slice %215 {offsets = [3, 0, 0], sizes = [1, 8, 16], strides = [1, 1, 1]} : vector<4x8x16xf32> to vector<1x8x16xf32>
    %223 = vector.shape_cast %222 : vector<1x8x16xf32> to vector<8x16xf32>
    %224 = tpu.concatenate %217, %219, %221, %223 in 1 : vector<8x16xf32>, vector<8x16xf32>, vector<8x16xf32>, vector<8x16xf32> -> vector<8x64xf32>
    %c1_82 = arith.constant 1 : index
    %c0_83 = arith.constant 0 : index
    %c0_84 = arith.constant 0 : index
    %225 = vector.load %arg4[%c1_82, %c0_83, %c0_84] : memref<5x64x64xf32, #tpu.memory_space<vmem>>, vector<1x64x64xf32>
    %226 = vector.shape_cast %225 : vector<1x64x64xf32> to vector<64x64xf32>
    %cst_85 = arith.constant dense<0.000000e+00> : vector<8x64xf32>
    %227 = tpu.matmul %224, %226, %cst_85 {dimension_numbers = #tpu.dot_dimension_numbers<[1], [0], [0], [1], [0, 0, 1, 1], [], []>} : vector<8x64xf32>, vector<64x64xf32>, vector<8x64xf32> -> vector<8x64xf32>
    %c1_86 = arith.constant 1 : index
    %c0_87 = arith.constant 0 : index
    %c0_88 = arith.constant 0 : index
    %228 = vector.load %arg5[%c1_86, %c0_87, %c0_88] : memref<5x1x64xf32, #tpu.memory_space<vmem>>, vector<1x1x64xf32>
    %229 = vector.shape_cast %228 : vector<1x1x64xf32> to vector<1x64xf32>
    %230 = vector.broadcast %229 : vector<1x64xf32> to vector<8x64xf32>
    %231 = arith.addf %227, %230 : vector<8x64xf32>
    %232 = arith.addf %168, %231 : vector<8x64xf32>
    %c1_89 = arith.constant 1 : index
    %c0_90 = arith.constant 0 : index
    %c0_91 = arith.constant 0 : index
    %233 = vector.load %arg10[%c1_89, %c0_90, %c0_91] : memref<5x1x64xf32, #tpu.memory_space<vmem>>, vector<1x1x64xf32>
    %234 = vector.shape_cast %233 : vector<1x1x64xf32> to vector<1x64xf32>
    %c1_92 = arith.constant 1 : index
    %c0_93 = arith.constant 0 : index
    %c0_94 = arith.constant 0 : index
    %235 = vector.load %arg11[%c1_92, %c0_93, %c0_94] : memref<5x1x64xf32, #tpu.memory_space<vmem>>, vector<1x1x64xf32>
    %236 = vector.shape_cast %235 : vector<1x1x64xf32> to vector<1x64xf32>
    %cst_95 = arith.constant dense<0.000000e+00> : vector<8xf32>
    %237 = vector.multi_reduction <add>, %232, %cst_95 [1] : vector<8x64xf32> to vector<8xf32>
    %238 = vector.shape_cast %237 : vector<8xf32> to vector<8x1xf32>
    %cst_96 = arith.constant 6.400000e+01 : f32
    %239 = vector.broadcast %cst_96 : f32 to vector<8x1xf32>
    %240 = arith.divf %238, %239 : vector<8x1xf32>
    %241 = vector.broadcast %240 : vector<8x1xf32> to vector<8x64xf32>
    %242 = arith.subf %232, %241 : vector<8x64xf32>
    %243 = arith.mulf %242, %242 : vector<8x64xf32>
    %cst_97 = arith.constant dense<0.000000e+00> : vector<8xf32>
    %244 = vector.multi_reduction <add>, %243, %cst_97 [1] : vector<8x64xf32> to vector<8xf32>
    %245 = vector.shape_cast %244 : vector<8xf32> to vector<8x1xf32>
    %cst_98 = arith.constant 6.400000e+01 : f32
    %246 = vector.broadcast %cst_98 : f32 to vector<8x1xf32>
    %247 = arith.divf %245, %246 : vector<8x1xf32>
    %cst_99 = arith.constant 9.99999974E-6 : f32
    %248 = vector.broadcast %cst_99 : f32 to vector<8x1xf32>
    %249 = arith.addf %247, %248 : vector<8x1xf32>
    %250 = math.rsqrt %249 : vector<8x1xf32>
    %251 = vector.broadcast %250 : vector<8x1xf32> to vector<8x64xf32>
    %252 = arith.mulf %242, %251 : vector<8x64xf32>
    %253 = vector.broadcast %234 : vector<1x64xf32> to vector<8x64xf32>
    %254 = arith.mulf %252, %253 : vector<8x64xf32>
    %255 = vector.broadcast %236 : vector<1x64xf32> to vector<8x64xf32>
    %256 = arith.addf %254, %255 : vector<8x64xf32>
    %c1_100 = arith.constant 1 : index
    %c0_101 = arith.constant 0 : index
    %c0_102 = arith.constant 0 : index
    %257 = vector.load %arg6[%c1_100, %c0_101, %c0_102] : memref<5x64x8xf32, #tpu.memory_space<vmem>>, vector<1x64x8xf32>
    %258 = vector.shape_cast %257 : vector<1x64x8xf32> to vector<64x8xf32>
    %cst_103 = arith.constant dense<0.000000e+00> : vector<8x8xf32>
    %259 = tpu.matmul %256, %258, %cst_103 {dimension_numbers = #tpu.dot_dimension_numbers<[1], [0], [0], [1], [0, 0, 1, 1], [], []>} : vector<8x64xf32>, vector<64x8xf32>, vector<8x8xf32> -> vector<8x8xf32>
    %c1_104 = arith.constant 1 : index
    %c0_105 = arith.constant 0 : index
    %c0_106 = arith.constant 0 : index
    %260 = vector.load %arg7[%c1_104, %c0_105, %c0_106] : memref<5x1x8xf32, #tpu.memory_space<vmem>>, vector<1x1x8xf32>
    %261 = vector.shape_cast %260 : vector<1x1x8xf32> to vector<1x8xf32>
    %262 = vector.broadcast %261 : vector<1x8xf32> to vector<8x8xf32>
    %263 = arith.addf %259, %262 : vector<8x8xf32>
    %cst_107 = arith.constant 5.000000e-01 : f32
    %264 = vector.broadcast %cst_107 : f32 to vector<8x8xf32>
    %265 = arith.mulf %264, %263 : vector<8x8xf32>
    %cst_108 = arith.constant 0.707106769 : f32
    %266 = vector.broadcast %cst_108 : f32 to vector<8x8xf32>
    %267 = arith.mulf %263, %266 : vector<8x8xf32>
    %cst_109 = arith.constant 0.000000e+00 : f32
    %268 = vector.broadcast %cst_109 : f32 to vector<8x8xf32>
    %269 = arith.cmpf oge, %267, %268 : vector<8x8xf32>
    %cst_110 = arith.constant 1.000000e+00 : f32
    %cst_111 = arith.constant -1.000000e+00 : f32
    %270 = vector.broadcast %cst_110 : f32 to vector<8x8xf32>
    %271 = vector.broadcast %cst_111 : f32 to vector<8x8xf32>
    %272 = arith.select %269, %270, %271 : vector<8x8xi1>, vector<8x8xf32>
    %273 = math.absf %267 : vector<8x8xf32>
    %cst_112 = arith.constant 0.327591091 : f32
    %274 = vector.broadcast %cst_112 : f32 to vector<8x8xf32>
    %275 = arith.mulf %274, %273 : vector<8x8xf32>
    %cst_113 = arith.constant 1.000000e+00 : f32
    %276 = vector.broadcast %cst_113 : f32 to vector<8x8xf32>
    %277 = arith.addf %276, %275 : vector<8x8xf32>
    %cst_114 = arith.constant 1.000000e+00 : f32
    %278 = vector.broadcast %cst_114 : f32 to vector<8x8xf32>
    %279 = arith.divf %278, %277 : vector<8x8xf32>
    %cst_115 = arith.constant 1.06140542 : f32
    %280 = vector.broadcast %cst_115 : f32 to vector<8x8xf32>
    %281 = arith.mulf %280, %279 : vector<8x8xf32>
    %cst_116 = arith.constant -1.45315206 : f32
    %282 = vector.broadcast %cst_116 : f32 to vector<8x8xf32>
    %283 = arith.addf %281, %282 : vector<8x8xf32>
    %284 = arith.mulf %283, %279 : vector<8x8xf32>
    %cst_117 = arith.constant 1.42141378 : f32
    %285 = vector.broadcast %cst_117 : f32 to vector<8x8xf32>
    %286 = arith.addf %284, %285 : vector<8x8xf32>
    %287 = arith.mulf %286, %279 : vector<8x8xf32>
    %cst_118 = arith.constant -0.284496725 : f32
    %288 = vector.broadcast %cst_118 : f32 to vector<8x8xf32>
    %289 = arith.addf %287, %288 : vector<8x8xf32>
    %290 = arith.mulf %289, %279 : vector<8x8xf32>
    %cst_119 = arith.constant 0.254829586 : f32
    %291 = vector.broadcast %cst_119 : f32 to vector<8x8xf32>
    %292 = arith.addf %290, %291 : vector<8x8xf32>
    %293 = arith.mulf %292, %279 : vector<8x8xf32>
    %cst_120 = arith.constant 0.000000e+00 : f32
    %294 = vector.broadcast %cst_120 : f32 to vector<8x8xf32>
    %295 = arith.subf %294, %273 : vector<8x8xf32>
    %296 = arith.mulf %295, %273 : vector<8x8xf32>
    %297 = math.exp %296 : vector<8x8xf32>
    %298 = arith.mulf %293, %297 : vector<8x8xf32>
    %cst_121 = arith.constant 1.000000e+00 : f32
    %299 = vector.broadcast %cst_121 : f32 to vector<8x8xf32>
    %300 = arith.subf %299, %298 : vector<8x8xf32>
    %301 = arith.mulf %272, %300 : vector<8x8xf32>
    %cst_122 = arith.constant 1.000000e+00 : f32
    %302 = vector.broadcast %cst_122 : f32 to vector<8x8xf32>
    %303 = arith.addf %302, %301 : vector<8x8xf32>
    %304 = arith.mulf %265, %303 : vector<8x8xf32>
    %c1_123 = arith.constant 1 : index
    %c0_124 = arith.constant 0 : index
    %c0_125 = arith.constant 0 : index
    %305 = vector.load %arg8[%c1_123, %c0_124, %c0_125] : memref<5x8x64xf32, #tpu.memory_space<vmem>>, vector<1x8x64xf32>
    %306 = vector.shape_cast %305 : vector<1x8x64xf32> to vector<8x64xf32>
    %cst_126 = arith.constant dense<0.000000e+00> : vector<8x64xf32>
    %307 = tpu.matmul %304, %306, %cst_126 {dimension_numbers = #tpu.dot_dimension_numbers<[1], [0], [0], [1], [0, 0, 1, 1], [], []>} : vector<8x8xf32>, vector<8x64xf32>, vector<8x64xf32> -> vector<8x64xf32>
    %c1_127 = arith.constant 1 : index
    %c0_128 = arith.constant 0 : index
    %c0_129 = arith.constant 0 : index
    %308 = vector.load %arg9[%c1_127, %c0_128, %c0_129] : memref<5x1x64xf32, #tpu.memory_space<vmem>>, vector<1x1x64xf32>
    %309 = vector.shape_cast %308 : vector<1x1x64xf32> to vector<1x64xf32>
    %310 = vector.broadcast %309 : vector<1x64xf32> to vector<8x64xf32>
    %311 = arith.addf %307, %310 : vector<8x64xf32>
    %312 = arith.addf %256, %311 : vector<8x64xf32>
    %c1_130 = arith.constant 1 : index
    %c0_131 = arith.constant 0 : index
    %c0_132 = arith.constant 0 : index
    %313 = vector.load %arg12[%c1_130, %c0_131, %c0_132] : memref<5x1x64xf32, #tpu.memory_space<vmem>>, vector<1x1x64xf32>
    %314 = vector.shape_cast %313 : vector<1x1x64xf32> to vector<1x64xf32>
    %c1_133 = arith.constant 1 : index
    %c0_134 = arith.constant 0 : index
    %c0_135 = arith.constant 0 : index
    %315 = vector.load %arg13[%c1_133, %c0_134, %c0_135] : memref<5x1x64xf32, #tpu.memory_space<vmem>>, vector<1x1x64xf32>
    %316 = vector.shape_cast %315 : vector<1x1x64xf32> to vector<1x64xf32>
    %cst_136 = arith.constant dense<0.000000e+00> : vector<8xf32>
    %317 = vector.multi_reduction <add>, %312, %cst_136 [1] : vector<8x64xf32> to vector<8xf32>
    %318 = vector.shape_cast %317 : vector<8xf32> to vector<8x1xf32>
    %cst_137 = arith.constant 6.400000e+01 : f32
    %319 = vector.broadcast %cst_137 : f32 to vector<8x1xf32>
    %320 = arith.divf %318, %319 : vector<8x1xf32>
    %321 = vector.broadcast %320 : vector<8x1xf32> to vector<8x64xf32>
    %322 = arith.subf %312, %321 : vector<8x64xf32>
    %323 = arith.mulf %322, %322 : vector<8x64xf32>
    %cst_138 = arith.constant dense<0.000000e+00> : vector<8xf32>
    %324 = vector.multi_reduction <add>, %323, %cst_138 [1] : vector<8x64xf32> to vector<8xf32>
    %325 = vector.shape_cast %324 : vector<8xf32> to vector<8x1xf32>
    %cst_139 = arith.constant 6.400000e+01 : f32
    %326 = vector.broadcast %cst_139 : f32 to vector<8x1xf32>
    %327 = arith.divf %325, %326 : vector<8x1xf32>
    %cst_140 = arith.constant 9.99999974E-6 : f32
    %328 = vector.broadcast %cst_140 : f32 to vector<8x1xf32>
    %329 = arith.addf %327, %328 : vector<8x1xf32>
    %330 = math.rsqrt %329 : vector<8x1xf32>
    %331 = vector.broadcast %330 : vector<8x1xf32> to vector<8x64xf32>
    %332 = arith.mulf %322, %331 : vector<8x64xf32>
    %333 = vector.broadcast %314 : vector<1x64xf32> to vector<8x64xf32>
    %334 = arith.mulf %332, %333 : vector<8x64xf32>
    %335 = vector.broadcast %316 : vector<1x64xf32> to vector<8x64xf32>
    %336 = arith.addf %334, %335 : vector<8x64xf32>
    %c2 = arith.constant 2 : index
    %c0_141 = arith.constant 0 : index
    %c0_142 = arith.constant 0 : index
    %337 = vector.load %arg2[%c2, %c0_141, %c0_142] : memref<5x64x192xf32, #tpu.memory_space<vmem>>, vector<1x64x192xf32>
    %338 = vector.shape_cast %337 : vector<1x64x192xf32> to vector<64x192xf32>
    %cst_143 = arith.constant dense<0.000000e+00> : vector<8x192xf32>
    %339 = tpu.matmul %336, %338, %cst_143 {dimension_numbers = #tpu.dot_dimension_numbers<[1], [0], [0], [1], [0, 0, 1, 1], [], []>} : vector<8x64xf32>, vector<64x192xf32>, vector<8x192xf32> -> vector<8x192xf32>
    %c2_144 = arith.constant 2 : index
    %c0_145 = arith.constant 0 : index
    %c0_146 = arith.constant 0 : index
    %340 = vector.load %arg3[%c2_144, %c0_145, %c0_146] : memref<5x1x192xf32, #tpu.memory_space<vmem>>, vector<1x1x192xf32>
    %341 = vector.shape_cast %340 : vector<1x1x192xf32> to vector<1x192xf32>
    %342 = vector.broadcast %341 : vector<1x192xf32> to vector<8x192xf32>
    %343 = arith.addf %339, %342 : vector<8x192xf32>
    %344 = vector.extract_strided_slice %343 {offsets = [0, 0], sizes = [8, 16], strides = [1, 1]} : vector<8x192xf32> to vector<8x16xf32>
    %345 = vector.extract_strided_slice %343 {offsets = [0, 16], sizes = [8, 16], strides = [1, 1]} : vector<8x192xf32> to vector<8x16xf32>
    %346 = vector.extract_strided_slice %343 {offsets = [0, 32], sizes = [8, 16], strides = [1, 1]} : vector<8x192xf32> to vector<8x16xf32>
    %347 = vector.extract_strided_slice %343 {offsets = [0, 48], sizes = [8, 16], strides = [1, 1]} : vector<8x192xf32> to vector<8x16xf32>
    %348 = vector.shape_cast %344 : vector<8x16xf32> to vector<1x8x16xf32>
    %349 = vector.shape_cast %345 : vector<8x16xf32> to vector<1x8x16xf32>
    %350 = vector.shape_cast %346 : vector<8x16xf32> to vector<1x8x16xf32>
    %351 = vector.shape_cast %347 : vector<8x16xf32> to vector<1x8x16xf32>
    %352 = tpu.concatenate %348, %349, %350, %351 in 0 : vector<1x8x16xf32>, vector<1x8x16xf32>, vector<1x8x16xf32>, vector<1x8x16xf32> -> vector<4x8x16xf32>
    %353 = vector.extract_strided_slice %343 {offsets = [0, 64], sizes = [8, 16], strides = [1, 1]} : vector<8x192xf32> to vector<8x16xf32>
    %354 = vector.extract_strided_slice %343 {offsets = [0, 80], sizes = [8, 16], strides = [1, 1]} : vector<8x192xf32> to vector<8x16xf32>
    %355 = vector.extract_strided_slice %343 {offsets = [0, 96], sizes = [8, 16], strides = [1, 1]} : vector<8x192xf32> to vector<8x16xf32>
    %356 = vector.extract_strided_slice %343 {offsets = [0, 112], sizes = [8, 16], strides = [1, 1]} : vector<8x192xf32> to vector<8x16xf32>
    %357 = vector.shape_cast %353 : vector<8x16xf32> to vector<1x8x16xf32>
    %358 = vector.shape_cast %354 : vector<8x16xf32> to vector<1x8x16xf32>
    %359 = vector.shape_cast %355 : vector<8x16xf32> to vector<1x8x16xf32>
    %360 = vector.shape_cast %356 : vector<8x16xf32> to vector<1x8x16xf32>
    %361 = tpu.concatenate %357, %358, %359, %360 in 0 : vector<1x8x16xf32>, vector<1x8x16xf32>, vector<1x8x16xf32>, vector<1x8x16xf32> -> vector<4x8x16xf32>
    %362 = vector.extract_strided_slice %343 {offsets = [0, 128], sizes = [8, 16], strides = [1, 1]} : vector<8x192xf32> to vector<8x16xf32>
    %363 = vector.extract_strided_slice %343 {offsets = [0, 144], sizes = [8, 16], strides = [1, 1]} : vector<8x192xf32> to vector<8x16xf32>
    %364 = vector.extract_strided_slice %343 {offsets = [0, 160], sizes = [8, 16], strides = [1, 1]} : vector<8x192xf32> to vector<8x16xf32>
    %365 = vector.extract_strided_slice %343 {offsets = [0, 176], sizes = [8, 16], strides = [1, 1]} : vector<8x192xf32> to vector<8x16xf32>
    %366 = vector.shape_cast %362 : vector<8x16xf32> to vector<1x8x16xf32>
    %367 = vector.shape_cast %363 : vector<8x16xf32> to vector<1x8x16xf32>
    %368 = vector.shape_cast %364 : vector<8x16xf32> to vector<1x8x16xf32>
    %369 = vector.shape_cast %365 : vector<8x16xf32> to vector<1x8x16xf32>
    %370 = tpu.concatenate %366, %367, %368, %369 in 0 : vector<1x8x16xf32>, vector<1x8x16xf32>, vector<1x8x16xf32>, vector<1x8x16xf32> -> vector<4x8x16xf32>
    "tpu.trace_start"() <{level = 10 : i32, message = "hqf,hkf->hqk"}> : () -> ()
    %cst_147 = arith.constant dense<0.000000e+00> : vector<4x8x8xf32>
    %371 = tpu.matmul %352, %361, %cst_147 {dimension_numbers = #tpu.dot_dimension_numbers<[2], [2], [1], [1], [0, 0, 0, 1, 1, 1], [0], [0]>} : vector<4x8x16xf32>, vector<4x8x16xf32>, vector<4x8x8xf32> -> vector<4x8x8xf32>
    "tpu.trace_stop"() : () -> ()
    %cst_148 = arith.constant 2.500000e-01 : f32
    %372 = vector.broadcast %cst_148 : f32 to vector<4x8x8xf32>
    %373 = arith.mulf %371, %372 : vector<4x8x8xf32>
    %cst_149 = arith.constant dense<0xFF800000> : vector<4x8xf32>
    %374 = vector.multi_reduction <maximumf>, %373, %cst_149 [2] : vector<4x8x8xf32> to vector<4x8xf32>
    %375 = vector.shape_cast %374 : vector<4x8xf32> to vector<4x8x1xf32>
    %376 = vector.broadcast %375 : vector<4x8x1xf32> to vector<4x8x8xf32>
    %377 = arith.subf %373, %376 : vector<4x8x8xf32>
    %378 = math.exp %377 : vector<4x8x8xf32>
    %cst_150 = arith.constant dense<0.000000e+00> : vector<4x8xf32>
    %379 = vector.multi_reduction <add>, %378, %cst_150 [2] : vector<4x8x8xf32> to vector<4x8xf32>
    %380 = vector.shape_cast %379 : vector<4x8xf32> to vector<4x8x1xf32>
    %381 = vector.broadcast %380 : vector<4x8x1xf32> to vector<4x8x8xf32>
    %382 = arith.divf %378, %381 : vector<4x8x8xf32>
    "tpu.trace_start"() <{level = 10 : i32, message = "hqk,hkf->hqf"}> : () -> ()
    %cst_151 = arith.constant dense<0.000000e+00> : vector<4x8x16xf32>
    %383 = tpu.matmul %382, %370, %cst_151 {dimension_numbers = #tpu.dot_dimension_numbers<[2], [1], [1], [2], [0, 0, 0, 1, 1, 2], [0], [0]>} : vector<4x8x8xf32>, vector<4x8x16xf32>, vector<4x8x16xf32> -> vector<4x8x16xf32>
    "tpu.trace_stop"() : () -> ()
    %384 = vector.extract_strided_slice %383 {offsets = [0, 0, 0], sizes = [1, 8, 16], strides = [1, 1, 1]} : vector<4x8x16xf32> to vector<1x8x16xf32>
    %385 = vector.shape_cast %384 : vector<1x8x16xf32> to vector<8x16xf32>
    %386 = vector.extract_strided_slice %383 {offsets = [1, 0, 0], sizes = [1, 8, 16], strides = [1, 1, 1]} : vector<4x8x16xf32> to vector<1x8x16xf32>
    %387 = vector.shape_cast %386 : vector<1x8x16xf32> to vector<8x16xf32>
    %388 = vector.extract_strided_slice %383 {offsets = [2, 0, 0], sizes = [1, 8, 16], strides = [1, 1, 1]} : vector<4x8x16xf32> to vector<1x8x16xf32>
    %389 = vector.shape_cast %388 : vector<1x8x16xf32> to vector<8x16xf32>
    %390 = vector.extract_strided_slice %383 {offsets = [3, 0, 0], sizes = [1, 8, 16], strides = [1, 1, 1]} : vector<4x8x16xf32> to vector<1x8x16xf32>
    %391 = vector.shape_cast %390 : vector<1x8x16xf32> to vector<8x16xf32>
    %392 = tpu.concatenate %385, %387, %389, %391 in 1 : vector<8x16xf32>, vector<8x16xf32>, vector<8x16xf32>, vector<8x16xf32> -> vector<8x64xf32>
    %c2_152 = arith.constant 2 : index
    %c0_153 = arith.constant 0 : index
    %c0_154 = arith.constant 0 : index
    %393 = vector.load %arg4[%c2_152, %c0_153, %c0_154] : memref<5x64x64xf32, #tpu.memory_space<vmem>>, vector<1x64x64xf32>
    %394 = vector.shape_cast %393 : vector<1x64x64xf32> to vector<64x64xf32>
    %cst_155 = arith.constant dense<0.000000e+00> : vector<8x64xf32>
    %395 = tpu.matmul %392, %394, %cst_155 {dimension_numbers = #tpu.dot_dimension_numbers<[1], [0], [0], [1], [0, 0, 1, 1], [], []>} : vector<8x64xf32>, vector<64x64xf32>, vector<8x64xf32> -> vector<8x64xf32>
    %c2_156 = arith.constant 2 : index
    %c0_157 = arith.constant 0 : index
    %c0_158 = arith.constant 0 : index
    %396 = vector.load %arg5[%c2_156, %c0_157, %c0_158] : memref<5x1x64xf32, #tpu.memory_space<vmem>>, vector<1x1x64xf32>
    %397 = vector.shape_cast %396 : vector<1x1x64xf32> to vector<1x64xf32>
    %398 = vector.broadcast %397 : vector<1x64xf32> to vector<8x64xf32>
    %399 = arith.addf %395, %398 : vector<8x64xf32>
    %400 = arith.addf %336, %399 : vector<8x64xf32>
    %c2_159 = arith.constant 2 : index
    %c0_160 = arith.constant 0 : index
    %c0_161 = arith.constant 0 : index
    %401 = vector.load %arg10[%c2_159, %c0_160, %c0_161] : memref<5x1x64xf32, #tpu.memory_space<vmem>>, vector<1x1x64xf32>
    %402 = vector.shape_cast %401 : vector<1x1x64xf32> to vector<1x64xf32>
    %c2_162 = arith.constant 2 : index
    %c0_163 = arith.constant 0 : index
    %c0_164 = arith.constant 0 : index
    %403 = vector.load %arg11[%c2_162, %c0_163, %c0_164] : memref<5x1x64xf32, #tpu.memory_space<vmem>>, vector<1x1x64xf32>
    %404 = vector.shape_cast %403 : vector<1x1x64xf32> to vector<1x64xf32>
    %cst_165 = arith.constant dense<0.000000e+00> : vector<8xf32>
    %405 = vector.multi_reduction <add>, %400, %cst_165 [1] : vector<8x64xf32> to vector<8xf32>
    %406 = vector.shape_cast %405 : vector<8xf32> to vector<8x1xf32>
    %cst_166 = arith.constant 6.400000e+01 : f32
    %407 = vector.broadcast %cst_166 : f32 to vector<8x1xf32>
    %408 = arith.divf %406, %407 : vector<8x1xf32>
    %409 = vector.broadcast %408 : vector<8x1xf32> to vector<8x64xf32>
    %410 = arith.subf %400, %409 : vector<8x64xf32>
    %411 = arith.mulf %410, %410 : vector<8x64xf32>
    %cst_167 = arith.constant dense<0.000000e+00> : vector<8xf32>
    %412 = vector.multi_reduction <add>, %411, %cst_167 [1] : vector<8x64xf32> to vector<8xf32>
    %413 = vector.shape_cast %412 : vector<8xf32> to vector<8x1xf32>
    %cst_168 = arith.constant 6.400000e+01 : f32
    %414 = vector.broadcast %cst_168 : f32 to vector<8x1xf32>
    %415 = arith.divf %413, %414 : vector<8x1xf32>
    %cst_169 = arith.constant 9.99999974E-6 : f32
    %416 = vector.broadcast %cst_169 : f32 to vector<8x1xf32>
    %417 = arith.addf %415, %416 : vector<8x1xf32>
    %418 = math.rsqrt %417 : vector<8x1xf32>
    %419 = vector.broadcast %418 : vector<8x1xf32> to vector<8x64xf32>
    %420 = arith.mulf %410, %419 : vector<8x64xf32>
    %421 = vector.broadcast %402 : vector<1x64xf32> to vector<8x64xf32>
    %422 = arith.mulf %420, %421 : vector<8x64xf32>
    %423 = vector.broadcast %404 : vector<1x64xf32> to vector<8x64xf32>
    %424 = arith.addf %422, %423 : vector<8x64xf32>
    %c2_170 = arith.constant 2 : index
    %c0_171 = arith.constant 0 : index
    %c0_172 = arith.constant 0 : index
    %425 = vector.load %arg6[%c2_170, %c0_171, %c0_172] : memref<5x64x8xf32, #tpu.memory_space<vmem>>, vector<1x64x8xf32>
    %426 = vector.shape_cast %425 : vector<1x64x8xf32> to vector<64x8xf32>
    %cst_173 = arith.constant dense<0.000000e+00> : vector<8x8xf32>
    %427 = tpu.matmul %424, %426, %cst_173 {dimension_numbers = #tpu.dot_dimension_numbers<[1], [0], [0], [1], [0, 0, 1, 1], [], []>} : vector<8x64xf32>, vector<64x8xf32>, vector<8x8xf32> -> vector<8x8xf32>
    %c2_174 = arith.constant 2 : index
    %c0_175 = arith.constant 0 : index
    %c0_176 = arith.constant 0 : index
    %428 = vector.load %arg7[%c2_174, %c0_175, %c0_176] : memref<5x1x8xf32, #tpu.memory_space<vmem>>, vector<1x1x8xf32>
    %429 = vector.shape_cast %428 : vector<1x1x8xf32> to vector<1x8xf32>
    %430 = vector.broadcast %429 : vector<1x8xf32> to vector<8x8xf32>
    %431 = arith.addf %427, %430 : vector<8x8xf32>
    %cst_177 = arith.constant 5.000000e-01 : f32
    %432 = vector.broadcast %cst_177 : f32 to vector<8x8xf32>
    %433 = arith.mulf %432, %431 : vector<8x8xf32>
    %cst_178 = arith.constant 0.707106769 : f32
    %434 = vector.broadcast %cst_178 : f32 to vector<8x8xf32>
    %435 = arith.mulf %431, %434 : vector<8x8xf32>
    %cst_179 = arith.constant 0.000000e+00 : f32
    %436 = vector.broadcast %cst_179 : f32 to vector<8x8xf32>
    %437 = arith.cmpf oge, %435, %436 : vector<8x8xf32>
    %cst_180 = arith.constant 1.000000e+00 : f32
    %cst_181 = arith.constant -1.000000e+00 : f32
    %438 = vector.broadcast %cst_180 : f32 to vector<8x8xf32>
    %439 = vector.broadcast %cst_181 : f32 to vector<8x8xf32>
    %440 = arith.select %437, %438, %439 : vector<8x8xi1>, vector<8x8xf32>
    %441 = math.absf %435 : vector<8x8xf32>
    %cst_182 = arith.constant 0.327591091 : f32
    %442 = vector.broadcast %cst_182 : f32 to vector<8x8xf32>
    %443 = arith.mulf %442, %441 : vector<8x8xf32>
    %cst_183 = arith.constant 1.000000e+00 : f32
    %444 = vector.broadcast %cst_183 : f32 to vector<8x8xf32>
    %445 = arith.addf %444, %443 : vector<8x8xf32>
    %cst_184 = arith.constant 1.000000e+00 : f32
    %446 = vector.broadcast %cst_184 : f32 to vector<8x8xf32>
    %447 = arith.divf %446, %445 : vector<8x8xf32>
    %cst_185 = arith.constant 1.06140542 : f32
    %448 = vector.broadcast %cst_185 : f32 to vector<8x8xf32>
    %449 = arith.mulf %448, %447 : vector<8x8xf32>
    %cst_186 = arith.constant -1.45315206 : f32
    %450 = vector.broadcast %cst_186 : f32 to vector<8x8xf32>
    %451 = arith.addf %449, %450 : vector<8x8xf32>
    %452 = arith.mulf %451, %447 : vector<8x8xf32>
    %cst_187 = arith.constant 1.42141378 : f32
    %453 = vector.broadcast %cst_187 : f32 to vector<8x8xf32>
    %454 = arith.addf %452, %453 : vector<8x8xf32>
    %455 = arith.mulf %454, %447 : vector<8x8xf32>
    %cst_188 = arith.constant -0.284496725 : f32
    %456 = vector.broadcast %cst_188 : f32 to vector<8x8xf32>
    %457 = arith.addf %455, %456 : vector<8x8xf32>
    %458 = arith.mulf %457, %447 : vector<8x8xf32>
    %cst_189 = arith.constant 0.254829586 : f32
    %459 = vector.broadcast %cst_189 : f32 to vector<8x8xf32>
    %460 = arith.addf %458, %459 : vector<8x8xf32>
    %461 = arith.mulf %460, %447 : vector<8x8xf32>
    %cst_190 = arith.constant 0.000000e+00 : f32
    %462 = vector.broadcast %cst_190 : f32 to vector<8x8xf32>
    %463 = arith.subf %462, %441 : vector<8x8xf32>
    %464 = arith.mulf %463, %441 : vector<8x8xf32>
    %465 = math.exp %464 : vector<8x8xf32>
    %466 = arith.mulf %461, %465 : vector<8x8xf32>
    %cst_191 = arith.constant 1.000000e+00 : f32
    %467 = vector.broadcast %cst_191 : f32 to vector<8x8xf32>
    %468 = arith.subf %467, %466 : vector<8x8xf32>
    %469 = arith.mulf %440, %468 : vector<8x8xf32>
    %cst_192 = arith.constant 1.000000e+00 : f32
    %470 = vector.broadcast %cst_192 : f32 to vector<8x8xf32>
    %471 = arith.addf %470, %469 : vector<8x8xf32>
    %472 = arith.mulf %433, %471 : vector<8x8xf32>
    %c2_193 = arith.constant 2 : index
    %c0_194 = arith.constant 0 : index
    %c0_195 = arith.constant 0 : index
    %473 = vector.load %arg8[%c2_193, %c0_194, %c0_195] : memref<5x8x64xf32, #tpu.memory_space<vmem>>, vector<1x8x64xf32>
    %474 = vector.shape_cast %473 : vector<1x8x64xf32> to vector<8x64xf32>
    %cst_196 = arith.constant dense<0.000000e+00> : vector<8x64xf32>
    %475 = tpu.matmul %472, %474, %cst_196 {dimension_numbers = #tpu.dot_dimension_numbers<[1], [0], [0], [1], [0, 0, 1, 1], [], []>} : vector<8x8xf32>, vector<8x64xf32>, vector<8x64xf32> -> vector<8x64xf32>
    %c2_197 = arith.constant 2 : index
    %c0_198 = arith.constant 0 : index
    %c0_199 = arith.constant 0 : index
    %476 = vector.load %arg9[%c2_197, %c0_198, %c0_199] : memref<5x1x64xf32, #tpu.memory_space<vmem>>, vector<1x1x64xf32>
    %477 = vector.shape_cast %476 : vector<1x1x64xf32> to vector<1x64xf32>
    %478 = vector.broadcast %477 : vector<1x64xf32> to vector<8x64xf32>
    %479 = arith.addf %475, %478 : vector<8x64xf32>
    %480 = arith.addf %424, %479 : vector<8x64xf32>
    %c2_200 = arith.constant 2 : index
    %c0_201 = arith.constant 0 : index
    %c0_202 = arith.constant 0 : index
    %481 = vector.load %arg12[%c2_200, %c0_201, %c0_202] : memref<5x1x64xf32, #tpu.memory_space<vmem>>, vector<1x1x64xf32>
    %482 = vector.shape_cast %481 : vector<1x1x64xf32> to vector<1x64xf32>
    %c2_203 = arith.constant 2 : index
    %c0_204 = arith.constant 0 : index
    %c0_205 = arith.constant 0 : index
    %483 = vector.load %arg13[%c2_203, %c0_204, %c0_205] : memref<5x1x64xf32, #tpu.memory_space<vmem>>, vector<1x1x64xf32>
    %484 = vector.shape_cast %483 : vector<1x1x64xf32> to vector<1x64xf32>
    %cst_206 = arith.constant dense<0.000000e+00> : vector<8xf32>
    %485 = vector.multi_reduction <add>, %480, %cst_206 [1] : vector<8x64xf32> to vector<8xf32>
    %486 = vector.shape_cast %485 : vector<8xf32> to vector<8x1xf32>
    %cst_207 = arith.constant 6.400000e+01 : f32
    %487 = vector.broadcast %cst_207 : f32 to vector<8x1xf32>
    %488 = arith.divf %486, %487 : vector<8x1xf32>
    %489 = vector.broadcast %488 : vector<8x1xf32> to vector<8x64xf32>
    %490 = arith.subf %480, %489 : vector<8x64xf32>
    %491 = arith.mulf %490, %490 : vector<8x64xf32>
    %cst_208 = arith.constant dense<0.000000e+00> : vector<8xf32>
    %492 = vector.multi_reduction <add>, %491, %cst_208 [1] : vector<8x64xf32> to vector<8xf32>
    %493 = vector.shape_cast %492 : vector<8xf32> to vector<8x1xf32>
    %cst_209 = arith.constant 6.400000e+01 : f32
    %494 = vector.broadcast %cst_209 : f32 to vector<8x1xf32>
    %495 = arith.divf %493, %494 : vector<8x1xf32>
    %cst_210 = arith.constant 9.99999974E-6 : f32
    %496 = vector.broadcast %cst_210 : f32 to vector<8x1xf32>
    %497 = arith.addf %495, %496 : vector<8x1xf32>
    %498 = math.rsqrt %497 : vector<8x1xf32>
    %499 = vector.broadcast %498 : vector<8x1xf32> to vector<8x64xf32>
    %500 = arith.mulf %490, %499 : vector<8x64xf32>
    %501 = vector.broadcast %482 : vector<1x64xf32> to vector<8x64xf32>
    %502 = arith.mulf %500, %501 : vector<8x64xf32>
    %503 = vector.broadcast %484 : vector<1x64xf32> to vector<8x64xf32>
    %504 = arith.addf %502, %503 : vector<8x64xf32>
    %c3 = arith.constant 3 : index
    %c0_211 = arith.constant 0 : index
    %c0_212 = arith.constant 0 : index
    %505 = vector.load %arg2[%c3, %c0_211, %c0_212] : memref<5x64x192xf32, #tpu.memory_space<vmem>>, vector<1x64x192xf32>
    %506 = vector.shape_cast %505 : vector<1x64x192xf32> to vector<64x192xf32>
    %cst_213 = arith.constant dense<0.000000e+00> : vector<8x192xf32>
    %507 = tpu.matmul %504, %506, %cst_213 {dimension_numbers = #tpu.dot_dimension_numbers<[1], [0], [0], [1], [0, 0, 1, 1], [], []>} : vector<8x64xf32>, vector<64x192xf32>, vector<8x192xf32> -> vector<8x192xf32>
    %c3_214 = arith.constant 3 : index
    %c0_215 = arith.constant 0 : index
    %c0_216 = arith.constant 0 : index
    %508 = vector.load %arg3[%c3_214, %c0_215, %c0_216] : memref<5x1x192xf32, #tpu.memory_space<vmem>>, vector<1x1x192xf32>
    %509 = vector.shape_cast %508 : vector<1x1x192xf32> to vector<1x192xf32>
    %510 = vector.broadcast %509 : vector<1x192xf32> to vector<8x192xf32>
    %511 = arith.addf %507, %510 : vector<8x192xf32>
    %512 = vector.extract_strided_slice %511 {offsets = [0, 0], sizes = [8, 16], strides = [1, 1]} : vector<8x192xf32> to vector<8x16xf32>
    %513 = vector.extract_strided_slice %511 {offsets = [0, 16], sizes = [8, 16], strides = [1, 1]} : vector<8x192xf32> to vector<8x16xf32>
    %514 = vector.extract_strided_slice %511 {offsets = [0, 32], sizes = [8, 16], strides = [1, 1]} : vector<8x192xf32> to vector<8x16xf32>
    %515 = vector.extract_strided_slice %511 {offsets = [0, 48], sizes = [8, 16], strides = [1, 1]} : vector<8x192xf32> to vector<8x16xf32>
    %516 = vector.shape_cast %512 : vector<8x16xf32> to vector<1x8x16xf32>
    %517 = vector.shape_cast %513 : vector<8x16xf32> to vector<1x8x16xf32>
    %518 = vector.shape_cast %514 : vector<8x16xf32> to vector<1x8x16xf32>
    %519 = vector.shape_cast %515 : vector<8x16xf32> to vector<1x8x16xf32>
    %520 = tpu.concatenate %516, %517, %518, %519 in 0 : vector<1x8x16xf32>, vector<1x8x16xf32>, vector<1x8x16xf32>, vector<1x8x16xf32> -> vector<4x8x16xf32>
    %521 = vector.extract_strided_slice %511 {offsets = [0, 64], sizes = [8, 16], strides = [1, 1]} : vector<8x192xf32> to vector<8x16xf32>
    %522 = vector.extract_strided_slice %511 {offsets = [0, 80], sizes = [8, 16], strides = [1, 1]} : vector<8x192xf32> to vector<8x16xf32>
    %523 = vector.extract_strided_slice %511 {offsets = [0, 96], sizes = [8, 16], strides = [1, 1]} : vector<8x192xf32> to vector<8x16xf32>
    %524 = vector.extract_strided_slice %511 {offsets = [0, 112], sizes = [8, 16], strides = [1, 1]} : vector<8x192xf32> to vector<8x16xf32>
    %525 = vector.shape_cast %521 : vector<8x16xf32> to vector<1x8x16xf32>
    %526 = vector.shape_cast %522 : vector<8x16xf32> to vector<1x8x16xf32>
    %527 = vector.shape_cast %523 : vector<8x16xf32> to vector<1x8x16xf32>
    %528 = vector.shape_cast %524 : vector<8x16xf32> to vector<1x8x16xf32>
    %529 = tpu.concatenate %525, %526, %527, %528 in 0 : vector<1x8x16xf32>, vector<1x8x16xf32>, vector<1x8x16xf32>, vector<1x8x16xf32> -> vector<4x8x16xf32>
    %530 = vector.extract_strided_slice %511 {offsets = [0, 128], sizes = [8, 16], strides = [1, 1]} : vector<8x192xf32> to vector<8x16xf32>
    %531 = vector.extract_strided_slice %511 {offsets = [0, 144], sizes = [8, 16], strides = [1, 1]} : vector<8x192xf32> to vector<8x16xf32>
    %532 = vector.extract_strided_slice %511 {offsets = [0, 160], sizes = [8, 16], strides = [1, 1]} : vector<8x192xf32> to vector<8x16xf32>
    %533 = vector.extract_strided_slice %511 {offsets = [0, 176], sizes = [8, 16], strides = [1, 1]} : vector<8x192xf32> to vector<8x16xf32>
    %534 = vector.shape_cast %530 : vector<8x16xf32> to vector<1x8x16xf32>
    %535 = vector.shape_cast %531 : vector<8x16xf32> to vector<1x8x16xf32>
    %536 = vector.shape_cast %532 : vector<8x16xf32> to vector<1x8x16xf32>
    %537 = vector.shape_cast %533 : vector<8x16xf32> to vector<1x8x16xf32>
    %538 = tpu.concatenate %534, %535, %536, %537 in 0 : vector<1x8x16xf32>, vector<1x8x16xf32>, vector<1x8x16xf32>, vector<1x8x16xf32> -> vector<4x8x16xf32>
    "tpu.trace_start"() <{level = 10 : i32, message = "hqf,hkf->hqk"}> : () -> ()
    %cst_217 = arith.constant dense<0.000000e+00> : vector<4x8x8xf32>
    %539 = tpu.matmul %520, %529, %cst_217 {dimension_numbers = #tpu.dot_dimension_numbers<[2], [2], [1], [1], [0, 0, 0, 1, 1, 1], [0], [0]>} : vector<4x8x16xf32>, vector<4x8x16xf32>, vector<4x8x8xf32> -> vector<4x8x8xf32>
    "tpu.trace_stop"() : () -> ()
    %cst_218 = arith.constant 2.500000e-01 : f32
    %540 = vector.broadcast %cst_218 : f32 to vector<4x8x8xf32>
    %541 = arith.mulf %539, %540 : vector<4x8x8xf32>
    %cst_219 = arith.constant dense<0xFF800000> : vector<4x8xf32>
    %542 = vector.multi_reduction <maximumf>, %541, %cst_219 [2] : vector<4x8x8xf32> to vector<4x8xf32>
    %543 = vector.shape_cast %542 : vector<4x8xf32> to vector<4x8x1xf32>
    %544 = vector.broadcast %543 : vector<4x8x1xf32> to vector<4x8x8xf32>
    %545 = arith.subf %541, %544 : vector<4x8x8xf32>
    %546 = math.exp %545 : vector<4x8x8xf32>
    %cst_220 = arith.constant dense<0.000000e+00> : vector<4x8xf32>
    %547 = vector.multi_reduction <add>, %546, %cst_220 [2] : vector<4x8x8xf32> to vector<4x8xf32>
    %548 = vector.shape_cast %547 : vector<4x8xf32> to vector<4x8x1xf32>
    %549 = vector.broadcast %548 : vector<4x8x1xf32> to vector<4x8x8xf32>
    %550 = arith.divf %546, %549 : vector<4x8x8xf32>
    "tpu.trace_start"() <{level = 10 : i32, message = "hqk,hkf->hqf"}> : () -> ()
    %cst_221 = arith.constant dense<0.000000e+00> : vector<4x8x16xf32>
    %551 = tpu.matmul %550, %538, %cst_221 {dimension_numbers = #tpu.dot_dimension_numbers<[2], [1], [1], [2], [0, 0, 0, 1, 1, 2], [0], [0]>} : vector<4x8x8xf32>, vector<4x8x16xf32>, vector<4x8x16xf32> -> vector<4x8x16xf32>
    "tpu.trace_stop"() : () -> ()
    %552 = vector.extract_strided_slice %551 {offsets = [0, 0, 0], sizes = [1, 8, 16], strides = [1, 1, 1]} : vector<4x8x16xf32> to vector<1x8x16xf32>
    %553 = vector.shape_cast %552 : vector<1x8x16xf32> to vector<8x16xf32>
    %554 = vector.extract_strided_slice %551 {offsets = [1, 0, 0], sizes = [1, 8, 16], strides = [1, 1, 1]} : vector<4x8x16xf32> to vector<1x8x16xf32>
    %555 = vector.shape_cast %554 : vector<1x8x16xf32> to vector<8x16xf32>
    %556 = vector.extract_strided_slice %551 {offsets = [2, 0, 0], sizes = [1, 8, 16], strides = [1, 1, 1]} : vector<4x8x16xf32> to vector<1x8x16xf32>
    %557 = vector.shape_cast %556 : vector<1x8x16xf32> to vector<8x16xf32>
    %558 = vector.extract_strided_slice %551 {offsets = [3, 0, 0], sizes = [1, 8, 16], strides = [1, 1, 1]} : vector<4x8x16xf32> to vector<1x8x16xf32>
    %559 = vector.shape_cast %558 : vector<1x8x16xf32> to vector<8x16xf32>
    %560 = tpu.concatenate %553, %555, %557, %559 in 1 : vector<8x16xf32>, vector<8x16xf32>, vector<8x16xf32>, vector<8x16xf32> -> vector<8x64xf32>
    %c3_222 = arith.constant 3 : index
    %c0_223 = arith.constant 0 : index
    %c0_224 = arith.constant 0 : index
    %561 = vector.load %arg4[%c3_222, %c0_223, %c0_224] : memref<5x64x64xf32, #tpu.memory_space<vmem>>, vector<1x64x64xf32>
    %562 = vector.shape_cast %561 : vector<1x64x64xf32> to vector<64x64xf32>
    %cst_225 = arith.constant dense<0.000000e+00> : vector<8x64xf32>
    %563 = tpu.matmul %560, %562, %cst_225 {dimension_numbers = #tpu.dot_dimension_numbers<[1], [0], [0], [1], [0, 0, 1, 1], [], []>} : vector<8x64xf32>, vector<64x64xf32>, vector<8x64xf32> -> vector<8x64xf32>
    %c3_226 = arith.constant 3 : index
    %c0_227 = arith.constant 0 : index
    %c0_228 = arith.constant 0 : index
    %564 = vector.load %arg5[%c3_226, %c0_227, %c0_228] : memref<5x1x64xf32, #tpu.memory_space<vmem>>, vector<1x1x64xf32>
    %565 = vector.shape_cast %564 : vector<1x1x64xf32> to vector<1x64xf32>
    %566 = vector.broadcast %565 : vector<1x64xf32> to vector<8x64xf32>
    %567 = arith.addf %563, %566 : vector<8x64xf32>
    %568 = arith.addf %504, %567 : vector<8x64xf32>
    %c3_229 = arith.constant 3 : index
    %c0_230 = arith.constant 0 : index
    %c0_231 = arith.constant 0 : index
    %569 = vector.load %arg10[%c3_229, %c0_230, %c0_231] : memref<5x1x64xf32, #tpu.memory_space<vmem>>, vector<1x1x64xf32>
    %570 = vector.shape_cast %569 : vector<1x1x64xf32> to vector<1x64xf32>
    %c3_232 = arith.constant 3 : index
    %c0_233 = arith.constant 0 : index
    %c0_234 = arith.constant 0 : index
    %571 = vector.load %arg11[%c3_232, %c0_233, %c0_234] : memref<5x1x64xf32, #tpu.memory_space<vmem>>, vector<1x1x64xf32>
    %572 = vector.shape_cast %571 : vector<1x1x64xf32> to vector<1x64xf32>
    %cst_235 = arith.constant dense<0.000000e+00> : vector<8xf32>
    %573 = vector.multi_reduction <add>, %568, %cst_235 [1] : vector<8x64xf32> to vector<8xf32>
    %574 = vector.shape_cast %573 : vector<8xf32> to vector<8x1xf32>
    %cst_236 = arith.constant 6.400000e+01 : f32
    %575 = vector.broadcast %cst_236 : f32 to vector<8x1xf32>
    %576 = arith.divf %574, %575 : vector<8x1xf32>
    %577 = vector.broadcast %576 : vector<8x1xf32> to vector<8x64xf32>
    %578 = arith.subf %568, %577 : vector<8x64xf32>
    %579 = arith.mulf %578, %578 : vector<8x64xf32>
    %cst_237 = arith.constant dense<0.000000e+00> : vector<8xf32>
    %580 = vector.multi_reduction <add>, %579, %cst_237 [1] : vector<8x64xf32> to vector<8xf32>
    %581 = vector.shape_cast %580 : vector<8xf32> to vector<8x1xf32>
    %cst_238 = arith.constant 6.400000e+01 : f32
    %582 = vector.broadcast %cst_238 : f32 to vector<8x1xf32>
    %583 = arith.divf %581, %582 : vector<8x1xf32>
    %cst_239 = arith.constant 9.99999974E-6 : f32
    %584 = vector.broadcast %cst_239 : f32 to vector<8x1xf32>
    %585 = arith.addf %583, %584 : vector<8x1xf32>
    %586 = math.rsqrt %585 : vector<8x1xf32>
    %587 = vector.broadcast %586 : vector<8x1xf32> to vector<8x64xf32>
    %588 = arith.mulf %578, %587 : vector<8x64xf32>
    %589 = vector.broadcast %570 : vector<1x64xf32> to vector<8x64xf32>
    %590 = arith.mulf %588, %589 : vector<8x64xf32>
    %591 = vector.broadcast %572 : vector<1x64xf32> to vector<8x64xf32>
    %592 = arith.addf %590, %591 : vector<8x64xf32>
    %c3_240 = arith.constant 3 : index
    %c0_241 = arith.constant 0 : index
    %c0_242 = arith.constant 0 : index
    %593 = vector.load %arg6[%c3_240, %c0_241, %c0_242] : memref<5x64x8xf32, #tpu.memory_space<vmem>>, vector<1x64x8xf32>
    %594 = vector.shape_cast %593 : vector<1x64x8xf32> to vector<64x8xf32>
    %cst_243 = arith.constant dense<0.000000e+00> : vector<8x8xf32>
    %595 = tpu.matmul %592, %594, %cst_243 {dimension_numbers = #tpu.dot_dimension_numbers<[1], [0], [0], [1], [0, 0, 1, 1], [], []>} : vector<8x64xf32>, vector<64x8xf32>, vector<8x8xf32> -> vector<8x8xf32>
    %c3_244 = arith.constant 3 : index
    %c0_245 = arith.constant 0 : index
    %c0_246 = arith.constant 0 : index
    %596 = vector.load %arg7[%c3_244, %c0_245, %c0_246] : memref<5x1x8xf32, #tpu.memory_space<vmem>>, vector<1x1x8xf32>
    %597 = vector.shape_cast %596 : vector<1x1x8xf32> to vector<1x8xf32>
    %598 = vector.broadcast %597 : vector<1x8xf32> to vector<8x8xf32>
    %599 = arith.addf %595, %598 : vector<8x8xf32>
    %cst_247 = arith.constant 5.000000e-01 : f32
    %600 = vector.broadcast %cst_247 : f32 to vector<8x8xf32>
    %601 = arith.mulf %600, %599 : vector<8x8xf32>
    %cst_248 = arith.constant 0.707106769 : f32
    %602 = vector.broadcast %cst_248 : f32 to vector<8x8xf32>
    %603 = arith.mulf %599, %602 : vector<8x8xf32>
    %cst_249 = arith.constant 0.000000e+00 : f32
    %604 = vector.broadcast %cst_249 : f32 to vector<8x8xf32>
    %605 = arith.cmpf oge, %603, %604 : vector<8x8xf32>
    %cst_250 = arith.constant 1.000000e+00 : f32
    %cst_251 = arith.constant -1.000000e+00 : f32
    %606 = vector.broadcast %cst_250 : f32 to vector<8x8xf32>
    %607 = vector.broadcast %cst_251 : f32 to vector<8x8xf32>
    %608 = arith.select %605, %606, %607 : vector<8x8xi1>, vector<8x8xf32>
    %609 = math.absf %603 : vector<8x8xf32>
    %cst_252 = arith.constant 0.327591091 : f32
    %610 = vector.broadcast %cst_252 : f32 to vector<8x8xf32>
    %611 = arith.mulf %610, %609 : vector<8x8xf32>
    %cst_253 = arith.constant 1.000000e+00 : f32
    %612 = vector.broadcast %cst_253 : f32 to vector<8x8xf32>
    %613 = arith.addf %612, %611 : vector<8x8xf32>
    %cst_254 = arith.constant 1.000000e+00 : f32
    %614 = vector.broadcast %cst_254 : f32 to vector<8x8xf32>
    %615 = arith.divf %614, %613 : vector<8x8xf32>
    %cst_255 = arith.constant 1.06140542 : f32
    %616 = vector.broadcast %cst_255 : f32 to vector<8x8xf32>
    %617 = arith.mulf %616, %615 : vector<8x8xf32>
    %cst_256 = arith.constant -1.45315206 : f32
    %618 = vector.broadcast %cst_256 : f32 to vector<8x8xf32>
    %619 = arith.addf %617, %618 : vector<8x8xf32>
    %620 = arith.mulf %619, %615 : vector<8x8xf32>
    %cst_257 = arith.constant 1.42141378 : f32
    %621 = vector.broadcast %cst_257 : f32 to vector<8x8xf32>
    %622 = arith.addf %620, %621 : vector<8x8xf32>
    %623 = arith.mulf %622, %615 : vector<8x8xf32>
    %cst_258 = arith.constant -0.284496725 : f32
    %624 = vector.broadcast %cst_258 : f32 to vector<8x8xf32>
    %625 = arith.addf %623, %624 : vector<8x8xf32>
    %626 = arith.mulf %625, %615 : vector<8x8xf32>
    %cst_259 = arith.constant 0.254829586 : f32
    %627 = vector.broadcast %cst_259 : f32 to vector<8x8xf32>
    %628 = arith.addf %626, %627 : vector<8x8xf32>
    %629 = arith.mulf %628, %615 : vector<8x8xf32>
    %cst_260 = arith.constant 0.000000e+00 : f32
    %630 = vector.broadcast %cst_260 : f32 to vector<8x8xf32>
    %631 = arith.subf %630, %609 : vector<8x8xf32>
    %632 = arith.mulf %631, %609 : vector<8x8xf32>
    %633 = math.exp %632 : vector<8x8xf32>
    %634 = arith.mulf %629, %633 : vector<8x8xf32>
    %cst_261 = arith.constant 1.000000e+00 : f32
    %635 = vector.broadcast %cst_261 : f32 to vector<8x8xf32>
    %636 = arith.subf %635, %634 : vector<8x8xf32>
    %637 = arith.mulf %608, %636 : vector<8x8xf32>
    %cst_262 = arith.constant 1.000000e+00 : f32
    %638 = vector.broadcast %cst_262 : f32 to vector<8x8xf32>
    %639 = arith.addf %638, %637 : vector<8x8xf32>
    %640 = arith.mulf %601, %639 : vector<8x8xf32>
    %c3_263 = arith.constant 3 : index
    %c0_264 = arith.constant 0 : index
    %c0_265 = arith.constant 0 : index
    %641 = vector.load %arg8[%c3_263, %c0_264, %c0_265] : memref<5x8x64xf32, #tpu.memory_space<vmem>>, vector<1x8x64xf32>
    %642 = vector.shape_cast %641 : vector<1x8x64xf32> to vector<8x64xf32>
    %cst_266 = arith.constant dense<0.000000e+00> : vector<8x64xf32>
    %643 = tpu.matmul %640, %642, %cst_266 {dimension_numbers = #tpu.dot_dimension_numbers<[1], [0], [0], [1], [0, 0, 1, 1], [], []>} : vector<8x8xf32>, vector<8x64xf32>, vector<8x64xf32> -> vector<8x64xf32>
    %c3_267 = arith.constant 3 : index
    %c0_268 = arith.constant 0 : index
    %c0_269 = arith.constant 0 : index
    %644 = vector.load %arg9[%c3_267, %c0_268, %c0_269] : memref<5x1x64xf32, #tpu.memory_space<vmem>>, vector<1x1x64xf32>
    %645 = vector.shape_cast %644 : vector<1x1x64xf32> to vector<1x64xf32>
    %646 = vector.broadcast %645 : vector<1x64xf32> to vector<8x64xf32>
    %647 = arith.addf %643, %646 : vector<8x64xf32>
    %648 = arith.addf %592, %647 : vector<8x64xf32>
    %c3_270 = arith.constant 3 : index
    %c0_271 = arith.constant 0 : index
    %c0_272 = arith.constant 0 : index
    %649 = vector.load %arg12[%c3_270, %c0_271, %c0_272] : memref<5x1x64xf32, #tpu.memory_space<vmem>>, vector<1x1x64xf32>
    %650 = vector.shape_cast %649 : vector<1x1x64xf32> to vector<1x64xf32>
    %c3_273 = arith.constant 3 : index
    %c0_274 = arith.constant 0 : index
    %c0_275 = arith.constant 0 : index
    %651 = vector.load %arg13[%c3_273, %c0_274, %c0_275] : memref<5x1x64xf32, #tpu.memory_space<vmem>>, vector<1x1x64xf32>
    %652 = vector.shape_cast %651 : vector<1x1x64xf32> to vector<1x64xf32>
    %cst_276 = arith.constant dense<0.000000e+00> : vector<8xf32>
    %653 = vector.multi_reduction <add>, %648, %cst_276 [1] : vector<8x64xf32> to vector<8xf32>
    %654 = vector.shape_cast %653 : vector<8xf32> to vector<8x1xf32>
    %cst_277 = arith.constant 6.400000e+01 : f32
    %655 = vector.broadcast %cst_277 : f32 to vector<8x1xf32>
    %656 = arith.divf %654, %655 : vector<8x1xf32>
    %657 = vector.broadcast %656 : vector<8x1xf32> to vector<8x64xf32>
    %658 = arith.subf %648, %657 : vector<8x64xf32>
    %659 = arith.mulf %658, %658 : vector<8x64xf32>
    %cst_278 = arith.constant dense<0.000000e+00> : vector<8xf32>
    %660 = vector.multi_reduction <add>, %659, %cst_278 [1] : vector<8x64xf32> to vector<8xf32>
    %661 = vector.shape_cast %660 : vector<8xf32> to vector<8x1xf32>
    %cst_279 = arith.constant 6.400000e+01 : f32
    %662 = vector.broadcast %cst_279 : f32 to vector<8x1xf32>
    %663 = arith.divf %661, %662 : vector<8x1xf32>
    %cst_280 = arith.constant 9.99999974E-6 : f32
    %664 = vector.broadcast %cst_280 : f32 to vector<8x1xf32>
    %665 = arith.addf %663, %664 : vector<8x1xf32>
    %666 = math.rsqrt %665 : vector<8x1xf32>
    %667 = vector.broadcast %666 : vector<8x1xf32> to vector<8x64xf32>
    %668 = arith.mulf %658, %667 : vector<8x64xf32>
    %669 = vector.broadcast %650 : vector<1x64xf32> to vector<8x64xf32>
    %670 = arith.mulf %668, %669 : vector<8x64xf32>
    %671 = vector.broadcast %652 : vector<1x64xf32> to vector<8x64xf32>
    %672 = arith.addf %670, %671 : vector<8x64xf32>
    %c4 = arith.constant 4 : index
    %c0_281 = arith.constant 0 : index
    %c0_282 = arith.constant 0 : index
    %673 = vector.load %arg2[%c4, %c0_281, %c0_282] : memref<5x64x192xf32, #tpu.memory_space<vmem>>, vector<1x64x192xf32>
    %674 = vector.shape_cast %673 : vector<1x64x192xf32> to vector<64x192xf32>
    %cst_283 = arith.constant dense<0.000000e+00> : vector<8x192xf32>
    %675 = tpu.matmul %672, %674, %cst_283 {dimension_numbers = #tpu.dot_dimension_numbers<[1], [0], [0], [1], [0, 0, 1, 1], [], []>} : vector<8x64xf32>, vector<64x192xf32>, vector<8x192xf32> -> vector<8x192xf32>
    %c4_284 = arith.constant 4 : index
    %c0_285 = arith.constant 0 : index
    %c0_286 = arith.constant 0 : index
    %676 = vector.load %arg3[%c4_284, %c0_285, %c0_286] : memref<5x1x192xf32, #tpu.memory_space<vmem>>, vector<1x1x192xf32>
    %677 = vector.shape_cast %676 : vector<1x1x192xf32> to vector<1x192xf32>
    %678 = vector.broadcast %677 : vector<1x192xf32> to vector<8x192xf32>
    %679 = arith.addf %675, %678 : vector<8x192xf32>
    %680 = vector.extract_strided_slice %679 {offsets = [0, 0], sizes = [8, 16], strides = [1, 1]} : vector<8x192xf32> to vector<8x16xf32>
    %681 = vector.extract_strided_slice %679 {offsets = [0, 16], sizes = [8, 16], strides = [1, 1]} : vector<8x192xf32> to vector<8x16xf32>
    %682 = vector.extract_strided_slice %679 {offsets = [0, 32], sizes = [8, 16], strides = [1, 1]} : vector<8x192xf32> to vector<8x16xf32>
    %683 = vector.extract_strided_slice %679 {offsets = [0, 48], sizes = [8, 16], strides = [1, 1]} : vector<8x192xf32> to vector<8x16xf32>
    %684 = vector.shape_cast %680 : vector<8x16xf32> to vector<1x8x16xf32>
    %685 = vector.shape_cast %681 : vector<8x16xf32> to vector<1x8x16xf32>
    %686 = vector.shape_cast %682 : vector<8x16xf32> to vector<1x8x16xf32>
    %687 = vector.shape_cast %683 : vector<8x16xf32> to vector<1x8x16xf32>
    %688 = tpu.concatenate %684, %685, %686, %687 in 0 : vector<1x8x16xf32>, vector<1x8x16xf32>, vector<1x8x16xf32>, vector<1x8x16xf32> -> vector<4x8x16xf32>
    %689 = vector.extract_strided_slice %679 {offsets = [0, 64], sizes = [8, 16], strides = [1, 1]} : vector<8x192xf32> to vector<8x16xf32>
    %690 = vector.extract_strided_slice %679 {offsets = [0, 80], sizes = [8, 16], strides = [1, 1]} : vector<8x192xf32> to vector<8x16xf32>
    %691 = vector.extract_strided_slice %679 {offsets = [0, 96], sizes = [8, 16], strides = [1, 1]} : vector<8x192xf32> to vector<8x16xf32>
    %692 = vector.extract_strided_slice %679 {offsets = [0, 112], sizes = [8, 16], strides = [1, 1]} : vector<8x192xf32> to vector<8x16xf32>
    %693 = vector.shape_cast %689 : vector<8x16xf32> to vector<1x8x16xf32>
    %694 = vector.shape_cast %690 : vector<8x16xf32> to vector<1x8x16xf32>
    %695 = vector.shape_cast %691 : vector<8x16xf32> to vector<1x8x16xf32>
    %696 = vector.shape_cast %692 : vector<8x16xf32> to vector<1x8x16xf32>
    %697 = tpu.concatenate %693, %694, %695, %696 in 0 : vector<1x8x16xf32>, vector<1x8x16xf32>, vector<1x8x16xf32>, vector<1x8x16xf32> -> vector<4x8x16xf32>
    %698 = vector.extract_strided_slice %679 {offsets = [0, 128], sizes = [8, 16], strides = [1, 1]} : vector<8x192xf32> to vector<8x16xf32>
    %699 = vector.extract_strided_slice %679 {offsets = [0, 144], sizes = [8, 16], strides = [1, 1]} : vector<8x192xf32> to vector<8x16xf32>
    %700 = vector.extract_strided_slice %679 {offsets = [0, 160], sizes = [8, 16], strides = [1, 1]} : vector<8x192xf32> to vector<8x16xf32>
    %701 = vector.extract_strided_slice %679 {offsets = [0, 176], sizes = [8, 16], strides = [1, 1]} : vector<8x192xf32> to vector<8x16xf32>
    %702 = vector.shape_cast %698 : vector<8x16xf32> to vector<1x8x16xf32>
    %703 = vector.shape_cast %699 : vector<8x16xf32> to vector<1x8x16xf32>
    %704 = vector.shape_cast %700 : vector<8x16xf32> to vector<1x8x16xf32>
    %705 = vector.shape_cast %701 : vector<8x16xf32> to vector<1x8x16xf32>
    %706 = tpu.concatenate %702, %703, %704, %705 in 0 : vector<1x8x16xf32>, vector<1x8x16xf32>, vector<1x8x16xf32>, vector<1x8x16xf32> -> vector<4x8x16xf32>
    "tpu.trace_start"() <{level = 10 : i32, message = "hqf,hkf->hqk"}> : () -> ()
    %cst_287 = arith.constant dense<0.000000e+00> : vector<4x8x8xf32>
    %707 = tpu.matmul %688, %697, %cst_287 {dimension_numbers = #tpu.dot_dimension_numbers<[2], [2], [1], [1], [0, 0, 0, 1, 1, 1], [0], [0]>} : vector<4x8x16xf32>, vector<4x8x16xf32>, vector<4x8x8xf32> -> vector<4x8x8xf32>
    "tpu.trace_stop"() : () -> ()
    %cst_288 = arith.constant 2.500000e-01 : f32
    %708 = vector.broadcast %cst_288 : f32 to vector<4x8x8xf32>
    %709 = arith.mulf %707, %708 : vector<4x8x8xf32>
    %cst_289 = arith.constant dense<0xFF800000> : vector<4x8xf32>
    %710 = vector.multi_reduction <maximumf>, %709, %cst_289 [2] : vector<4x8x8xf32> to vector<4x8xf32>
    %711 = vector.shape_cast %710 : vector<4x8xf32> to vector<4x8x1xf32>
    %712 = vector.broadcast %711 : vector<4x8x1xf32> to vector<4x8x8xf32>
    %713 = arith.subf %709, %712 : vector<4x8x8xf32>
    %714 = math.exp %713 : vector<4x8x8xf32>
    %cst_290 = arith.constant dense<0.000000e+00> : vector<4x8xf32>
    %715 = vector.multi_reduction <add>, %714, %cst_290 [2] : vector<4x8x8xf32> to vector<4x8xf32>
    %716 = vector.shape_cast %715 : vector<4x8xf32> to vector<4x8x1xf32>
    %717 = vector.broadcast %716 : vector<4x8x1xf32> to vector<4x8x8xf32>
    %718 = arith.divf %714, %717 : vector<4x8x8xf32>
    "tpu.trace_start"() <{level = 10 : i32, message = "hqk,hkf->hqf"}> : () -> ()
    %cst_291 = arith.constant dense<0.000000e+00> : vector<4x8x16xf32>
    %719 = tpu.matmul %718, %706, %cst_291 {dimension_numbers = #tpu.dot_dimension_numbers<[2], [1], [1], [2], [0, 0, 0, 1, 1, 2], [0], [0]>} : vector<4x8x8xf32>, vector<4x8x16xf32>, vector<4x8x16xf32> -> vector<4x8x16xf32>
    "tpu.trace_stop"() : () -> ()
    %720 = vector.extract_strided_slice %719 {offsets = [0, 0, 0], sizes = [1, 8, 16], strides = [1, 1, 1]} : vector<4x8x16xf32> to vector<1x8x16xf32>
    %721 = vector.shape_cast %720 : vector<1x8x16xf32> to vector<8x16xf32>
    %722 = vector.extract_strided_slice %719 {offsets = [1, 0, 0], sizes = [1, 8, 16], strides = [1, 1, 1]} : vector<4x8x16xf32> to vector<1x8x16xf32>
    %723 = vector.shape_cast %722 : vector<1x8x16xf32> to vector<8x16xf32>
    %724 = vector.extract_strided_slice %719 {offsets = [2, 0, 0], sizes = [1, 8, 16], strides = [1, 1, 1]} : vector<4x8x16xf32> to vector<1x8x16xf32>
    %725 = vector.shape_cast %724 : vector<1x8x16xf32> to vector<8x16xf32>
    %726 = vector.extract_strided_slice %719 {offsets = [3, 0, 0], sizes = [1, 8, 16], strides = [1, 1, 1]} : vector<4x8x16xf32> to vector<1x8x16xf32>
    %727 = vector.shape_cast %726 : vector<1x8x16xf32> to vector<8x16xf32>
    %728 = tpu.concatenate %721, %723, %725, %727 in 1 : vector<8x16xf32>, vector<8x16xf32>, vector<8x16xf32>, vector<8x16xf32> -> vector<8x64xf32>
    %c4_292 = arith.constant 4 : index
    %c0_293 = arith.constant 0 : index
    %c0_294 = arith.constant 0 : index
    %729 = vector.load %arg4[%c4_292, %c0_293, %c0_294] : memref<5x64x64xf32, #tpu.memory_space<vmem>>, vector<1x64x64xf32>
    %730 = vector.shape_cast %729 : vector<1x64x64xf32> to vector<64x64xf32>
    %cst_295 = arith.constant dense<0.000000e+00> : vector<8x64xf32>
    %731 = tpu.matmul %728, %730, %cst_295 {dimension_numbers = #tpu.dot_dimension_numbers<[1], [0], [0], [1], [0, 0, 1, 1], [], []>} : vector<8x64xf32>, vector<64x64xf32>, vector<8x64xf32> -> vector<8x64xf32>
    %c4_296 = arith.constant 4 : index
    %c0_297 = arith.constant 0 : index
    %c0_298 = arith.constant 0 : index
    %732 = vector.load %arg5[%c4_296, %c0_297, %c0_298] : memref<5x1x64xf32, #tpu.memory_space<vmem>>, vector<1x1x64xf32>
    %733 = vector.shape_cast %732 : vector<1x1x64xf32> to vector<1x64xf32>
    %734 = vector.broadcast %733 : vector<1x64xf32> to vector<8x64xf32>
    %735 = arith.addf %731, %734 : vector<8x64xf32>
    %736 = arith.addf %672, %735 : vector<8x64xf32>
    %c4_299 = arith.constant 4 : index
    %c0_300 = arith.constant 0 : index
    %c0_301 = arith.constant 0 : index
    %737 = vector.load %arg10[%c4_299, %c0_300, %c0_301] : memref<5x1x64xf32, #tpu.memory_space<vmem>>, vector<1x1x64xf32>
    %738 = vector.shape_cast %737 : vector<1x1x64xf32> to vector<1x64xf32>
    %c4_302 = arith.constant 4 : index
    %c0_303 = arith.constant 0 : index
    %c0_304 = arith.constant 0 : index
    %739 = vector.load %arg11[%c4_302, %c0_303, %c0_304] : memref<5x1x64xf32, #tpu.memory_space<vmem>>, vector<1x1x64xf32>
    %740 = vector.shape_cast %739 : vector<1x1x64xf32> to vector<1x64xf32>
    %cst_305 = arith.constant dense<0.000000e+00> : vector<8xf32>
    %741 = vector.multi_reduction <add>, %736, %cst_305 [1] : vector<8x64xf32> to vector<8xf32>
    %742 = vector.shape_cast %741 : vector<8xf32> to vector<8x1xf32>
    %cst_306 = arith.constant 6.400000e+01 : f32
    %743 = vector.broadcast %cst_306 : f32 to vector<8x1xf32>
    %744 = arith.divf %742, %743 : vector<8x1xf32>
    %745 = vector.broadcast %744 : vector<8x1xf32> to vector<8x64xf32>
    %746 = arith.subf %736, %745 : vector<8x64xf32>
    %747 = arith.mulf %746, %746 : vector<8x64xf32>
    %cst_307 = arith.constant dense<0.000000e+00> : vector<8xf32>
    %748 = vector.multi_reduction <add>, %747, %cst_307 [1] : vector<8x64xf32> to vector<8xf32>
    %749 = vector.shape_cast %748 : vector<8xf32> to vector<8x1xf32>
    %cst_308 = arith.constant 6.400000e+01 : f32
    %750 = vector.broadcast %cst_308 : f32 to vector<8x1xf32>
    %751 = arith.divf %749, %750 : vector<8x1xf32>
    %cst_309 = arith.constant 9.99999974E-6 : f32
    %752 = vector.broadcast %cst_309 : f32 to vector<8x1xf32>
    %753 = arith.addf %751, %752 : vector<8x1xf32>
    %754 = math.rsqrt %753 : vector<8x1xf32>
    %755 = vector.broadcast %754 : vector<8x1xf32> to vector<8x64xf32>
    %756 = arith.mulf %746, %755 : vector<8x64xf32>
    %757 = vector.broadcast %738 : vector<1x64xf32> to vector<8x64xf32>
    %758 = arith.mulf %756, %757 : vector<8x64xf32>
    %759 = vector.broadcast %740 : vector<1x64xf32> to vector<8x64xf32>
    %760 = arith.addf %758, %759 : vector<8x64xf32>
    %c4_310 = arith.constant 4 : index
    %c0_311 = arith.constant 0 : index
    %c0_312 = arith.constant 0 : index
    %761 = vector.load %arg6[%c4_310, %c0_311, %c0_312] : memref<5x64x8xf32, #tpu.memory_space<vmem>>, vector<1x64x8xf32>
    %762 = vector.shape_cast %761 : vector<1x64x8xf32> to vector<64x8xf32>
    %cst_313 = arith.constant dense<0.000000e+00> : vector<8x8xf32>
    %763 = tpu.matmul %760, %762, %cst_313 {dimension_numbers = #tpu.dot_dimension_numbers<[1], [0], [0], [1], [0, 0, 1, 1], [], []>} : vector<8x64xf32>, vector<64x8xf32>, vector<8x8xf32> -> vector<8x8xf32>
    %c4_314 = arith.constant 4 : index
    %c0_315 = arith.constant 0 : index
    %c0_316 = arith.constant 0 : index
    %764 = vector.load %arg7[%c4_314, %c0_315, %c0_316] : memref<5x1x8xf32, #tpu.memory_space<vmem>>, vector<1x1x8xf32>
    %765 = vector.shape_cast %764 : vector<1x1x8xf32> to vector<1x8xf32>
    %766 = vector.broadcast %765 : vector<1x8xf32> to vector<8x8xf32>
    %767 = arith.addf %763, %766 : vector<8x8xf32>
    %cst_317 = arith.constant 5.000000e-01 : f32
    %768 = vector.broadcast %cst_317 : f32 to vector<8x8xf32>
    %769 = arith.mulf %768, %767 : vector<8x8xf32>
    %cst_318 = arith.constant 0.707106769 : f32
    %770 = vector.broadcast %cst_318 : f32 to vector<8x8xf32>
    %771 = arith.mulf %767, %770 : vector<8x8xf32>
    %cst_319 = arith.constant 0.000000e+00 : f32
    %772 = vector.broadcast %cst_319 : f32 to vector<8x8xf32>
    %773 = arith.cmpf oge, %771, %772 : vector<8x8xf32>
    %cst_320 = arith.constant 1.000000e+00 : f32
    %cst_321 = arith.constant -1.000000e+00 : f32
    %774 = vector.broadcast %cst_320 : f32 to vector<8x8xf32>
    %775 = vector.broadcast %cst_321 : f32 to vector<8x8xf32>
    %776 = arith.select %773, %774, %775 : vector<8x8xi1>, vector<8x8xf32>
    %777 = math.absf %771 : vector<8x8xf32>
    %cst_322 = arith.constant 0.327591091 : f32
    %778 = vector.broadcast %cst_322 : f32 to vector<8x8xf32>
    %779 = arith.mulf %778, %777 : vector<8x8xf32>
    %cst_323 = arith.constant 1.000000e+00 : f32
    %780 = vector.broadcast %cst_323 : f32 to vector<8x8xf32>
    %781 = arith.addf %780, %779 : vector<8x8xf32>
    %cst_324 = arith.constant 1.000000e+00 : f32
    %782 = vector.broadcast %cst_324 : f32 to vector<8x8xf32>
    %783 = arith.divf %782, %781 : vector<8x8xf32>
    %cst_325 = arith.constant 1.06140542 : f32
    %784 = vector.broadcast %cst_325 : f32 to vector<8x8xf32>
    %785 = arith.mulf %784, %783 : vector<8x8xf32>
    %cst_326 = arith.constant -1.45315206 : f32
    %786 = vector.broadcast %cst_326 : f32 to vector<8x8xf32>
    %787 = arith.addf %785, %786 : vector<8x8xf32>
    %788 = arith.mulf %787, %783 : vector<8x8xf32>
    %cst_327 = arith.constant 1.42141378 : f32
    %789 = vector.broadcast %cst_327 : f32 to vector<8x8xf32>
    %790 = arith.addf %788, %789 : vector<8x8xf32>
    %791 = arith.mulf %790, %783 : vector<8x8xf32>
    %cst_328 = arith.constant -0.284496725 : f32
    %792 = vector.broadcast %cst_328 : f32 to vector<8x8xf32>
    %793 = arith.addf %791, %792 : vector<8x8xf32>
    %794 = arith.mulf %793, %783 : vector<8x8xf32>
    %cst_329 = arith.constant 0.254829586 : f32
    %795 = vector.broadcast %cst_329 : f32 to vector<8x8xf32>
    %796 = arith.addf %794, %795 : vector<8x8xf32>
    %797 = arith.mulf %796, %783 : vector<8x8xf32>
    %cst_330 = arith.constant 0.000000e+00 : f32
    %798 = vector.broadcast %cst_330 : f32 to vector<8x8xf32>
    %799 = arith.subf %798, %777 : vector<8x8xf32>
    %800 = arith.mulf %799, %777 : vector<8x8xf32>
    %801 = math.exp %800 : vector<8x8xf32>
    %802 = arith.mulf %797, %801 : vector<8x8xf32>
    %cst_331 = arith.constant 1.000000e+00 : f32
    %803 = vector.broadcast %cst_331 : f32 to vector<8x8xf32>
    %804 = arith.subf %803, %802 : vector<8x8xf32>
    %805 = arith.mulf %776, %804 : vector<8x8xf32>
    %cst_332 = arith.constant 1.000000e+00 : f32
    %806 = vector.broadcast %cst_332 : f32 to vector<8x8xf32>
    %807 = arith.addf %806, %805 : vector<8x8xf32>
    %808 = arith.mulf %769, %807 : vector<8x8xf32>
    %c4_333 = arith.constant 4 : index
    %c0_334 = arith.constant 0 : index
    %c0_335 = arith.constant 0 : index
    %809 = vector.load %arg8[%c4_333, %c0_334, %c0_335] : memref<5x8x64xf32, #tpu.memory_space<vmem>>, vector<1x8x64xf32>
    %810 = vector.shape_cast %809 : vector<1x8x64xf32> to vector<8x64xf32>
    %cst_336 = arith.constant dense<0.000000e+00> : vector<8x64xf32>
    %811 = tpu.matmul %808, %810, %cst_336 {dimension_numbers = #tpu.dot_dimension_numbers<[1], [0], [0], [1], [0, 0, 1, 1], [], []>} : vector<8x8xf32>, vector<8x64xf32>, vector<8x64xf32> -> vector<8x64xf32>
    %c4_337 = arith.constant 4 : index
    %c0_338 = arith.constant 0 : index
    %c0_339 = arith.constant 0 : index
    %812 = vector.load %arg9[%c4_337, %c0_338, %c0_339] : memref<5x1x64xf32, #tpu.memory_space<vmem>>, vector<1x1x64xf32>
    %813 = vector.shape_cast %812 : vector<1x1x64xf32> to vector<1x64xf32>
    %814 = vector.broadcast %813 : vector<1x64xf32> to vector<8x64xf32>
    %815 = arith.addf %811, %814 : vector<8x64xf32>
    %816 = arith.addf %760, %815 : vector<8x64xf32>
    %c4_340 = arith.constant 4 : index
    %c0_341 = arith.constant 0 : index
    %c0_342 = arith.constant 0 : index
    %817 = vector.load %arg12[%c4_340, %c0_341, %c0_342] : memref<5x1x64xf32, #tpu.memory_space<vmem>>, vector<1x1x64xf32>
    %818 = vector.shape_cast %817 : vector<1x1x64xf32> to vector<1x64xf32>
    %c4_343 = arith.constant 4 : index
    %c0_344 = arith.constant 0 : index
    %c0_345 = arith.constant 0 : index
    %819 = vector.load %arg13[%c4_343, %c0_344, %c0_345] : memref<5x1x64xf32, #tpu.memory_space<vmem>>, vector<1x1x64xf32>
    %820 = vector.shape_cast %819 : vector<1x1x64xf32> to vector<1x64xf32>
    %cst_346 = arith.constant dense<0.000000e+00> : vector<8xf32>
    %821 = vector.multi_reduction <add>, %816, %cst_346 [1] : vector<8x64xf32> to vector<8xf32>
    %822 = vector.shape_cast %821 : vector<8xf32> to vector<8x1xf32>
    %cst_347 = arith.constant 6.400000e+01 : f32
    %823 = vector.broadcast %cst_347 : f32 to vector<8x1xf32>
    %824 = arith.divf %822, %823 : vector<8x1xf32>
    %825 = vector.broadcast %824 : vector<8x1xf32> to vector<8x64xf32>
    %826 = arith.subf %816, %825 : vector<8x64xf32>
    %827 = arith.mulf %826, %826 : vector<8x64xf32>
    %cst_348 = arith.constant dense<0.000000e+00> : vector<8xf32>
    %828 = vector.multi_reduction <add>, %827, %cst_348 [1] : vector<8x64xf32> to vector<8xf32>
    %829 = vector.shape_cast %828 : vector<8xf32> to vector<8x1xf32>
    %cst_349 = arith.constant 6.400000e+01 : f32
    %830 = vector.broadcast %cst_349 : f32 to vector<8x1xf32>
    %831 = arith.divf %829, %830 : vector<8x1xf32>
    %cst_350 = arith.constant 9.99999974E-6 : f32
    %832 = vector.broadcast %cst_350 : f32 to vector<8x1xf32>
    %833 = arith.addf %831, %832 : vector<8x1xf32>
    %834 = math.rsqrt %833 : vector<8x1xf32>
    %835 = vector.broadcast %834 : vector<8x1xf32> to vector<8x64xf32>
    %836 = arith.mulf %826, %835 : vector<8x64xf32>
    %837 = vector.broadcast %818 : vector<1x64xf32> to vector<8x64xf32>
    %838 = arith.mulf %836, %837 : vector<8x64xf32>
    %839 = vector.broadcast %820 : vector<1x64xf32> to vector<8x64xf32>
    %840 = arith.addf %838, %839 : vector<8x64xf32>
    %c0_351 = arith.constant 0 : index
    %c0_352 = arith.constant 0 : index
    %841 = vector.load %arg14[%c0_351, %c0_352] : memref<8x64xf32, #tpu.memory_space<vmem>>, vector<8x64xf32>
    tpu.vector_store %arg14[%c0_351, %c0_352], %840 {strides = array<i32>} : memref<8x64xf32, #tpu.memory_space<vmem>>, vector<8x64xf32>,
    return
  }
  func.func @transform_0(%arg0: i32) -> (i32, i32) {
    %c0_i32 = arith.constant 0 : i32
    %c0_i32_0 = arith.constant 0 : i32
    return %arg0, %c0_i32 : i32, i32
  }
  func.func @transform_1(%arg0: i32) -> (i32, i32, i32) {
    %c0_i32 = arith.constant 0 : i32
    %c0_i32_0 = arith.constant 0 : i32
    %c0_i32_1 = arith.constant 0 : i32
    %c0_i32_2 = arith.constant 0 : i32
    return %c0_i32, %c0_i32_0, %c0_i32_1 : i32, i32, i32
  }
  func.func @transform_2(%arg0: i32) -> (i32, i32, i32) {
    %c0_i32 = arith.constant 0 : i32
    %c0_i32_0 = arith.constant 0 : i32
    %c0_i32_1 = arith.constant 0 : i32
    %c0_i32_2 = arith.constant 0 : i32
    return %c0_i32, %c0_i32_0, %c0_i32_1 : i32, i32, i32
  }
  func.func @transform_3(%arg0: i32) -> (i32, i32, i32) {
    %c0_i32 = arith.constant 0 : i32
    %c0_i32_0 = arith.constant 0 : i32
    %c0_i32_1 = arith.constant 0 : i32
    %c0_i32_2 = arith.constant 0 : i32
    return %c0_i32, %c0_i32_0, %c0_i32_1 : i32, i32, i32
  }
  func.func @transform_4(%arg0: i32) -> (i32, i32, i32) {
    %c0_i32 = arith.constant 0 : i32
    %c0_i32_0 = arith.constant 0 : i32
    %c0_i32_1 = arith.constant 0 : i32
    %c0_i32_2 = arith.constant 0 : i32
    return %c0_i32, %c0_i32_0, %c0_i32_1 : i32, i32, i32
  }
  func.func @transform_5(%arg0: i32) -> (i32, i32, i32) {
    %c0_i32 = arith.constant 0 : i32
    %c0_i32_0 = arith.constant 0 : i32
    %c0_i32_1 = arith.constant 0 : i32
    %c0_i32_2 = arith.constant 0 : i32
    return %c0_i32, %c0_i32_0, %c0_i32_1 : i32, i32, i32
  }
  func.func @transform_6(%arg0: i32) -> (i32, i32, i32) {
    %c0_i32 = arith.constant 0 : i32
    %c0_i32_0 = arith.constant 0 : i32
    %c0_i32_1 = arith.constant 0 : i32
    %c0_i32_2 = arith.constant 0 : i32
    return %c0_i32, %c0_i32_0, %c0_i32_1 : i32, i32, i32
  }
  func.func @transform_7(%arg0: i32) -> (i32, i32, i32) {
    %c0_i32 = arith.constant 0 : i32
    %c0_i32_0 = arith.constant 0 : i32
    %c0_i32_1 = arith.constant 0 : i32
    %c0_i32_2 = arith.constant 0 : i32
    return %c0_i32, %c0_i32_0, %c0_i32_1 : i32, i32, i32
  }
  func.func @transform_8(%arg0: i32) -> (i32, i32, i32) {
    %c0_i32 = arith.constant 0 : i32
    %c0_i32_0 = arith.constant 0 : i32
    %c0_i32_1 = arith.constant 0 : i32
    %c0_i32_2 = arith.constant 0 : i32
    return %c0_i32, %c0_i32_0, %c0_i32_1 : i32, i32, i32
  }
  func.func @transform_9(%arg0: i32) -> (i32, i32, i32) {
    %c0_i32 = arith.constant 0 : i32
    %c0_i32_0 = arith.constant 0 : i32
    %c0_i32_1 = arith.constant 0 : i32
    %c0_i32_2 = arith.constant 0 : i32
    return %c0_i32, %c0_i32_0, %c0_i32_1 : i32, i32, i32
  }
  func.func @transform_10(%arg0: i32) -> (i32, i32, i32) {
    %c0_i32 = arith.constant 0 : i32
    %c0_i32_0 = arith.constant 0 : i32
    %c0_i32_1 = arith.constant 0 : i32
    %c0_i32_2 = arith.constant 0 : i32
    return %c0_i32, %c0_i32_0, %c0_i32_1 : i32, i32, i32
  }
  func.func @transform_11(%arg0: i32) -> (i32, i32, i32) {
    %c0_i32 = arith.constant 0 : i32
    %c0_i32_0 = arith.constant 0 : i32
    %c0_i32_1 = arith.constant 0 : i32
    %c0_i32_2 = arith.constant 0 : i32
    return %c0_i32, %c0_i32_0, %c0_i32_1 : i32, i32, i32
  }
  func.func @transform_12(%arg0: i32) -> (i32, i32, i32) {
    %c0_i32 = arith.constant 0 : i32
    %c0_i32_0 = arith.constant 0 : i32
    %c0_i32_1 = arith.constant 0 : i32
    %c0_i32_2 = arith.constant 0 : i32
    return %c0_i32, %c0_i32_0, %c0_i32_1 : i32, i32, i32
  }
  func.func @transform_13(%arg0: i32) -> (i32, i32) {
    %c0_i32 = arith.constant 0 : i32
    %c0_i32_0 = arith.constant 0 : i32
    return %arg0, %c0_i32 : i32, i32
  }
}

</mosaic_0001>

<bundles_post_ra>
// kernel: transformer_encoder.1
= control target key start
LH: loop header
LB: loop body
LE: loop exit
PB: predicated region body
PF: predicated region fallthrough
CT: control target
= control target key end

     0   :  { %s5545_s0 = inlined_call_operand.hbm [shape: f32[16,64], index: 0, kind: input, shape index: {}]   ;;  %s5546_s1 = inlined_call_operand.hbm [shape: f32[5,64,192], index: 1, kind: input, shape index: {}]   ;;  %s5547_s2 = inlined_call_operand.vmem [shape: f32[5,1,192], index: 2, kind: input, shape index: {}]   ;;  %s5548_s3 = inlined_call_operand.vmem [shape: f32[5,64,64], index: 3, kind: input, shape index: {}]   ;;  %s5549_s4 = inlined_call_operand.hbm [shape: f32[5,1,64], index: 4, kind: input, shape index: {}]   ;;  %s5550_s5 = inlined_call_operand.vmem [shape: f32[5,64,8], index: 5, kind: input, shape index: {}]   ;;  %s5551_s6 = inlined_call_operand.hbm [shape: f32[5,1,8], index: 6, kind: input, shape index: {}]   ;;  %s5552_s7 = inlined_call_operand.vmem [shape: f32[5,8,64], index: 7, kind: input, shape index: {}]   ;;  %s5553_s8 = inlined_call_operand.hbm [shape: f32[5,1,64], index: 8, kind: input, shape index: {}]   ;;  %s5554_s9 = inlined_call_operand.hbm [shape: f32[5,1,64], index: 9, kind: input, shape index: {}]   ;;  %s5555_s10 = inlined_call_operand.hbm [shape: f32[5,1,64], index: 10, kind: input, shape index: {}]   ;;  %s5556_s11 = inlined_call_operand.hbm [shape: f32[5,1,64], index: 11, kind: input, shape index: {}]   ;;  %s5557_s12 = inlined_call_operand.hbm [shape: f32[5,1,64], index: 12, kind: input, shape index: {}]   ;;  %s5558_s13 = inlined_call_operand.hbm [shape: f32[16,64], index: 13, kind: output, shape index: {}]  }
   0x1   :  { %5576 = sst [smem:[#allocation24_spill]] %s5545_s0 }
   0x2   :  { %5577 = sst [smem:[#allocation25_spill]] %s5546_s1 }
   0x3   :  { %5578 = sst [smem:[#allocation26_spill]] %s5549_s4 }
   0x4   :  { %5579 = sst [smem:[#allocation27_spill]] %s5551_s6 }
   0x5   :  { %5580 = sst [smem:[#allocation28_spill]] %s5552_s7 }
   0x6   :  { %5581 = sst [smem:[#allocation29_spill]] %s5553_s8 }
   0x7   :  { %5582 = sst [smem:[#allocation30_spill]] %s5554_s9 }
   0x8   :  { %5583 = sst [smem:[#allocation31_spill]] %s5555_s10 }
   0x9   :  { %5584 = sst [smem:[#allocation32_spill]] %s5556_s11 }
   0xa   :  { %5585 = sst [smem:[#allocation33_spill]] %s5557_s12 }
   0xb   :  { %5586 = sst [smem:[#allocation34_spill]] %s5558_s13 }
   0xc   :  { %18 = vsyncpa [#allocation3], 0 }
   0xd   :  { %20 = vsyncpa [#allocation3 + $0x1], 0 }
   0xe   :  { %21 = vsyncpa [#allocation6], 0 }
   0xf   :  { %22 = vsyncpa [#allocation9], 0 }
  0x10   :  { %23 = vsyncpa [#allocation12], 0 }
  0x11   :  { %24 = vsyncpa [#allocation15], 0 }
  0x12   :  { %25 = vsyncpa [#allocation4], 0 }
  0x13   :  { %27 = vsyncpa [#allocation4 + $0x1], 0  ;;  %s4724_s25 = smov 0   ;;  %s4726_s26 = smov 0  }
  0x14   :  { %s4728_s27 = smov 0   ;;  %s4730_s28 = smov 0  }
  0x15 LB: > { %s5587_s1 = sld [smem:[#allocation25_spill]]  ;;  %s4748_s15 = sadd.s32 4294967295, %s4632_s28   ;;  %s4632_s28 = sphi %s4730_s28, %s5618_s28   ;;  %s4628_s27 = sphi %s4728_s27, %s5617_s27   ;;  %s4624_s26 = sphi %s4726_s26, %s5616_s26   ;;  %s4620_s25 = sphi %s4724_s25, %s5615_s25  }
  0x16   : > { %p3800_p0 = scmp.ge.s32.totalorder %s4632_s28, 1  ;;  %p54_p1 = scmp.eq.s32.totalorder %s4748_s15, 0 }
  0x17   : > { %p342_p2 = scmp.lt.s32.totalorder %s4632_s28, 3  ;;  %s4634_s17 = smov [#allocation5]  }
  0x18   : > { %s355_s18 = sshll.u32 %s4634_s17, 4  ;;  %s5590_s6 = sld [smem:[#allocation27_spill]]  ;;  %s356_s18 = int_to_ptr.vmem [resolvable:$true] %s355_s18 }
  0x19   : > { %p4753_p3 = pnand %p3800_p0, %p342_p2  ;;  %s4635_s23 = smov [#allocation8]  }
  0x1a   : > { %s392_s24 = sshll.u32 %s4635_s23, 4  ;;  %s4636_s29 = smov 256   ;;  %s393_s24 = int_to_ptr.vmem [resolvable:$true] %s392_s24 }
  0x1b   : > { %s353_s14 = sshll.u32 %s5587_s1, 4  ;;  %p4020_p4 = pneg %p4753_p3  ;;  %s354_s14 = int_to_ptr.hbm [resolvable:$true] %s353_s14 }
  0x1c   : > { %s4637_s30 = smov 16   ;;  %s5591_s9 = sld [smem:[#allocation30_spill]] }
  0x1d   : > { %p4762_p6 = pnand %p4020_p4, %p54_p1  ;;  %s4638_s7 = smov 1  }
  0x1e   : > { %s390_s22 = sshll.u32 %s5590_s6, 4  ;;  %s4639_s20 = smov [#allocation11]   ;;  %s391_s22 = int_to_ptr.hbm [resolvable:$true] %s390_s22 }
  0x1f   : > { %4023 = dma.hbm_to_vmem [thread:$0]  (!%p4762_p6), %s354_s14, 10240, %s356_s18, [#allocation6], %s4636_s29, %s4636_s29, %s4637_s30  }
  0x20   : > { %4029 = dma.hbm_to_vmem [thread:$0]  (!%p4762_p6), %s391_s22, 80, %s393_s24, [#allocation9], %s4637_s30, %s4637_s30, %s4638_s7  }
  0x21   : > { %s423_s21 = sshll.u32 %s4639_s20, 4  ;;  %s5592_s11 = sld [smem:[#allocation32_spill]]  ;;  %s424_s21 = int_to_ptr.vmem [resolvable:$true] %s423_s21 }
  0x22   : > { %s421_s13 = sshll.u32 %s5591_s9, 4  ;;  %s5593_s4 = sld [smem:[#allocation26_spill]]  ;;  %s422_s13 = int_to_ptr.hbm [resolvable:$true] %s421_s13 }
  0x23   : > { %4035 = dma.hbm_to_vmem [thread:$0]  (!%p4762_p6), %s422_s13, 80, %s424_s21, [#allocation12], %s4637_s30, %s4637_s30, %s4638_s7  }
  0x24   : > { %s4640_s22 = smov [#allocation14]   ;;  %s4641_s6 = smov [#allocation7]  }
  0x25   : > { %s451_s24 = sshll.u32 %s4640_s22, 4  ;;  %s375_s17 = sshll.u32 %s4641_s6, 4  ;;  %s452_s24 = int_to_ptr.vmem [resolvable:$true] %s451_s24  ;;  %s376_s17 = int_to_ptr.vmem [resolvable:$true] %s375_s17 }
  0x26   : > { %s5594_s8 = sld [smem:[#allocation29_spill]]  ;;  %s4644_s23 = smov [#allocation16]  }
  0x27   : > { %s449_s14 = sshll.u32 %s5592_s11, 4  ;;  %s5595_s10 = sld [smem:[#allocation31_spill]]  ;;  %s450_s14 = int_to_ptr.hbm [resolvable:$true] %s449_s14 }
  0x28   : > { %s373_s29 = sshll.u32 %s5593_s4, 4  ;;  %s5596_s12 = sld [smem:[#allocation33_spill]]  ;;  %s374_s29 = int_to_ptr.hbm [resolvable:$true] %s373_s29 }
  0x29   : > { %4041 = dma.hbm_to_vmem [thread:$0]  (!%p4762_p6), %s450_s14, 80, %s452_s24, [#allocation15], %s4637_s30, %s4637_s30, %s4638_s7  }
  0x2a   : > { %4026 = dma.hbm_to_vmem [thread:$0]  (!%p4762_p6), %s374_s29, 80, %s376_s17, [#allocation6], %s4637_s30, %s4637_s30, %s4638_s7  }
  0x2b   : > { %s4642_s14 = smov [#allocation10]   ;;  %s4643_s29 = smov [#allocation13]  }
  0x2c   : > { %s407_s13 = sshll.u32 %s5594_s8, 4  ;;  %s409_s22 = sshll.u32 %s4642_s14, 4  ;;  %s408_s13 = int_to_ptr.hbm [resolvable:$true] %s407_s13  ;;  %s410_s22 = int_to_ptr.vmem [resolvable:$true] %s409_s22 }
  0x2d   : > { %s435_s18 = sshll.u32 %s5595_s10, 4  ;;  %s437_s24 = sshll.u32 %s4643_s29, 4  ;;  %s436_s18 = int_to_ptr.hbm [resolvable:$true] %s435_s18  ;;  %s438_s24 = int_to_ptr.vmem [resolvable:$true] %s437_s24 }
  0x2e   : > { %4032 = dma.hbm_to_vmem [thread:$0]  (!%p4762_p6), %s408_s13, 80, %s410_s22, [#allocation9], %s4637_s30, %s4637_s30, %s4638_s7  }
  0x2f   : > { %s463_s20 = sshll.u32 %s5596_s12, 4  ;;  %s465_s13 = sshll.u32 %s4644_s23, 4  ;;  %s464_s20 = int_to_ptr.hbm [resolvable:$true] %s463_s20  ;;  %s466_s13 = int_to_ptr.vmem [resolvable:$true] %s465_s13 }
  0x30   : > { %4038 = dma.hbm_to_vmem [thread:$0]  (!%p4762_p6), %s436_s18, 80, %s438_s24, [#allocation12], %s4637_s30, %s4637_s30, %s4638_s7  }
  0x31   : > { %4044 = dma.hbm_to_vmem [thread:$0]  (!%p4762_p6), %s464_s20, 80, %s466_s13, [#allocation15], %s4637_s30, %s4637_s30, %s4638_s7  }
  0x32   : > { %s3799_s21 = sadd.s32 4294967294, %s4632_s28   ;;  %s4827_s1 = sadd.s32 1, %s4632_s28  }
  0x33   : > { %s40_s14 = sadd.s32 1, %s4628_s27  ;;  %s37_s22 = ssub.s32 %s4632_s28, %s4827_s1 }
  0x34   : > { %p47_p7 = scmp.ne.s32.totalorder %s4628_s27, %s4624_s26  ;;  %p38_p8 = scmp.eq.s32.totalorder %s37_s22, 0 }
  0x35   : > { %p48_p9 = scmp.eq.s32.totalorder %s4632_s28, 0  ;;  %p53_p10 = scmp.ne.s32.totalorder %s4624_s26, %s4620_s25 }
  0x36   : > { %p329_p11 = scmp.eq.s32.totalorder %s4748_s15, 1  ;;  %p335_p0 = scmp.eq.s32.totalorder %s3799_s21, 1 }
  0x37   : > { %s4839_s18 = scalar_select %p38_p8, %s4628_s27, %s40_s14  }
  0x38   : > { %p4843_p12 = por %p54_p1, %p53_p10  ;;  %p4847_p13 = por %p329_p11, %p47_p7 }
  0x39   : > { %p49_p2 = por %p48_p9, %p47_p7  ;;  %s479_s30 = sand.u32 1, %s4628_s27  }
  0x3a   : > { %p4852_p4 = por %p335_p0, %p53_p10  ;;  %p4061_p6 = scmp.lt.s32.totalorder %s4632_s28, 2 }
  0x3b   : > { %s3810_s24 = sshll.u32 %s479_s30, 3  ;;  %s3811_s6 = sshll.u32 %s4632_s28, 3 }
  0x3c   : > { %s5600_s0 = sld [smem:[#allocation24_spill]]  ;;  %s483_s14 = scalar_lea.vmem [#allocation2], %s3810_s24 }
  0x3d   : > { %s491_s22 = sshll.u32 %s483_s14, 4  ;;  %p4861_p8 = pnand %p4061_p6, %p49_p2  ;;  %s492_s22 = int_to_ptr.vmem [resolvable:$true] %s491_s22 }
  0x3e   : > { %s480_s4 = scalar_lea.sflag [#allocation3], %s479_s30 }
  0x3f   : > { %p4524_p9 = pneg %p4861_p8 }
  0x42   : > { %s487_s23 = scalar_lea.hbm %s5600_s0, %s3811_s6  ;;  %s4527_s24 = scalar_lea.hbm %s5600_s0, 16 }
  0x43   : > { %s489_s13 = sshll.u32 %s487_s23, 4  ;;  %s490_s13 = int_to_ptr.hbm [resolvable:$true] %s489_s13 }
  0x44   : > { %s4520_s8 = sshra.s32 %s490_s13, 4  ;;  %s4521_s8 = int_to_ptr.hbm [resolvable:$true] %s4520_s8 }
  0x45   : > { %s4522_s9 = scalar_lea.hbm %s4521_s8, 8  ;;  %p4528_p0 = scmp.lt.s32.totalorder %s4521_s8, %s5600_s0 }
  0x46   : > { %p4523_p7 = scmp.ne.s32.totalorder %s4521_s8, %s4522_s9  ;;  %p4529_p2 = scmp.lt.s32.totalorder %s4527_s24, %s4522_s9 }
  0x48   : > { %p4525_p10 = pnand %p4524_p9, %p4523_p7  ;;  %p4530_p6 = por %p4529_p2, %p4528_p0 }
  0x4a   : > { %p4526_p11 = pneg %p4525_p10 }
  0x4c   : > { %p4531_p5 = pnand %p4530_p6, %p4526_p11 }
  0x4e   : > { %4534 = shalt.err (!%p4531_p5)
}
  0x4f   : > { %4048 = dma.hbm_to_vmem [thread:$0]  (!%p4861_p8), %s490_s13, 128, %s492_s22, %s480_s4  }
  0x50   : > { %500 = sbr.rel (%p4753_p3) target bundleno = 10138 (0x279a), region = 72  ;;  %s4878_s30 = sand.u32 (!%p4753_p3), 1, %s4624_s26  }
  0x51   : > { %s5561_s14 = sshll.u32 (!%p4753_p3), %s4878_s30, 3  ;;  %s503_s6 = scalar_lea.sflag (!%p4753_p3), [#allocation3], %s4878_s30 }
  0x52   : > { %s506_s8 = scalar_lea.vmem (!%p4753_p3), [#allocation2], %s5561_s14 }
  0x55   : > { %4595 = dma.done.wait (%p4843_p12), %s503_s6, 128  }
  0x56   : > { %4597 = vsyncadd (%p4843_p12), %s503_s6, 4294967168 }
  0x57   : > { %4599 = dma.done.wait (%p54_p1), [#allocation6], 10320  }
  0x58   : > { %4601 = vsyncadd (%p54_p1), [#allocation6], 4294956976 }
  0x59   : > { %4603 = dma.done.wait (%p54_p1), [#allocation9], 160  }
  0x5a   : > { %4605 = vsyncadd (%p54_p1), [#allocation9], 4294967136 }
  0x5b   : > { %4607 = dma.done.wait (%p54_p1), [#allocation12], 160  }
  0x5c   : > { %4609 = vsyncadd (%p54_p1), [#allocation12], 4294967136 }
  0x5d   : > { %4611 = dma.done.wait (%p54_p1), [#allocation15], 160  }
  0x5e   : > { %4613 = vsyncadd (%p54_p1), [#allocation15], 4294967136  ;;  %v605_v0 = vld [vmem:[#allocation5 + $0x70] sm:$0xff]  ;;  %v603_v1 = vld [vmem:[#allocation5 + $0x60] sm:$0xff]  ;;  %vm613_vm0 = vcmask 523264   ;;  %s5572_s16 = smov 80  }
  0x5f   : > { %625 = vmatpush.msra.mxu0 %v605_v0  ;;  %v601_v2 = vld [vmem:[#allocation5 + $0x50] sm:$0xff]  ;;  %v599_v3 = vld [vmem:[#allocation5 + $0x40] sm:$0xff]  ;;  %v606_v9 = vld [vmem:[#allocation5 + $0x78] sm:$0xff]  ;;  %s5574_s19 = smov 112   ;;  %s5570_s13 = smov 96   ;;  %vm676_vm1 = vcmask 130048  }
  0x60   : > { %v597_v4 = vld [vmem:[#allocation5 + $0x30] sm:$0xff]  ;;  %v595_v5 = vld [vmem:[#allocation5 + $0x20] sm:$0xff]  ;;  %v604_v10 = vld [vmem:[#allocation5 + $0x68] sm:$0xff]  ;;  %645 = vmatpush.msra.mxu1 %v606_v9  ;;  %s5568_s22 = smov 64   ;;  %vm783_vm2 = vcmask 64512   ;;  %s5566_s21 = smov 32  }
  0x61   : > { %626 = vmatpush.msra.mxu0 %v603_v1  ;;  %v593_v6 = vld [vmem:[#allocation5 + $0x10] sm:$0xff]  ;;  %v591_v7 = vld [vmem:[#allocation5] sm:$0xff]  ;;  %v602_v15 = vld [vmem:[#allocation5 + $0x58] sm:$0xff]  ;;  %s5562_s17 = smov 16   ;;  %s5564_s24 = smov 48  }
  0x62   : > { %v4904_v8 = vld [vmem:[%s506_s8] sm:$0xff]  ;;  %646 = vmatpush.msra.mxu1 %v604_v10  ;;  %v600_v16 = vld [vmem:[#allocation5 + $0x48] sm:$0xff]  ;;  %s5602_s4 = sld [smem:[#allocation28_spill]]  ;;  %s5613_s8 = sshll.u32 %s4878_s30, 3 }
  0x63   : > { %627 = vmatpush.msra.mxu0 %v601_v2  ;;  %v607_v11 = vld [vmem:[%s5547_s2] sm:$0x3]  ;;  %v598_v17 = vld [vmem:[#allocation5 + $0x38] sm:$0xff]  ;;  %v596_v18 = vld [vmem:[#allocation5 + $0x28] sm:$0xff] }
  0x64   : > { %v609_v12 = vperm.slane %v607_v11, 0  ;;  %647 = vmatpush.msra.mxu1 %v602_v15  ;;  %v594_v19 = vld [vmem:[#allocation5 + $0x18] sm:$0xff]  ;;  %v592_v20 = vld [vmem:[#allocation5 + $0x8] sm:$0xff]  ;;  %v610_v26 = vperm.slane %v607_v11, 1 }
  0x65   : > { %628 = vmatpush.msra.mxu0 %v599_v3 }
  0x66   : > { %648 = vmatpush.msra.mxu1 %v600_v16 }
  0x67   : > { %629 = vmatpush.msra.mxu0 %v597_v4 }
  0x68   : > { %649 = vmatpush.msra.mxu1 %v598_v17 }
  0x69   : > { %630 = vmatpush.msra.mxu0 %v595_v5 }
  0x6a   : > { %650 = vmatpush.msra.mxu1 %v596_v18 }
  0x6b   : > { %631 = vmatpush.msra.mxu0 %v593_v6 }
  0x6c   : > { %651 = vmatpush.msra.mxu1 %v594_v19 }
  0x6d   : > { %632 = vmatpush.msra.mxu0 %v591_v7 }
  0x6e   : > { %3823 = vmatmul.msk.f32.vlgmr.msra.gmra.mxu0 %vm613_vm0, %v4904_v8  ;;  %652 = vmatpush.msra.mxu1 %v592_v20 }
  0x6f   : > { %3824 = vmatmul.msk.f32.vlgmr.msra.gmra.mxu1 %vm613_vm0, %v4904_v8 }
  0xeb   : > { %v634_v13 = vpop.f32.mrf.mxu0 }
  0xec   : > { %v635_v14 = vadd.f32 %v634_v13, %v609_v12  ;;  %v654_v27 = vpop.f32.mrf.mxu1 }
  0xed   : > { %v655_v28 = vadd.f32 %v654_v27, %v610_v26 }
  0xee   : > { %662 = vrot.lane.b32.xlu1 %v635_v14, %s5572_s16  ;;  %658 = vrot.lane.b32.xlu0 %v635_v14, %s5574_s19 }
  0xf6   : > { %660 = vrot.lane.b32.xlu0 %v635_v14, %s5570_s13 }
  0xfe   : > { %674 = vrot.lane.b32.xlu0 %v635_v14, %s5568_s22 }
 0x160   : > { %v659_v21 = vpop.permute.xlu0 %658  ;;  %v663_v23 = vpop.permute.xlu1 %662 }
 0x161   : > { %701 = vrot.lane.b32.xlu1 %v659_v21, %s5568_s22 }
 0x168   : > { %v661_v22 = vpop.permute.xlu0 %660 }
 0x169   : > { %727 = vrot.lane.b32.xlu2 %v661_v22, %s5568_s22 }
 0x170   : > { %v675_v24 = vpop.permute.xlu0 %674 }
 0x171   : > { %3825 = vmatpush.xpose.msk.msrb.mxu1 %vm676_vm1, %v675_v24  ;;  %753 = vrot.lane.b32.xlu2 %v663_v23, %s5568_s22 }
 0x174   : > { %3826 = vmatmul.msk.f32.vlgmr.msrb.gmra.mxu1 %vm676_vm1, %v635_v14 }
 0x1c3   : > { %v728_v25 = vpop.permute.xlu2 %727 }
 0x1c4   : > { %3829 = vmatpush.xpose.msk.msra.mxu2 %vm676_vm1, %v728_v25 }
 0x1c7   : > { %3830 = vmatmul.msk.f32.vlgmr.msra.gmra.mxu2 %vm676_vm1, %v661_v22 }
 0x1c8   : > { %898 = vmatpush.msrb.mxu2 %v655_v28 }
 0x1cb   : > { %v754_v30 = vpop.permute.xlu2 %753 }
 0x1d3   : > { %v702_v29 = vpop.permute.xlu1 %701 }
 0x1d4   : > { %3827 = vmatpush.xpose.msk.msra.mxu3 %vm676_vm1, %v702_v29 }
 0x1d7   : > { %3828 = vmatmul.msk.f32.vlgmr.msra.gmra.mxu3 %vm676_vm1, %v659_v21 }
 0x1d8   : > { %3831 = vmatpush.xpose.msk.msrb.mxu3 %vm676_vm1, %v754_v30 }
 0x1df   : > { %3832 = vmatmul.msk.f32.vlgmr.msrb.gmra.mxu3 %vm676_vm1, %v663_v23 }
 0x1f1   : > { %v698_v34 = vpop.f32.mrf.mxu1 }
 0x1f2   : > { %v779_v35 = vmul.f32 0.25, %v698_v34 }
 0x1f4   : > { %v784_v36 = vsel %vm783_vm2, %v779_v35, -inf }
 0x24a   : > { %v750_v31 = vpop.f32.mrf.mxu2 }
 0x24b   : > { %v781_v32 = vmul.f32 0.25, %v750_v31 }
 0x24d   : > { %v790_v33 = vsel %vm783_vm2, %v781_v32, -inf }
 0x24e   : > { %791 = vmax.xlane.f32.xlu2 %v790_v33 }
 0x256   : > { %785 = vmax.xlane.f32.xlu2 %v784_v36 }
 0x25a   : > { %v724_v37 = vpop.f32.mrf.mxu3 }
 0x25b   : > { %v780_v38 = vmul.f32 0.25, %v724_v37 }
 0x25d   : > { %v787_v39 = vsel %vm783_vm2, %v780_v38, -inf }
 0x25e   : > { %788 = vmax.xlane.f32.xlu1 %v787_v39 }
 0x262   : > { %v776_v40 = vpop.f32.mrf.mxu3 }
 0x263   : > { %v782_v41 = vmul.f32 0.25, %v776_v40 }
 0x265   : > { %v793_v42 = vsel %vm783_vm2, %v782_v41, -inf }
 0x266   : > { %794 = vmax.xlane.f32.xlu0 %v793_v42 }
 0x2c1   : > { %v792_v43 = vpop.xlane.xlu2 %791 }
 0x2c2   : > { %v798_v44 = vsub.f32 %v781_v32, %v792_v43 }
 0x2c4   : > { %v804_v45 = vmul.f32 1.442695, %v798_v44 }
 0x2c6   : > { %4158 = vpow2.f32 %v804_v45 }
 0x2c9   : > { %v786_v58 = vpop.xlane.xlu2 %785 }
 0x2ca   : > { %v796_v59 = vsub.f32 %v779_v35, %v786_v58  ;;  %v992_v58 = vld [vmem:[%s5548_s3 + $0x18] sm:$0xff] }
 0x2cc   : > { %v4159_v46 = vpop.eup %4158  ;;  %v800_v60 = vmul.f32 1.442695, %v796_v59  ;;  %v991_v59 = vld [vmem:[%s5548_s3 + $0x10] sm:$0xff] }
 0x2cd   : > { %v814_v47 = vsel %vm783_vm2, %v4159_v46, 0.0 }
 0x2ce   : > { %815 = vadd.xlane.f32.xlu2 %v814_v47 }
 0x2d1   : > { %v789_v48 = vpop.xlane.xlu1 %788 }
 0x2d2   : > { %v797_v49 = vsub.f32 %v780_v38, %v789_v48 }
 0x2d4   : > { %v802_v50 = vmul.f32 1.442695, %v797_v49 }
 0x2d6   : > { %4160 = vpow2.f32 %v802_v50 }
 0x2d9   : > { %v795_v51 = vpop.xlane.xlu0 %794 }
 0x2da   : > { %v799_v52 = vsub.f32 %v782_v41, %v795_v51 }
 0x2dc   : > { %v4933_v53 = vpop.eup %4160  ;;  %v806_v54 = vmul.f32 1.442695, %v799_v52 }
 0x2dd   : > { %v811_v55 = vsel %vm783_vm2, %v4933_v53, 0.0 }
 0x2de   : > { %4162 = vpow2.f32 %v806_v54  ;;  %812 = vadd.xlane.f32.xlu1 %v811_v55  ;;  %v996_v54 = vld [vmem:[%s5548_s3 + $0x38] sm:$0xff]  ;;  %v995_v55 = vld [vmem:[%s5548_s3 + $0x30] sm:$0xff] }
 0x2df   : > { %4164 = vpow2.f32 %v800_v60  ;;  %1012 = vmatpush.msra.mxu2 %v996_v54  ;;  %v990_v60 = vld [vmem:[%s5548_s3 + $0x8] sm:$0xff] }
 0x2e1   : > { %1013 = vmatpush.msra.mxu2 %v995_v55 }
 0x2e4   : > { %v4937_v56 = vpop.eup %4162 }
 0x2e5   : > { %v817_v57 = vsel %vm783_vm2, %v4937_v56, 0.0  ;;  %v4944_v61 = vpop.eup %4164 }
 0x2e6   : > { %818 = vadd.xlane.f32.xlu0 %v817_v57  ;;  %668 = vrot.lane.b32.xlu2 %v655_v28, %s5570_s13  ;;  %v808_v62 = vsel %vm783_vm2, %v4944_v61, 0.0  ;;  %v993_v57 = vld [vmem:[%s5548_s3 + $0x20] sm:$0xff] }
 0x2f7   : > { %665 = vrot.lane.b32.xlu1 %v655_v28, %s5574_s19 }
 0x2fa   : > { %671 = vrot.lane.b32.xlu0 %v655_v28, %s5572_s16 }
 0x321   : > { %809 = vadd.xlane.f32.xlu1 %v808_v62 }
 0x341   : > { %v816_v63 = vpop.xlane.xlu2 %815 }
 0x342   : > { %4166 = vrcp.f32 %v816_v63  ;;  %v861_v5 = vand.u32 2147483648, %v816_v63  ;;  %v859_v6 = vand.u32 2147483647, %v816_v63  ;;  %vm855_vm4 = vweird.f32 %v816_v63 }
 0x344   : > { %v862_v9 = vor.u32 1.1754944e-38, %v861_v5  ;;  %vm860_vm6 = vcmp.eq.f32.partialorder %v859_v6, 8.507059e+37  ;;  %v4123_v5 = vld [vmem:[#allocation7] ss:$0 sm:$0xff] }
 0x348   : > { %v4167_v0 = vpop.eup %4166 }
 0x349   : > { %v851_v1 = vmul.f32 %v4167_v0, %v816_v63  ;;  %v669_v2 = vpop.permute.xlu2 %668  ;;  %vm856_vm3 = vweird.f32 %v4167_v0 }
 0x34a   : > { %944 = vmatpush.msrb.mxu0 %v669_v2  ;;  %vm857_vm5 = vmor %vm855_vm4, %vm856_vm3 }
 0x34b   : > { %v852_v3 = vsub.f32 1.0, %v851_v1 }
 0x34d   : > { %v853_v4 = vmul.f32 %v4167_v0, %v852_v3 }
 0x34f   : > { %v854_v7 = vadd.f32 %v4167_v0, %v853_v4 }
 0x351   : > { %v813_v10 = vpop.xlane.xlu1 %812  ;;  %v858_v11 = vsel %vm857_vm5, %v4167_v0, %v854_v7 }
 0x352   : > { %4168 = vrcp.f32 %v813_v10  ;;  %v863_v12 = vsel %vm860_vm6, %v862_v9, %v858_v11  ;;  %v846_v21 = vand.u32 2147483648, %v813_v10  ;;  %vm840_vm8 = vweird.f32 %v813_v10 }
 0x353   : > { %v864_v13 = vmul.f32 %v4159_v46, %v863_v12  ;;  %v844_v22 = vand.u32 2147483647, %v813_v10  ;;  %vm985_vm6 = vcmask 261120   ;;  %v4652_v11 = vmov 64.0  }
 0x354   : > { %v847_v26 = vor.u32 1.1754944e-38, %v846_v21 }
 0x355   : > { %3835 = vmatmul.msk.f32.vlgmr.msrb.gmra.mxu0 %vm783_vm2, %v864_v13  ;;  %vm845_vm10 = vcmp.eq.f32.partialorder %v844_v22, 8.507059e+37  ;;  %v1071_v22 = vld [vmem:[%s5550_s5 + $0x38] sm:$0xff] }
 0x358   : > { %v4169_v14 = vpop.eup %4168 }
 0x359   : > { %v836_v15 = vmul.f32 %v4169_v14, %v813_v10  ;;  %v819_v16 = vpop.xlane.xlu0 %818  ;;  %vm841_vm7 = vweird.f32 %v4169_v14 }
 0x35a   : > { %4170 = vrcp.f32 %v819_v16  ;;  %vm842_vm9 = vmor %vm840_vm8, %vm841_vm7  ;;  %v876_v27 = vand.u32 2147483648, %v819_v16  ;;  %v874_v29 = vand.u32 2147483647, %v819_v16  ;;  %vm870_vm12 = vweird.f32 %v819_v16 }
 0x35b   : > { %v837_v17 = vsub.f32 1.0, %v836_v15  ;;  %vm987_vm7 = vcmask 392192  }
 0x35c   : > { %v877_v32 = vor.u32 1.1754944e-38, %v876_v27  ;;  %vm875_vm14 = vcmp.eq.f32.partialorder %v874_v29, 8.507059e+37  ;;  %v1066_v27 = vld [vmem:[%s5550_s5 + $0x10] sm:$0xff]  ;;  %v1064_v29 = vld [vmem:[%s5550_s5] sm:$0xff] }
 0x35d   : > { %v838_v18 = vmul.f32 %v4169_v14, %v837_v17 }
 0x35f   : > { %v839_v19 = vadd.f32 %v4169_v14, %v838_v18 }
 0x360   : > { %v4171_v20 = vpop.eup %4170 }
 0x361   : > { %v866_v23 = vmul.f32 %v4171_v20, %v819_v16  ;;  %v843_v24 = vsel %vm842_vm9, %v4169_v14, %v839_v19  ;;  %vm871_vm11 = vweird.f32 %v4171_v20 }
 0x362   : > { %v848_v30 = vsel %vm845_vm10, %v847_v26, %v843_v24  ;;  %vm872_vm13 = vmor %vm870_vm12, %vm871_vm11  ;;  %v1069_v24 = vld [vmem:[%s5550_s5 + $0x28] sm:$0xff]  ;;  %v1067_v26 = vld [vmem:[%s5550_s5 + $0x18] sm:$0xff] }
 0x363   : > { %v867_v25 = vsub.f32 1.0, %v866_v23  ;;  %v849_v35 = vmul.f32 %v4933_v53, %v848_v30  ;;  %v1070_v23 = vld [vmem:[%s5550_s5 + $0x30] sm:$0xff] }
 0x365   : > { %v868_v28 = vmul.f32 %v4171_v20, %v867_v25  ;;  %v1068_v25 = vld [vmem:[%s5550_s5 + $0x20] sm:$0xff] }
 0x367   : > { %v869_v31 = vadd.f32 %v4171_v20, %v868_v28  ;;  %v1065_v28 = vld [vmem:[%s5550_s5 + $0x8] sm:$0xff] }
 0x369   : > { %v873_v33 = vsel %vm872_vm13, %v4171_v20, %v869_v31  ;;  %v666_v34 = vpop.permute.xlu1 %665 }
 0x36a   : > { %v878_v36 = vsel %vm875_vm14, %v877_v32, %v873_v33  ;;  %921 = vmatpush.msra.mxu3 %v666_v34 }
 0x36b   : > { %3834 = vmatmul.msk.f32.vlgmr.msra.gmra.mxu3 %vm783_vm2, %v849_v35  ;;  %v879_v37 = vmul.f32 %v4937_v56, %v878_v36  ;;  %v994_v56 = vld [vmem:[%s5548_s3 + $0x28] sm:$0xff] }
 0x36c   : > { %v672_v38 = vpop.permute.xlu0 %671  ;;  %1014 = vmatpush.msra.mxu2 %v994_v56  ;;  %1087 = vmatpush.msrb.mxu3 %v1071_v22 }
 0x36d   : > { %967 = vmatpush.msra.mxu1 %v672_v38 }
 0x36e   : > { %3836 = vmatmul.msk.f32.vlgmr.msra.gmra.mxu1 %vm783_vm2, %v879_v37  ;;  %1015 = vmatpush.msra.mxu2 %v993_v57 }
 0x36f   : > { %1088 = vmatpush.msrb.mxu3 %v1070_v23 }
 0x370   : > { %1016 = vmatpush.msra.mxu2 %v992_v58  ;;  %v1139_v58 = vld [vmem:[%s5602_s4] sm:$0xff] }
 0x371   : > { %1089 = vmatpush.msrb.mxu3 %v1069_v24  ;;  %1162 = vmatpush.msra.mxu0 %v1139_v58 }
 0x372   : > { %1017 = vmatpush.msra.mxu2 %v991_v59 }
 0x373   : > { %1090 = vmatpush.msrb.mxu3 %v1068_v25 }
 0x374   : > { %1018 = vmatpush.msra.mxu2 %v990_v60 }
 0x375   : > { %1091 = vmatpush.msrb.mxu3 %v1067_v26 }
 0x377   : > { %1092 = vmatpush.msrb.mxu3 %v1066_v27 }
 0x379   : > { %1093 = vmatpush.msrb.mxu3 %v1065_v28 }
 0x37b   : > { %1094 = vmatpush.msrb.mxu3 %v1064_v29 }
 0x394   : > { %v810_v39 = vpop.xlane.xlu1 %809 }
 0x395   : > { %4172 = vrcp.f32 %v810_v39  ;;  %v831_v43 = vand.u32 2147483648, %v810_v39  ;;  %v829_v45 = vand.u32 2147483647, %v810_v39  ;;  %vm825_vm3 = vweird.f32 %v810_v39 }
 0x396   : > { %4174 = vrcp.f32 %v4652_v11 }
 0x397   : > { %v832_v47 = vor.u32 1.1754944e-38, %v831_v43  ;;  %vm830_vm5 = vcmp.eq.f32.partialorder %v829_v45, 8.507059e+37  ;;  %v4126_v45 = vld [vmem:[#allocation8] ss:$0 sm:$0xff] }
 0x39b   : > { %v4173_v40 = vpop.eup %4172 }
 0x39c   : > { %v821_v41 = vmul.f32 %v4173_v40, %v810_v39  ;;  %vm826_vm15 = vweird.f32 %v4173_v40  ;;  %v4175_v12 = vpop.eup %4174  ;;  %v4124_v39 = vld [vmem:[#allocation11] ss:$0 sm:$0xff] }
 0x39d   : > { %vm827_vm4 = vmor %vm825_vm3, %vm826_vm15  ;;  %v1031_v13 = vmul.f32 64.0, %v4175_v12  ;;  %vm1035_vm8 = vweird.f32 %v4175_v12 }
 0x39e   : > { %v822_v42 = vsub.f32 1.0, %v821_v41 }
 0x39f   : > { %v1032_v14 = vsub.f32 1.0, %v1031_v13 }
 0x3a0   : > { %v823_v44 = vmul.f32 %v4173_v40, %v822_v42  ;;  %v4125_v42 = vld [vmem:[#allocation13] ss:$0 sm:$0xff] }
 0x3a1   : > { %v1033_v15 = vmul.f32 %v4175_v12, %v1032_v14 }
 0x3a2   : > { %v824_v46 = vadd.f32 %v4173_v40, %v823_v44 }
 0x3a3   : > { %v1034_v16 = vadd.f32 %v4175_v12, %v1033_v15  ;;  %v4653_v15 = vmov -1.0  }
 0x3a4   : > { %v828_v48 = vsel %vm827_vm4, %v4173_v40, %v824_v46 }
 0x3a5   : > { %v833_v49 = vsel %vm830_vm5, %v832_v47, %v828_v48  ;;  %v4988_v17 = vsel %vm1035_vm8, %v4175_v12, %v1034_v16 }
 0x3a6   : > { %v834_v50 = vmul.f32 %v4944_v61, %v833_v49  ;;  %v989_v61 = vld [vmem:[%s5548_s3] sm:$0xff] }
 0x3a7   : > { %1019 = vmatpush.msra.mxu2 %v989_v61 }
 0x3a8   : > { %3833 = vmatmul.msk.f32.vlgmr.msrb.gmra.mxu2 %vm783_vm2, %v834_v50 }
 0x3d2   : > { %v946_v51 = vpop.f32.mrf.mxu0 }
 0x3d3   : > { %977 = vrot.lane.b32.xlu2 %v946_v51, %s5566_s21  ;;  %s5603_s21 = smov 32  }
 0x3eb   : > { %v969_v53 = vpop.f32.mrf.mxu1 }
 0x3ee   : > { %v923_v52 = vpop.f32.mrf.mxu3 }
 0x3ef   : > { %973 = vrot.lane.b32.xlu0 %v923_v52, %s5562_s17  ;;  %s5604_s17 = smov 16  }
 0x3f7   : > { %981 = vrot.lane.b32.xlu0 %v969_v53, %s5564_s24  ;;  %s5605_s24 = smov 48  }
 0x42b   : > { %v900_v63 = vpop.f32.mrf.mxu2 }
 0x42d   : > { %v978_v1 = vpop.permute.xlu2 %977 }
 0x461   : > { %v974_v62 = vpop.permute.xlu0 %973 }
 0x462   : > { %v984_v0 = vsel %vm676_vm1, %v900_v63, %v974_v62 }
 0x463   : > { %v986_v3 = vsel %vm985_vm6, %v984_v0, %v978_v1 }
 0x469   : > { %v982_v2 = vpop.permute.xlu0 %981 }
 0x46a   : > { %v988_v4 = vsel %vm987_vm7, %v986_v3, %v982_v2 }
 0x46b   : > { %3837 = vmatmul.msk.f32.vlgmr.msra.gmra.mxu2 %vm613_vm0, %v988_v4 }
 0x4ee   : > { %v1021_v6 = vpop.f32.mrf.mxu2 }
 0x4ef   : > { %v1022_v7 = vadd.f32 %v4123_v5, %v1021_v6 }
 0x4f1   : > { %v1024_v9 = vadd.f32 %v1022_v7, %v4904_v8 }
 0x4f3   : > { %v1027_v10 = vsel %vm613_vm0, %v1024_v9, 0.0 }
 0x4f4   : > { %1028 = vadd.xlane.f32.xlu2 %v1027_v10 }
 0x567   : > { %v1029_v18 = vpop.xlane.xlu2 %1028 }
 0x568   : > { %v1037_v19 = vmul.f32 %v4988_v17, %v1029_v18 }
 0x56a   : > { %v1038_v20 = vsub.f32 %v1024_v9, %v1037_v19 }
 0x56c   : > { %v1039_v21 = vmul.f32 %v1038_v20, %v1038_v20 }
 0x56e   : > { %v1040_v8 = vsel %vm613_vm0, %v1039_v21, 0.0 }
 0x56f   : > { %1041 = vadd.xlane.f32.xlu0 %v1040_v8  ;;  %v4127_v8 = vld [vmem:[#allocation10] ss:$0 sm:$0xff] }
 0x5e2   : > { %v1042_v30 = vpop.xlane.xlu0 %1041 }
 0x5e3   : > { %v1043_v31 = vmul.f32 %v1042_v30, %v4988_v17 }
 0x5e5   : > { %v1044_v32 = vadd.f32 1e-05, %v1043_v31  ;;  %v1215_v31 = vld [vmem:[#allocation5 + $0xf0] sm:$0xff] }
 0x5e6   : > { %1235 = vmatpush.msrb.mxu1 %v1215_v31 }
 0x5e7   : > { %4176 = vrsqrt.f32 %v1044_v32  ;;  %vm1051_vm10 = vweird.f32 %v1044_v32 }
 0x5ed   : > { %v4177_v33 = vpop.eup %4176 }
 0x5ee   : > { %v1046_v34 = vmul.f32 %v4177_v33, %v1044_v32  ;;  %vm1052_vm9 = vweird.f32 %v4177_v33  ;;  %v1216_v32 = vld [vmem:[#allocation5 + $0xf8] sm:$0xff] }
 0x5ef   : > { %vm1053_vm11 = vmor %vm1051_vm10, %vm1052_vm9  ;;  %1255 = vmatpush.msrb.mxu0 %v1216_v32 }
 0x5f0   : > { %v1047_v35 = vmul.f32 %v4177_v33, %v1046_v34  ;;  %v1214_v34 = vld [vmem:[#allocation5 + $0xe8] sm:$0xff] }
 0x5f1   : > { %1256 = vmatpush.msrb.mxu0 %v1214_v34 }
 0x5f2   : > { %v1048_v36 = vmul.f32 0.5, %v1047_v35  ;;  %v1211_v35 = vld [vmem:[#allocation5 + $0xd0] sm:$0xff] }
 0x5f4   : > { %v1049_v37 = vsub.f32 1.5, %v1048_v36  ;;  %v1212_v36 = vld [vmem:[#allocation5 + $0xd8] sm:$0xff] }
 0x5f5   : > { %1257 = vmatpush.msrb.mxu0 %v1212_v36 }
 0x5f6   : > { %v1050_v38 = vmul.f32 %v4177_v33, %v1049_v37  ;;  %v1209_v37 = vld [vmem:[#allocation5 + $0xc0] sm:$0xff] }
 0x5f8   : > { %v1054_v40 = vsel %vm1053_vm11, %v4177_v33, %v1050_v38  ;;  %v1213_v33 = vld [vmem:[#allocation5 + $0xe0] sm:$0xff]  ;;  %v1210_v38 = vld [vmem:[#allocation5 + $0xc8] sm:$0xff] }
 0x5f9   : > { %v1055_v41 = vmul.f32 %v1054_v40, %v1038_v20  ;;  %1236 = vmatpush.msrb.mxu1 %v1213_v33  ;;  %1258 = vmatpush.msrb.mxu0 %v1210_v38  ;;  %v1208_v40 = vld [vmem:[#allocation5 + $0xb8] sm:$0xff] }
 0x5fb   : > { %v1059_v43 = vmul.f32 %v4124_v39, %v1055_v41  ;;  %1237 = vmatpush.msrb.mxu1 %v1211_v35  ;;  %v1207_v39 = vld [vmem:[#allocation5 + $0xb0] sm:$0xff]  ;;  %1259 = vmatpush.msrb.mxu0 %v1208_v40  ;;  %v1205_v41 = vld [vmem:[#allocation5 + $0xa0] sm:$0xff] }
 0x5fd   : > { %v1063_v44 = vadd.f32 %v4125_v42, %v1059_v43  ;;  %1238 = vmatpush.msrb.mxu1 %v1209_v37  ;;  %v1206_v42 = vld [vmem:[#allocation5 + $0xa8] sm:$0xff]  ;;  %v1203_v43 = vld [vmem:[#allocation5 + $0x90] sm:$0xff] }
 0x5fe   : > { %1260 = vmatpush.msrb.mxu0 %v1206_v42 }
 0x5ff   : > { %3838 = vmatmul.msk.f32.vlgmr.msrb.gmra.mxu3 %vm613_vm0, %v1063_v44  ;;  %1239 = vmatpush.msrb.mxu1 %v1207_v39 }
 0x601   : > { %1240 = vmatpush.msrb.mxu1 %v1205_v41 }
 0x603   : > { %1241 = vmatpush.msrb.mxu1 %v1203_v43 }
 0x682   : > { %v1096_v46 = vpop.f32.mrf.mxu3 }
 0x683   : > { %v1097_v47 = vadd.f32 %v4126_v45, %v1096_v46  ;;  %v1201_v45 = vld [vmem:[#allocation5 + $0x80] sm:$0xff]  ;;  %v1202_v46 = vld [vmem:[#allocation5 + $0x88] sm:$0xff] }
 0x684   : > { %1242 = vmatpush.msrb.mxu1 %v1201_v45 }
 0x685   : > { %v1100_v48 = vmul.f32 0.70710677, %v1097_v47  ;;  %v1099_v19 = vmul.f32 0.5, %v1097_v47 }
 0x687   : > { %v1103_v49 = vand.u32 2147483647, %v1100_v48  ;;  %vm1101_vm3 = vcmp.ge.f32.partialorder %v1100_v48, 0.0 }
 0x688   : > { %v1102_v16 = vsel %vm1101_vm3, 1.0, %v4653_v15 }
 0x689   : > { %v1104_v50 = vmul.f32 0.3275911, %v1103_v49  ;;  %v1130_v63 = vsub.f32 0.0, %v1103_v49 }
 0x68b   : > { %v1105_v51 = vadd.f32 1.0, %v1104_v50  ;;  %v1131_v2 = vmul.f32 %v1130_v63, %v1103_v49 }
 0x68d   : > { %4178 = vrcp.f32 %v1105_v51  ;;  %v1117_v55 = vand.u32 2147483648, %v1105_v51  ;;  %v1115_v57 = vand.u32 2147483647, %v1105_v51  ;;  %vm1111_vm13 = vweird.f32 %v1105_v51 }
 0x68e   : > { %v1132_v5 = vmul.f32 1.442695, %v1131_v2 }
 0x68f   : > { %v1118_v60 = vor.u32 1.1754944e-38, %v1117_v55  ;;  %vm1116_vm15 = vcmp.eq.f32.partialorder %v1115_v57, 8.507059e+37 }
 0x690   : > { %4180 = vpow2.f32 %v1132_v5 }
 0x693   : > { %v4179_v52 = vpop.eup %4178 }
 0x694   : > { %v1107_v53 = vmul.f32 %v4179_v52, %v1105_v51  ;;  %vm1112_vm12 = vweird.f32 %v4179_v52 }
 0x695   : > { %vm1113_vm14 = vmor %vm1111_vm13, %vm1112_vm12 }
 0x696   : > { %v1108_v54 = vsub.f32 1.0, %v1107_v53  ;;  %v4181_v12 = vpop.eup %4180 }
 0x698   : > { %v1109_v56 = vmul.f32 %v4179_v52, %v1108_v54 }
 0x69a   : > { %v1110_v59 = vadd.f32 %v4179_v52, %v1109_v56  ;;  %v4128_v56 = vld [vmem:[#allocation14] ss:$0 sm:$0xff] }
 0x69c   : > { %v1114_v61 = vsel %vm1113_vm14, %v4179_v52, %v1110_v59  ;;  %v4129_v59 = vld [vmem:[#allocation16] ss:$0 sm:$0xff] }
 0x69d   : > { %v1119_v62 = vsel %vm1116_vm15, %v1118_v60, %v1114_v61 }
 0x69e   : > { %v1121_v0 = vmul.f32 1.0614054, %v1119_v62 }
 0x6a0   : > { %v1122_v1 = vadd.f32 -1.4531521, %v1121_v0 }
 0x6a2   : > { %v1123_v3 = vmul.f32 %v1122_v1, %v1119_v62 }
 0x6a4   : > { %v1124_v4 = vadd.f32 1.4214138, %v1123_v3 }
 0x6a6   : > { %v1125_v6 = vmul.f32 %v1124_v4, %v1119_v62 }
 0x6a8   : > { %v1126_v7 = vadd.f32 -0.28449672, %v1125_v6 }
 0x6aa   : > { %v1127_v9 = vmul.f32 %v1126_v7, %v1119_v62 }
 0x6ac   : > { %v1128_v10 = vadd.f32 0.2548296, %v1127_v9 }
 0x6ae   : > { %v1129_v11 = vmul.f32 %v1128_v10, %v1119_v62  ;;  %v3840_v62 = vld [vmem:[%s5547_s2 + $0x2] sm:$0x3] }
 0x6af   : > { %v1220_v63 = vperm.slane %v3840_v62, 0  ;;  %v1221_v9 = vperm.slane %v3840_v62, 1 }
 0x6b0   : > { %v1134_v13 = vmul.f32 %v4181_v12, %v1129_v11 }
 0x6b2   : > { %v1135_v14 = vsub.f32 1.0, %v1134_v13 }
 0x6b4   : > { %v1136_v18 = vmul.f32 %v1135_v14, %v1102_v16 }
 0x6b6   : > { %v1137_v20 = vadd.f32 1.0, %v1136_v18 }
 0x6b8   : > { %v1138_v21 = vmul.f32 %v1137_v20, %v1099_v19 }
 0x6ba   : > { %3839 = vmatmul.msk.f32.vlgmr.msra.gmra.mxu0 %vm783_vm2, %v1138_v21 }
 0x737   : > { %v1164_v22 = vpop.f32.mrf.mxu0 }
 0x738   : > { %v1165_v23 = vadd.f32 %v4127_v8, %v1164_v22 }
 0x73a   : > { %v1167_v24 = vadd.f32 %v1165_v23, %v1063_v44  ;;  %v1204_v44 = vld [vmem:[#allocation5 + $0x98] sm:$0xff] }
 0x73b   : > { %1261 = vmatpush.msrb.mxu0 %v1204_v44 }
 0x73c   : > { %v1170_v25 = vsel %vm613_vm0, %v1167_v24, 0.0 }
 0x73d   : > { %1171 = vadd.xlane.f32.xlu1 %v1170_v25  ;;  %1262 = vmatpush.msrb.mxu0 %v1202_v46 }
 0x7b0   : > { %v1172_v26 = vpop.xlane.xlu1 %1171 }
 0x7b1   : > { %v1173_v27 = vmul.f32 %v1172_v26, %v4988_v17 }
 0x7b3   : > { %v1174_v28 = vsub.f32 %v1167_v24, %v1173_v27 }
 0x7b5   : > { %v1175_v29 = vmul.f32 %v1174_v28, %v1174_v28 }
 0x7b7   : > { %v1176_v30 = vsel %vm613_vm0, %v1175_v29, 0.0 }
 0x7b8   : > { %1177 = vadd.xlane.f32.xlu1 %v1176_v30 }
 0x82b   : > { %v1178_v47 = vpop.xlane.xlu1 %1177 }
 0x82c   : > { %v1179_v48 = vmul.f32 %v1178_v47, %v4988_v17 }
 0x82e   : > { %v1180_v49 = vadd.f32 1e-05, %v1179_v48 }
 0x830   : > { %4182 = vrsqrt.f32 %v1180_v49  ;;  %vm1187_vm5 = vweird.f32 %v1180_v49 }
 0x836   : > { %v4183_v50 = vpop.eup %4182 }
 0x837   : > { %v1182_v51 = vmul.f32 %v4183_v50, %v1180_v49  ;;  %vm1188_vm4 = vweird.f32 %v4183_v50 }
 0x838   : > { %vm1189_vm8 = vmor %vm1187_vm5, %vm1188_vm4 }
 0x839   : > { %v1183_v52 = vmul.f32 %v4183_v50, %v1182_v51 }
 0x83b   : > { %v1184_v53 = vmul.f32 0.5, %v1183_v52 }
 0x83d   : > { %v1185_v54 = vsub.f32 1.5, %v1184_v53 }
 0x83f   : > { %v1186_v55 = vmul.f32 %v4183_v50, %v1185_v54 }
 0x841   : > { %v1190_v57 = vsel %vm1189_vm8, %v4183_v50, %v1186_v55 }
 0x842   : > { %v1191_v58 = vmul.f32 %v1190_v57, %v1174_v28 }
 0x844   : > { %v1195_v60 = vmul.f32 %v4128_v56, %v1191_v58 }
 0x846   : > { %v5027_v61 = vadd.f32 %v4129_v59, %v1195_v60 }
 0x848   : > { %3841 = vmatmul.msk.f32.vlgmr.msrb.gmra.mxu1 %vm613_vm0, %v5027_v61  ;;  %3842 = vmatmul.msk.f32.vlgmr.msrb.gmra.mxu0 %vm613_vm0, %v5027_v61 }
 0x8c5   : > { %v1244_v0 = vpop.f32.mrf.mxu1  ;;  %v1264_v10 = vpop.f32.mrf.mxu0 }
 0x8c6   : > { %v1245_v1 = vadd.f32 %v1244_v0, %v1220_v63  ;;  %v1265_v11 = vadd.f32 %v1264_v10, %v1221_v9 }
 0x8c8   : > { %1270 = vrot.lane.b32.xlu0 %v1245_v1, %s5570_s13  ;;  %1268 = vrot.lane.b32.xlu1 %v1245_v1, %s5574_s19 }
 0x8c9   : > { %1272 = vrot.lane.b32.xlu2 %v1245_v1, %s5572_s16 }
 0x8d1   : > { %1284 = vrot.lane.b32.xlu2 %v1245_v1, %s5568_s22 }
 0x923   : > { %v1273_v2 = vpop.permute.xlu2 %1272 }
 0x924   : > { %1362 = vrot.lane.b32.xlu0 %v1273_v2, %s5568_s22 }
 0x92b   : > { %v1285_v3 = vpop.permute.xlu2 %1284 }
 0x92c   : > { %3843 = vmatpush.xpose.msk.msrb.mxu2 %vm676_vm1, %v1285_v3 }
 0x92f   : > { %3844 = vmatmul.msk.f32.vlgmr.msrb.gmra.mxu2 %vm676_vm1, %v1245_v1 }
 0x93a   : > { %v1271_v4 = vpop.permute.xlu0 %1270  ;;  %v1269_v5 = vpop.permute.xlu1 %1268 }
 0x93b   : > { %1310 = vrot.lane.b32.xlu1 %v1269_v5, %s5568_s22  ;;  %1336 = vrot.lane.b32.xlu2 %v1271_v4, %s5568_s22  ;;  %s5609_s22 = smov 64  }
 0x995   : > { %v1337_v6 = vpop.permute.xlu2 %1336 }
 0x996   : > { %v1363_v7 = vpop.permute.xlu0 %1362  ;;  %3847 = vmatpush.xpose.msk.msra.mxu1 %vm676_vm1, %v1337_v6 }
 0x997   : > { %3849 = vmatpush.xpose.msk.msra.mxu2 %vm676_vm1, %v1363_v7 }
 0x999   : > { %3848 = vmatmul.msk.f32.vlgmr.msra.gmra.mxu1 %vm676_vm1, %v1271_v4 }
 0x99a   : > { %3850 = vmatmul.msk.f32.vlgmr.msra.gmra.mxu2 %vm676_vm1, %v1273_v2 }
 0x9ad   : > { %v1311_v12 = vpop.permute.xlu1 %1310 }
 0x9ae   : > { %3845 = vmatpush.xpose.msk.msra.mxu3 %vm676_vm1, %v1311_v12 }
 0x9b1   : > { %3846 = vmatmul.msk.f32.vlgmr.msra.gmra.mxu3 %vm676_vm1, %v1269_v5 }
 0x9b2   : > { %1506 = vmatpush.msrb.mxu3 %v1265_v11  ;;  %v1307_v13 = vpop.f32.mrf.mxu2 }
 0x9b3   : > { %v1388_v8 = vmul.f32 0.25, %v1307_v13 }
 0x9b5   : > { %v1392_v22 = vsel %vm783_vm2, %v1388_v8, -inf }
 0xa16   : > { %v1359_v14 = vpop.f32.mrf.mxu1 }
 0xa17   : > { %v1390_v16 = vmul.f32 0.25, %v1359_v14 }
 0xa19   : > { %v1398_v18 = vsel %vm783_vm2, %v1390_v16, -inf }
 0xa1a   : > { %1399 = vmax.xlane.f32.xlu2 %v1398_v18 }
 0xa1d   : > { %v1385_v19 = vpop.f32.mrf.mxu2 }
 0xa1e   : > { %v1391_v20 = vmul.f32 0.25, %v1385_v19 }
 0xa20   : > { %v1401_v21 = vsel %vm783_vm2, %v1391_v20, -inf }
 0xa21   : > { %1402 = vmax.xlane.f32.xlu0 %v1401_v21 }
 0xa29   : > { %1393 = vmax.xlane.f32.xlu0 %v1392_v22 }
 0xa34   : > { %v1333_v23 = vpop.f32.mrf.mxu3 }
 0xa35   : > { %v1389_v24 = vmul.f32 0.25, %v1333_v23 }
 0xa37   : > { %v1395_v25 = vsel %vm783_vm2, %v1389_v24, -inf }
 0xa38   : > { %1396 = vmax.xlane.f32.xlu1 %v1395_v25 }
 0xa8d   : > { %v1400_v26 = vpop.xlane.xlu2 %1399 }
 0xa8e   : > { %v1406_v27 = vsub.f32 %v1390_v16, %v1400_v26 }
 0xa90   : > { %v1412_v28 = vmul.f32 1.442695, %v1406_v27 }
 0xa92   : > { %4184 = vpow2.f32 %v1412_v28 }
 0xa94   : > { %v1403_v29 = vpop.xlane.xlu0 %1402 }
 0xa95   : > { %v1407_v30 = vsub.f32 %v1391_v20, %v1403_v29 }
 0xa97   : > { %v1414_v31 = vmul.f32 1.442695, %v1407_v30 }
 0xa98   : > { %v4185_v32 = vpop.eup %4184 }
 0xa99   : > { %4186 = vpow2.f32 %v1414_v31  ;;  %v1422_v33 = vsel %vm783_vm2, %v4185_v32, 0.0 }
 0xa9a   : > { %1423 = vadd.xlane.f32.xlu0 %v1422_v33 }
 0xa9c   : > { %v1394_v41 = vpop.xlane.xlu0 %1393 }
 0xa9d   : > { %v1404_v42 = vsub.f32 %v1388_v8, %v1394_v41  ;;  %v3860_v41 = vld [vmem:[%s5548_s3 + $0x68] sm:$0xff] }
 0xa9f   : > { %v4187_v34 = vpop.eup %4186  ;;  %v1408_v43 = vmul.f32 1.442695, %v1404_v42  ;;  %v3859_v42 = vld [vmem:[%s5548_s3 + $0x60] sm:$0xff] }
 0xaa0   : > { %v1425_v35 = vsel %vm783_vm2, %v4187_v34, 0.0 }
 0xaa1   : > { %1426 = vadd.xlane.f32.xlu1 %v1425_v35 }
 0xaab   : > { %v1397_v36 = vpop.xlane.xlu1 %1396 }
 0xaac   : > { %v1405_v37 = vsub.f32 %v1389_v24, %v1397_v36 }
 0xaae   : > { %v1410_v38 = vmul.f32 1.442695, %v1405_v37  ;;  %1278 = vrot.lane.b32.xlu0 %v1265_v11, %s5570_s13  ;;  %s5608_s13 = smov 96  }
 0xab0   : > { %4188 = vpow2.f32 %v1410_v38 }
 0xab1   : > { %4190 = vpow2.f32 %v1408_v43  ;;  %v3858_v43 = vld [vmem:[%s5548_s3 + $0x58] sm:$0xff] }
 0xab6   : > { %v5058_v39 = vpop.eup %4188 }
 0xab7   : > { %v1419_v40 = vsel %vm783_vm2, %v5058_v39, 0.0  ;;  %v5064_v44 = vpop.eup %4190 }
 0xab8   : > { %1420 = vadd.xlane.f32.xlu2 %v1419_v40  ;;  %v1416_v45 = vsel %vm783_vm2, %v5064_v44, 0.0  ;;  %v3861_v40 = vld [vmem:[%s5548_s3 + $0x70] sm:$0xff] }
 0xaba   : > { %1281 = vrot.lane.b32.xlu1 %v1265_v11, %s5572_s16  ;;  %s5606_s16 = smov 112  }
 0xad0   : > { %1275 = vrot.lane.b32.xlu2 %v1265_v11, %s5574_s19  ;;  %s5607_s19 = smov 80  }
 0xae4   : > { %1417 = vadd.xlane.f32.xlu1 %v1416_v45  ;;  %v3856_v45 = vld [vmem:[%s5548_s3 + $0x48] sm:$0xff] }
 0xb0d   : > { %v1424_v46 = vpop.xlane.xlu0 %1423 }
 0xb0e   : > { %4192 = vrcp.f32 %v1424_v46  ;;  %v1469_v51 = vand.u32 2147483648, %v1424_v46  ;;  %v1467_v53 = vand.u32 2147483647, %v1424_v46  ;;  %vm1463_vm10 = vweird.f32 %v1424_v46 }
 0xb10   : > { %v1470_v56 = vor.u32 1.1754944e-38, %v1469_v51  ;;  %vm1468_vm12 = vcmp.eq.f32.partialorder %v1467_v53, 8.507059e+37 }
 0xb14   : > { %v4193_v47 = vpop.eup %4192  ;;  %v1427_v48 = vpop.xlane.xlu1 %1426 }
 0xb15   : > { %v1459_v49 = vmul.f32 %v4193_v47, %v1424_v46  ;;  %4194 = vrcp.f32 %v1427_v48  ;;  %vm1464_vm9 = vweird.f32 %v4193_v47  ;;  %v1484_v2 = vand.u32 2147483648, %v1427_v48  ;;  %v3855_v46 = vld [vmem:[%s5548_s3 + $0x40] sm:$0xff] }
 0xb16   : > { %vm1465_vm11 = vmor %vm1463_vm10, %vm1464_vm9  ;;  %vm1478_vm14 = vweird.f32 %v1427_v48  ;;  %v1482_v3 = vand.u32 2147483647, %v1427_v48 }
 0xb17   : > { %v1460_v50 = vsub.f32 1.0, %v1459_v49  ;;  %v1485_v5 = vor.u32 1.1754944e-38, %v1484_v2  ;;  %v3869_v2 = vld [vmem:[%s5550_s5 + $0x68] sm:$0xff] }
 0xb18   : > { %vm1483_vm3 = vcmp.eq.f32.partialorder %v1482_v3, 8.507059e+37  ;;  %v3868_v3 = vld [vmem:[%s5550_s5 + $0x60] sm:$0xff] }
 0xb19   : > { %v1461_v52 = vmul.f32 %v4193_v47, %v1460_v50 }
 0xb1b   : > { %v4195_v54 = vpop.eup %4194  ;;  %v1462_v55 = vadd.f32 %v4193_v47, %v1461_v52 }
 0xb1c   : > { %v1474_v57 = vmul.f32 %v4195_v54, %v1427_v48  ;;  %vm1479_vm13 = vweird.f32 %v4195_v54 }
 0xb1d   : > { %v1466_v58 = vsel %vm1465_vm11, %v4193_v47, %v1462_v55  ;;  %vm1480_vm15 = vmor %vm1478_vm14, %vm1479_vm13 }
 0xb1e   : > { %v1471_v59 = vsel %vm1468_vm12, %v1470_v56, %v1466_v58  ;;  %v1475_v60 = vsub.f32 1.0, %v1474_v57 }
 0xb1f   : > { %v1472_v62 = vmul.f32 %v4185_v32, %v1471_v59 }
 0xb20   : > { %v1476_v63 = vmul.f32 %v4195_v54, %v1475_v60  ;;  %v1279_v0 = vpop.permute.xlu0 %1278 }
 0xb21   : > { %1552 = vmatpush.msrb.mxu1 %v1279_v0 }
 0xb22   : > { %v1477_v1 = vadd.f32 %v4195_v54, %v1476_v63  ;;  %3853 = vmatmul.msk.f32.vlgmr.msrb.gmra.mxu1 %vm783_vm2, %v1472_v62 }
 0xb24   : > { %v1481_v4 = vsel %vm1480_vm15, %v4195_v54, %v1477_v1  ;;  %v4130_v54 = vld [vmem:[#allocation7 + $0x1] ss:$0 sm:$0xff]  ;;  %v3871_v1 = vld [vmem:[%s5550_s5 + $0x78] sm:$0xff] }
 0xb25   : > { %v1486_v6 = vsel %vm1483_vm3, %v1485_v5, %v1481_v4  ;;  %v3867_v4 = vld [vmem:[%s5550_s5 + $0x58] sm:$0xff]  ;;  %v3866_v5 = vld [vmem:[%s5550_s5 + $0x50] sm:$0xff] }
 0xb26   : > { %v1487_v10 = vmul.f32 %v4187_v34, %v1486_v6  ;;  %v3865_v6 = vld [vmem:[%s5550_s5 + $0x48] sm:$0xff] }
 0xb2b   : > { %v1421_v7 = vpop.xlane.xlu2 %1420 }
 0xb2c   : > { %v1282_v9 = vpop.permute.xlu1 %1281  ;;  %4196 = vrcp.f32 %v1421_v7  ;;  %v1454_v16 = vand.u32 2147483648, %v1421_v7  ;;  %v1452_v19 = vand.u32 2147483647, %v1421_v7  ;;  %vm1448_vm5 = vweird.f32 %v1421_v7 }
 0xb2d   : > { %1575 = vmatpush.msrb.mxu2 %v1282_v9 }
 0xb2e   : > { %3854 = vmatmul.msk.f32.vlgmr.msrb.gmra.mxu2 %vm783_vm2, %v1487_v10  ;;  %v1455_v21 = vor.u32 1.1754944e-38, %v1454_v16  ;;  %vm1453_vm9 = vcmp.eq.f32.partialorder %v1452_v19, 8.507059e+37 }
 0xb32   : > { %v4197_v11 = vpop.eup %4196 }
 0xb33   : > { %v1444_v12 = vmul.f32 %v4197_v11, %v1421_v7  ;;  %v1276_v13 = vpop.permute.xlu2 %1275  ;;  %vm1449_vm4 = vweird.f32 %v4197_v11  ;;  %v3864_v7 = vld [vmem:[%s5550_s5 + $0x40] sm:$0xff] }
 0xb34   : > { %1529 = vmatpush.msra.mxu0 %v1276_v13  ;;  %vm1450_vm8 = vmor %vm1448_vm5, %vm1449_vm4 }
 0xb35   : > { %v1445_v14 = vsub.f32 1.0, %v1444_v12 }
 0xb36   : > { %1692 = vmatpush.msrb.mxu0 %v3871_v1 }
 0xb37   : > { %v1446_v18 = vmul.f32 %v4197_v11, %v1445_v14 }
 0xb39   : > { %v1447_v20 = vadd.f32 %v4197_v11, %v1446_v18 }
 0xb3b   : > { %v1451_v8 = vsel %vm1450_vm8, %v4197_v11, %v1447_v20  ;;  %v4131_v20 = vld [vmem:[#allocation11 + $0x1] ss:$0 sm:$0xff] }
 0xb3c   : > { %v1456_v22 = vsel %vm1453_vm9, %v1455_v21, %v1451_v8 }
 0xb3d   : > { %v1457_v23 = vmul.f32 %v5058_v39, %v1456_v22  ;;  %v3862_v39 = vld [vmem:[%s5548_s3 + $0x78] sm:$0xff]  ;;  %v4132_v22 = vld [vmem:[#allocation13 + $0x1] ss:$0 sm:$0xff] }
 0xb3e   : > { %1620 = vmatpush.msra.mxu3 %v3862_v39 }
 0xb3f   : > { %3852 = vmatmul.msk.f32.vlgmr.msra.gmra.mxu0 %vm783_vm2, %v1457_v23 }
 0xb40   : > { %1621 = vmatpush.msra.mxu3 %v3861_v40 }
 0xb42   : > { %1622 = vmatpush.msra.mxu3 %v3860_v41 }
 0xb44   : > { %1623 = vmatpush.msra.mxu3 %v3859_v42 }
 0xb46   : > { %1624 = vmatpush.msra.mxu3 %v3858_v43 }
 0xb57   : > { %v1418_v24 = vpop.xlane.xlu1 %1417 }
 0xb58   : > { %4198 = vrcp.f32 %v1418_v24  ;;  %v1439_v28 = vand.u32 2147483648, %v1418_v24  ;;  %v1437_v30 = vand.u32 2147483647, %v1418_v24  ;;  %vm1433_vm11 = vweird.f32 %v1418_v24 }
 0xb5a   : > { %v1440_v32 = vor.u32 1.1754944e-38, %v1439_v28  ;;  %vm1438_vm13 = vcmp.eq.f32.partialorder %v1437_v30, 8.507059e+37 }
 0xb5e   : > { %v4199_v25 = vpop.eup %4198 }
 0xb5f   : > { %v1429_v26 = vmul.f32 %v4199_v25, %v1418_v24  ;;  %vm1434_vm10 = vweird.f32 %v4199_v25 }
 0xb60   : > { %vm1435_vm12 = vmor %vm1433_vm11, %vm1434_vm10 }
 0xb61   : > { %v1430_v27 = vsub.f32 1.0, %v1429_v26 }
 0xb63   : > { %v1431_v29 = vmul.f32 %v4199_v25, %v1430_v27 }
 0xb65   : > { %v1432_v31 = vadd.f32 %v4199_v25, %v1431_v29 }
 0xb67   : > { %v1436_v33 = vsel %vm1435_vm12, %v4199_v25, %v1432_v31  ;;  %v4133_v25 = vld [vmem:[#allocation8 + $0x1] ss:$0 sm:$0xff] }
 0xb68   : > { %v1441_v34 = vsel %vm1438_vm13, %v1440_v32, %v1436_v33 }
 0xb69   : > { %v1442_v35 = vmul.f32 %v5064_v44, %v1441_v34  ;;  %v3857_v44 = vld [vmem:[%s5548_s3 + $0x50] sm:$0xff] }
 0xb6a   : > { %1625 = vmatpush.msra.mxu3 %v3857_v44 }
 0xb6b   : > { %3851 = vmatmul.msk.f32.vlgmr.msrb.gmra.mxu3 %vm783_vm2, %v1442_v35 }
 0xb6c   : > { %1626 = vmatpush.msra.mxu3 %v3856_v45 }
 0xb6e   : > { %1627 = vmatpush.msra.mxu3 %v3855_v46 }
 0xb9f   : > { %v1554_v36 = vpop.f32.mrf.mxu1 }
 0xba0   : > { %1585 = vrot.lane.b32.xlu2 %v1554_v36, %s5603_s21 }
 0xbb1   : > { %v1577_v38 = vpop.f32.mrf.mxu2 }
 0xbbc   : > { %v1531_v37 = vpop.f32.mrf.mxu0 }
 0xbbd   : > { %1581 = vrot.lane.b32.xlu0 %v1531_v37, %s5604_s17 }
 0xbc5   : > { %1589 = vrot.lane.b32.xlu0 %v1577_v38, %s5605_s24  ;;  %v3873_v38 = vld [vmem:[%s5602_s4 + $0x8] sm:$0xff] }
 0xbc6   : > { %1769 = vmatpush.msra.mxu1 %v3873_v38 }
 0xbee   : > { %v1508_v48 = vpop.f32.mrf.mxu3 }
 0xbfa   : > { %v1586_v50 = vpop.permute.xlu2 %1585 }
 0xc2f   : > { %v1582_v47 = vpop.permute.xlu0 %1581 }
 0xc30   : > { %v1592_v49 = vsel %vm676_vm1, %v1508_v48, %v1582_v47 }
 0xc31   : > { %v1593_v52 = vsel %vm985_vm6, %v1592_v49, %v1586_v50 }
 0xc37   : > { %v1590_v51 = vpop.permute.xlu0 %1589 }
 0xc38   : > { %v1594_v53 = vsel %vm987_vm7, %v1593_v52, %v1590_v51 }
 0xc39   : > { %3863 = vmatmul.msk.f32.vlgmr.msra.gmra.mxu3 %vm613_vm0, %v1594_v53 }
 0xcbc   : > { %v1629_v55 = vpop.f32.mrf.mxu3 }
 0xcbd   : > { %v1630_v56 = vadd.f32 %v4130_v54, %v1629_v55 }
 0xcbf   : > { %v1632_v57 = vadd.f32 %v1630_v56, %v5027_v61  ;;  %v3870_v61 = vld [vmem:[%s5550_s5 + $0x70] sm:$0xff] }
 0xcc0   : > { %1693 = vmatpush.msrb.mxu0 %v3870_v61 }
 0xcc1   : > { %v1637_v58 = vsel %vm613_vm0, %v1632_v57, 0.0 }
 0xcc2   : > { %1638 = vadd.xlane.f32.xlu2 %v1637_v58  ;;  %1694 = vmatpush.msrb.mxu0 %v3869_v2 }
 0xcc4   : > { %1695 = vmatpush.msrb.mxu0 %v3868_v3 }
 0xcc6   : > { %1696 = vmatpush.msrb.mxu0 %v3867_v4 }
 0xcc8   : > { %1697 = vmatpush.msrb.mxu0 %v3866_v5 }
 0xcca   : > { %1698 = vmatpush.msrb.mxu0 %v3865_v6 }
 0xccc   : > { %1699 = vmatpush.msrb.mxu0 %v3864_v7 }
 0xd35   : > { %v1639_v59 = vpop.xlane.xlu2 %1638 }
 0xd36   : > { %v1640_v60 = vmul.f32 %v1639_v59, %v4988_v17 }
 0xd38   : > { %v1641_v62 = vsub.f32 %v1632_v57, %v1640_v60 }
 0xd3a   : > { %v1642_v63 = vmul.f32 %v1641_v62, %v1641_v62 }
 0xd3c   : > { %v1643_v0 = vsel %vm613_vm0, %v1642_v63, 0.0 }
 0xd3d   : > { %1644 = vadd.xlane.f32.xlu0 %v1643_v0  ;;  %v4134_v0 = vld [vmem:[#allocation10 + $0x1] ss:$0 sm:$0xff] }
 0xdb0   : > { %v1645_v9 = vpop.xlane.xlu0 %1644 }
 0xdb1   : > { %v1646_v10 = vmul.f32 %v1645_v9, %v4988_v17 }
 0xdb3   : > { %v1647_v11 = vadd.f32 1e-05, %v1646_v10  ;;  %v1824_v10 = vld [vmem:[#allocation5 + $0x170] sm:$0xff] }
 0xdb4   : > { %1844 = vmatpush.msra.mxu2 %v1824_v10 }
 0xdb5   : > { %4200 = vrsqrt.f32 %v1647_v11  ;;  %vm1654_vm15 = vweird.f32 %v1647_v11 }
 0xdbb   : > { %v4201_v12 = vpop.eup %4200 }
 0xdbc   : > { %v1649_v13 = vmul.f32 %v4201_v12, %v1647_v11  ;;  %vm1655_vm14 = vweird.f32 %v4201_v12  ;;  %v1825_v11 = vld [vmem:[#allocation5 + $0x178] sm:$0xff] }
 0xdbd   : > { %vm1656_vm3 = vmor %vm1654_vm15, %vm1655_vm14  ;;  %1864 = vmatpush.msrb.mxu1 %v1825_v11 }
 0xdbe   : > { %v1650_v14 = vmul.f32 %v4201_v12, %v1649_v13  ;;  %v1823_v13 = vld [vmem:[#allocation5 + $0x168] sm:$0xff] }
 0xdbf   : > { %1865 = vmatpush.msrb.mxu1 %v1823_v13 }
 0xdc0   : > { %v1651_v16 = vmul.f32 0.5, %v1650_v14  ;;  %v1820_v14 = vld [vmem:[#allocation5 + $0x150] sm:$0xff] }
 0xdc2   : > { %v1652_v18 = vsub.f32 1.5, %v1651_v16  ;;  %v1821_v16 = vld [vmem:[#allocation5 + $0x158] sm:$0xff] }
 0xdc3   : > { %1866 = vmatpush.msrb.mxu1 %v1821_v16 }
 0xdc4   : > { %v1653_v19 = vmul.f32 %v4201_v12, %v1652_v18  ;;  %v1818_v18 = vld [vmem:[#allocation5 + $0x140] sm:$0xff] }
 0xdc6   : > { %v1657_v21 = vsel %vm1656_vm3, %v4201_v12, %v1653_v19  ;;  %v1822_v12 = vld [vmem:[#allocation5 + $0x160] sm:$0xff]  ;;  %v1819_v19 = vld [vmem:[#allocation5 + $0x148] sm:$0xff] }
 0xdc7   : > { %v1658_v8 = vmul.f32 %v1657_v21, %v1641_v62  ;;  %1845 = vmatpush.msra.mxu2 %v1822_v12  ;;  %1867 = vmatpush.msrb.mxu1 %v1819_v19  ;;  %v1817_v21 = vld [vmem:[#allocation5 + $0x138] sm:$0xff] }
 0xdc9   : > { %v1662_v23 = vmul.f32 %v4131_v20, %v1658_v8  ;;  %1846 = vmatpush.msra.mxu2 %v1820_v14  ;;  %v1816_v20 = vld [vmem:[#allocation5 + $0x130] sm:$0xff]  ;;  %1868 = vmatpush.msrb.mxu1 %v1817_v21  ;;  %v1814_v8 = vld [vmem:[#allocation5 + $0x120] sm:$0xff] }
 0xdcb   : > { %v1666_v24 = vadd.f32 %v4132_v22, %v1662_v23  ;;  %1847 = vmatpush.msra.mxu2 %v1818_v18  ;;  %v1815_v22 = vld [vmem:[#allocation5 + $0x128] sm:$0xff]  ;;  %v1812_v23 = vld [vmem:[#allocation5 + $0x110] sm:$0xff] }
 0xdcc   : > { %1869 = vmatpush.msrb.mxu1 %v1815_v22 }
 0xdcd   : > { %3872 = vmatmul.msk.f32.vlgmr.msrb.gmra.mxu0 %vm613_vm0, %v1666_v24  ;;  %1848 = vmatpush.msra.mxu2 %v1816_v20 }
 0xdcf   : > { %1849 = vmatpush.msra.mxu2 %v1814_v8 }
 0xdd1   : > { %1850 = vmatpush.msra.mxu2 %v1812_v23 }
 0xe4a   : > { %v1701_v26 = vpop.f32.mrf.mxu0 }
 0xe4b   : > { %v1702_v27 = vadd.f32 %v4133_v25, %v1701_v26  ;;  %v1810_v25 = vld [vmem:[#allocation5 + $0x100] sm:$0xff]  ;;  %v1811_v26 = vld [vmem:[#allocation5 + $0x108] sm:$0xff] }
 0xe4c   : > { %1851 = vmatpush.msra.mxu2 %v1810_v25 }
 0xe4d   : > { %v1705_v28 = vmul.f32 0.70710677, %v1702_v27  ;;  %v1704_v60 = vmul.f32 0.5, %v1702_v27 }
 0xe4f   : > { %v1708_v29 = vand.u32 2147483647, %v1705_v28  ;;  %vm1706_vm10 = vcmp.ge.f32.partialorder %v1705_v28, 0.0 }
 0xe50   : > { %v1707_v58 = vsel %vm1706_vm10, 1.0, %v4653_v15 }
 0xe51   : > { %v1709_v30 = vmul.f32 0.3275911, %v1708_v29  ;;  %v1735_v43 = vsub.f32 0.0, %v1708_v29 }
 0xe53   : > { %v1710_v31 = vadd.f32 1.0, %v1709_v30  ;;  %v1736_v46 = vmul.f32 %v1735_v43, %v1708_v29 }
 0xe55   : > { %4202 = vrcp.f32 %v1710_v31  ;;  %v1722_v35 = vand.u32 2147483648, %v1710_v31  ;;  %v1720_v37 = vand.u32 2147483647, %v1710_v31  ;;  %vm1716_vm5 = vweird.f32 %v1710_v31 }
 0xe56   : > { %v1737_v49 = vmul.f32 1.442695, %v1736_v46 }
 0xe57   : > { %v1723_v40 = vor.u32 1.1754944e-38, %v1722_v35  ;;  %vm1721_vm9 = vcmp.eq.f32.partialorder %v1720_v37, 8.507059e+37 }
 0xe58   : > { %4204 = vpow2.f32 %v1737_v49 }
 0xe5b   : > { %v4203_v32 = vpop.eup %4202 }
 0xe5c   : > { %v1712_v33 = vmul.f32 %v4203_v32, %v1710_v31  ;;  %vm1717_vm4 = vweird.f32 %v4203_v32 }
 0xe5d   : > { %vm1718_vm8 = vmor %vm1716_vm5, %vm1717_vm4 }
 0xe5e   : > { %v1713_v34 = vsub.f32 1.0, %v1712_v33  ;;  %v4205_v55 = vpop.eup %4204 }
 0xe60   : > { %v1714_v36 = vmul.f32 %v4203_v32, %v1713_v34 }
 0xe62   : > { %v1715_v39 = vadd.f32 %v4203_v32, %v1714_v36  ;;  %v4135_v36 = vld [vmem:[#allocation14 + $0x1] ss:$0 sm:$0xff] }
 0xe64   : > { %v1719_v41 = vsel %vm1718_vm8, %v4203_v32, %v1715_v39  ;;  %v4136_v39 = vld [vmem:[#allocation16 + $0x1] ss:$0 sm:$0xff] }
 0xe65   : > { %v1724_v42 = vsel %vm1721_vm9, %v1723_v40, %v1719_v41 }
 0xe66   : > { %v1726_v44 = vmul.f32 1.0614054, %v1724_v42 }
 0xe68   : > { %v1727_v45 = vadd.f32 -1.4531521, %v1726_v44 }
 0xe6a   : > { %v1728_v47 = vmul.f32 %v1727_v45, %v1724_v42 }
 0xe6c   : > { %v1729_v48 = vadd.f32 1.4214138, %v1728_v47 }
 0xe6e   : > { %v1730_v50 = vmul.f32 %v1729_v48, %v1724_v42 }
 0xe70   : > { %v1731_v51 = vadd.f32 -0.28449672, %v1730_v50 }
 0xe72   : > { %v1732_v52 = vmul.f32 %v1731_v51, %v1724_v42 }
 0xe74   : > { %v1733_v53 = vadd.f32 0.2548296, %v1732_v52 }
 0xe76   : > { %v1734_v54 = vmul.f32 %v1733_v53, %v1724_v42  ;;  %v3875_v42 = vld [vmem:[%s5547_s2 + $0x4] sm:$0x3] }
 0xe77   : > { %v1829_v43 = vperm.slane %v3875_v42, 0  ;;  %v1830_v50 = vperm.slane %v3875_v42, 1 }
 0xe78   : > { %v1739_v56 = vmul.f32 %v4205_v55, %v1734_v54 }
 0xe7a   : > { %v1740_v57 = vsub.f32 1.0, %v1739_v56 }
 0xe7c   : > { %v1741_v59 = vmul.f32 %v1740_v57, %v1707_v58 }
 0xe7e   : > { %v1742_v62 = vadd.f32 1.0, %v1741_v59 }
 0xe80   : > { %v1743_v63 = vmul.f32 %v1742_v62, %v1704_v60 }
 0xe82   : > { %3874 = vmatmul.msk.f32.vlgmr.msra.gmra.mxu1 %vm783_vm2, %v1743_v63 }
 0xeff   : > { %v1771_v1 = vpop.f32.mrf.mxu1 }
 0xf00   : > { %v1772_v61 = vadd.f32 %v4134_v0, %v1771_v1 }
 0xf02   : > { %v1774_v2 = vadd.f32 %v1772_v61, %v1666_v24  ;;  %v1813_v24 = vld [vmem:[#allocation5 + $0x118] sm:$0xff] }
 0xf03   : > { %1870 = vmatpush.msrb.mxu1 %v1813_v24 }
 0xf04   : > { %v1779_v3 = vsel %vm613_vm0, %v1774_v2, 0.0 }
 0xf05   : > { %1780 = vadd.xlane.f32.xlu1 %v1779_v3  ;;  %1871 = vmatpush.msrb.mxu1 %v1811_v26 }
 0xf78   : > { %v1781_v4 = vpop.xlane.xlu1 %1780 }
 0xf79   : > { %v1782_v5 = vmul.f32 %v1781_v4, %v4988_v17 }
 0xf7b   : > { %v1783_v6 = vsub.f32 %v1774_v2, %v1782_v5 }
 0xf7d   : > { %v1784_v7 = vmul.f32 %v1783_v6, %v1783_v6 }
 0xf7f   : > { %v1785_v9 = vsel %vm613_vm0, %v1784_v7, 0.0 }
 0xf80   : > { %1786 = vadd.xlane.f32.xlu1 %v1785_v9 }
 0xff3   : > { %v1787_v27 = vpop.xlane.xlu1 %1786 }
 0xff4   : > { %v1788_v28 = vmul.f32 %v1787_v27, %v4988_v17 }
 0xff6   : > { %v1789_v29 = vadd.f32 1e-05, %v1788_v28 }
 0xff8   : > { %4206 = vrsqrt.f32 %v1789_v29  ;;  %vm1796_vm12 = vweird.f32 %v1789_v29 }
 0xffe   : > { %v4207_v30 = vpop.eup %4206 }
 0xfff   : > { %v1791_v31 = vmul.f32 %v4207_v30, %v1789_v29  ;;  %vm1797_vm11 = vweird.f32 %v4207_v30 }
0x1000   : > { %vm1798_vm13 = vmor %vm1796_vm12, %vm1797_vm11 }
0x1001   : > { %v1792_v32 = vmul.f32 %v4207_v30, %v1791_v31 }
0x1003   : > { %v1793_v33 = vmul.f32 0.5, %v1792_v32 }
0x1005   : > { %v1794_v34 = vsub.f32 1.5, %v1793_v33 }
0x1007   : > { %v1795_v35 = vmul.f32 %v4207_v30, %v1794_v34 }
0x1009   : > { %v1799_v37 = vsel %vm1798_vm13, %v4207_v30, %v1795_v35 }
0x100a   : > { %v1800_v38 = vmul.f32 %v1799_v37, %v1783_v6 }
0x100c   : > { %v1804_v40 = vmul.f32 %v4135_v36, %v1800_v38 }
0x100e   : > { %v5144_v41 = vadd.f32 %v4136_v39, %v1804_v40 }
0x1010   : > { %3876 = vmatmul.msk.f32.vlgmr.msra.gmra.mxu2 %vm613_vm0, %v5144_v41  ;;  %3877 = vmatmul.msk.f32.vlgmr.msrb.gmra.mxu1 %vm613_vm0, %v5144_v41 }
0x108d   : > { %v1873_v51 = vpop.f32.mrf.mxu1 }
0x108e   : > { %v1874_v52 = vadd.f32 %v1873_v51, %v1830_v50 }
0x1093   : > { %v1853_v44 = vpop.f32.mrf.mxu2 }
0x1094   : > { %v1854_v45 = vadd.f32 %v1853_v44, %v1829_v43 }
0x1096   : > { %1877 = vrot.lane.b32.xlu0 %v1854_v45, %s5606_s16  ;;  %1881 = vrot.lane.b32.xlu1 %v1854_v45, %s5607_s19 }
0x1097   : > { %1879 = vrot.lane.b32.xlu2 %v1854_v45, %s5608_s13 }
0x109f   : > { %1893 = vrot.lane.b32.xlu2 %v1854_v45, %s5609_s22 }
0x10f1   : > { %v1880_v46 = vpop.permute.xlu2 %1879 }
0x10f2   : > { %1945 = vrot.lane.b32.xlu0 %v1880_v46, %s5609_s22 }
0x10f9   : > { %v1894_v47 = vpop.permute.xlu2 %1893 }
0x10fa   : > { %3878 = vmatpush.xpose.msk.msrb.mxu3 %vm676_vm1, %v1894_v47 }
0x10fd   : > { %3879 = vmatmul.msk.f32.vlgmr.msrb.gmra.mxu3 %vm676_vm1, %v1854_v45 }
0x1108   : > { %v1878_v48 = vpop.permute.xlu0 %1877  ;;  %v1882_v49 = vpop.permute.xlu1 %1881 }
0x1109   : > { %1971 = vrot.lane.b32.xlu1 %v1882_v49, %s5609_s22  ;;  %1919 = vrot.lane.b32.xlu2 %v1878_v48, %s5609_s22 }
0x1163   : > { %v1920_v53 = vpop.permute.xlu2 %1919 }
0x1164   : > { %v1946_v54 = vpop.permute.xlu0 %1945  ;;  %3880 = vmatpush.xpose.msk.msra.mxu0 %vm676_vm1, %v1920_v53 }
0x1165   : > { %3882 = vmatpush.xpose.msk.msrb.mxu2 %vm676_vm1, %v1946_v54 }
0x1167   : > { %3881 = vmatmul.msk.f32.vlgmr.msra.gmra.mxu0 %vm676_vm1, %v1878_v48 }
0x1168   : > { %2115 = vmatpush.msrb.mxu0 %v1874_v52  ;;  %3883 = vmatmul.msk.f32.vlgmr.msrb.gmra.mxu2 %vm676_vm1, %v1880_v46 }
0x117b   : > { %v1972_v55 = vpop.permute.xlu1 %1971 }
0x117c   : > { %3884 = vmatpush.xpose.msk.msra.mxu3 %vm676_vm1, %v1972_v55 }
0x117f   : > { %3885 = vmatmul.msk.f32.vlgmr.msra.gmra.mxu3 %vm676_vm1, %v1882_v49 }
0x1180   : > { %v1916_v63 = vpop.f32.mrf.mxu3 }
0x1181   : > { %v1997_v0 = vmul.f32 0.25, %v1916_v63 }
0x1183   : > { %v2001_v1 = vsel %vm783_vm2, %v1997_v0, -inf }
0x11e4   : > { %v1942_v56 = vpop.f32.mrf.mxu0 }
0x11e5   : > { %v1998_v57 = vmul.f32 0.25, %v1942_v56 }
0x11e7   : > { %v2004_v58 = vsel %vm783_vm2, %v1998_v57, -inf }
0x11e8   : > { %2005 = vmax.xlane.f32.xlu2 %v2004_v58 }
0x11eb   : > { %v1968_v59 = vpop.f32.mrf.mxu2 }
0x11ec   : > { %v1999_v60 = vmul.f32 0.25, %v1968_v59 }
0x11ee   : > { %v2007_v62 = vsel %vm783_vm2, %v1999_v60, -inf }
0x11ef   : > { %2008 = vmax.xlane.f32.xlu0 %v2007_v62 }
0x11f7   : > { %2002 = vmax.xlane.f32.xlu0 %v2001_v1 }
0x1202   : > { %v1994_v61 = vpop.f32.mrf.mxu3 }
0x1203   : > { %v2000_v2 = vmul.f32 0.25, %v1994_v61 }
0x1205   : > { %v2010_v3 = vsel %vm783_vm2, %v2000_v2, -inf }
0x1206   : > { %2011 = vmax.xlane.f32.xlu1 %v2010_v3 }
0x125b   : > { %v2006_v4 = vpop.xlane.xlu2 %2005 }
0x125c   : > { %v2014_v5 = vsub.f32 %v1998_v57, %v2006_v4 }
0x125e   : > { %v2019_v6 = vmul.f32 1.442695, %v2014_v5 }
0x1260   : > { %4208 = vpow2.f32 %v2019_v6 }
0x1262   : > { %v2009_v7 = vpop.xlane.xlu0 %2008 }
0x1263   : > { %v2015_v9 = vsub.f32 %v1999_v60, %v2009_v7 }
0x1265   : > { %v2021_v10 = vmul.f32 1.442695, %v2015_v9 }
0x1266   : > { %v4209_v11 = vpop.eup %4208 }
0x1267   : > { %4210 = vpow2.f32 %v2021_v10  ;;  %v2028_v12 = vsel %vm783_vm2, %v4209_v11, 0.0 }
0x1268   : > { %2029 = vadd.xlane.f32.xlu0 %v2028_v12 }
0x126a   : > { %v2003_v8 = vpop.xlane.xlu0 %2002 }
0x126b   : > { %v2013_v22 = vsub.f32 %v1997_v0, %v2003_v8  ;;  %v3895_v8 = vld [vmem:[%s5548_s3 + $0xa8] sm:$0xff] }
0x126d   : > { %v4211_v13 = vpop.eup %4210  ;;  %v2017_v23 = vmul.f32 1.442695, %v2013_v22  ;;  %v3894_v22 = vld [vmem:[%s5548_s3 + $0xa0] sm:$0xff] }
0x126e   : > { %v2031_v14 = vsel %vm783_vm2, %v4211_v13, 0.0 }
0x126f   : > { %2032 = vadd.xlane.f32.xlu2 %v2031_v14 }
0x1279   : > { %v2012_v16 = vpop.xlane.xlu1 %2011 }
0x127a   : > { %v2016_v18 = vsub.f32 %v2000_v2, %v2012_v16 }
0x127c   : > { %v2023_v19 = vmul.f32 1.442695, %v2016_v18  ;;  %1884 = vrot.lane.b32.xlu0 %v1874_v52, %s5606_s16 }
0x127e   : > { %4212 = vpow2.f32 %v2023_v19 }
0x127f   : > { %4214 = vpow2.f32 %v2017_v23  ;;  %v3893_v23 = vld [vmem:[%s5548_s3 + $0x98] sm:$0xff] }
0x1284   : > { %v5175_v20 = vpop.eup %4212 }
0x1285   : > { %v2034_v21 = vsel %vm783_vm2, %v5175_v20, 0.0  ;;  %v5181_v24 = vpop.eup %4214 }
0x1286   : > { %2035 = vadd.xlane.f32.xlu1 %v2034_v21  ;;  %v2025_v25 = vsel %vm783_vm2, %v5181_v24, 0.0  ;;  %v3896_v21 = vld [vmem:[%s5548_s3 + $0xb0] sm:$0xff] }
0x1287   : > { %1887 = vrot.lane.b32.xlu2 %v1874_v52, %s5608_s13 }
0x129f   : > { %1890 = vrot.lane.b32.xlu1 %v1874_v52, %s5607_s19 }
0x12b0   : > { %2026 = vadd.xlane.f32.xlu2 %v2025_v25  ;;  %v3891_v25 = vld [vmem:[%s5548_s3 + $0x88] sm:$0xff] }
0x12db   : > { %v2030_v26 = vpop.xlane.xlu0 %2029 }
0x12dc   : > { %4216 = vrcp.f32 %v2030_v26  ;;  %v2063_v31 = vand.u32 2147483648, %v2030_v26  ;;  %v2061_v33 = vand.u32 2147483647, %v2030_v26  ;;  %vm2057_vm15 = vweird.f32 %v2030_v26 }
0x12de   : > { %v2064_v36 = vor.u32 1.1754944e-38, %v2063_v31  ;;  %vm2062_vm4 = vcmp.eq.f32.partialorder %v2061_v33, 8.507059e+37 }
0x12e2   : > { %v4217_v27 = vpop.eup %4216  ;;  %v2033_v28 = vpop.xlane.xlu2 %2032 }
0x12e3   : > { %v2053_v29 = vmul.f32 %v4217_v27, %v2030_v26  ;;  %4218 = vrcp.f32 %v2033_v28  ;;  %vm2058_vm14 = vweird.f32 %v4217_v27  ;;  %v2078_v43 = vand.u32 2147483648, %v2033_v28  ;;  %v3890_v26 = vld [vmem:[%s5548_s3 + $0x80] sm:$0xff] }
0x12e4   : > { %vm2059_vm3 = vmor %vm2057_vm15, %vm2058_vm14  ;;  %v2076_v46 = vand.u32 2147483647, %v2033_v28  ;;  %vm2072_vm8 = vweird.f32 %v2033_v28 }
0x12e5   : > { %v2054_v30 = vsub.f32 1.0, %v2053_v29  ;;  %v2079_v49 = vor.u32 1.1754944e-38, %v2078_v43 }
0x12e6   : > { %vm2077_vm10 = vcmp.eq.f32.partialorder %v2076_v46, 8.507059e+37  ;;  %v3904_v46 = vld [vmem:[%s5550_s5 + $0xa8] sm:$0xff] }
0x12e7   : > { %v2055_v32 = vmul.f32 %v4217_v27, %v2054_v30 }
0x12e9   : > { %v4219_v34 = vpop.eup %4218  ;;  %v2056_v35 = vadd.f32 %v4217_v27, %v2055_v32 }
0x12ea   : > { %v2068_v37 = vmul.f32 %v4219_v34, %v2033_v28  ;;  %v1888_v38 = vpop.permute.xlu2 %1887  ;;  %vm2073_vm5 = vweird.f32 %v4219_v34 }
0x12eb   : > { %v2060_v39 = vsel %vm2059_vm3, %v4217_v27, %v2056_v35  ;;  %2161 = vmatpush.msra.mxu2 %v1888_v38  ;;  %vm2074_vm9 = vmor %vm2072_vm8, %vm2073_vm5 }
0x12ec   : > { %v2065_v40 = vsel %vm2062_vm4, %v2064_v36, %v2060_v39  ;;  %v2069_v42 = vsub.f32 1.0, %v2068_v37 }
0x12ed   : > { %v2066_v44 = vmul.f32 %v4209_v11, %v2065_v40 }
0x12ee   : > { %v2070_v45 = vmul.f32 %v4219_v34, %v2069_v42  ;;  %v1885_v47 = vpop.permute.xlu0 %1884 }
0x12ef   : > { %2138 = vmatpush.msra.mxu1 %v1885_v47  ;;  %v3903_v47 = vld [vmem:[%s5550_s5 + $0xa0] sm:$0xff] }
0x12f0   : > { %v2071_v48 = vadd.f32 %v4219_v34, %v2070_v45  ;;  %3887 = vmatmul.msk.f32.vlgmr.msra.gmra.mxu1 %vm783_vm2, %v2066_v44  ;;  %v3906_v45 = vld [vmem:[%s5550_s5 + $0xb8] sm:$0xff] }
0x12f1   : > { %2301 = vmatpush.msrb.mxu1 %v3906_v45 }
0x12f2   : > { %v2075_v50 = vsel %vm2074_vm9, %v4219_v34, %v2071_v48  ;;  %v4137_v34 = vld [vmem:[#allocation7 + $0x2] ss:$0 sm:$0xff]  ;;  %v3902_v48 = vld [vmem:[%s5550_s5 + $0x98] sm:$0xff] }
0x12f3   : > { %v2080_v51 = vsel %vm2077_vm10, %v2079_v49, %v2075_v50  ;;  %v3901_v49 = vld [vmem:[%s5550_s5 + $0x90] sm:$0xff]  ;;  %v3900_v50 = vld [vmem:[%s5550_s5 + $0x88] sm:$0xff] }
0x12f4   : > { %v2081_v52 = vmul.f32 %v4211_v13, %v2080_v51  ;;  %v3899_v51 = vld [vmem:[%s5550_s5 + $0x80] sm:$0xff] }
0x12f6   : > { %3888 = vmatmul.msk.f32.vlgmr.msra.gmra.mxu2 %vm783_vm2, %v2081_v52 }
0x12f9   : > { %v2036_v53 = vpop.xlane.xlu1 %2035 }
0x12fa   : > { %4220 = vrcp.f32 %v2036_v53  ;;  %v2093_v59 = vand.u32 2147483648, %v2036_v53  ;;  %vm2087_vm12 = vweird.f32 %v2036_v53  ;;  %v2091_v60 = vand.u32 2147483647, %v2036_v53 }
0x12fc   : > { %v2094_v63 = vor.u32 1.1754944e-38, %v2093_v59  ;;  %vm2092_vm14 = vcmp.eq.f32.partialorder %v2091_v60, 8.507059e+37 }
0x1300   : > { %v4221_v54 = vpop.eup %4220 }
0x1301   : > { %v2083_v55 = vmul.f32 %v4221_v54, %v2036_v53  ;;  %vm2088_vm11 = vweird.f32 %v4221_v54 }
0x1302   : > { %vm2089_vm13 = vmor %vm2087_vm12, %vm2088_vm11 }
0x1303   : > { %v2084_v56 = vsub.f32 1.0, %v2083_v55 }
0x1305   : > { %v2085_v57 = vmul.f32 %v4221_v54, %v2084_v56 }
0x1307   : > { %v2086_v58 = vadd.f32 %v4221_v54, %v2085_v57 }
0x1309   : > { %v2090_v62 = vsel %vm2089_vm13, %v4221_v54, %v2086_v58 }
0x130a   : > { %v2095_v0 = vsel %vm2092_vm14, %v2094_v63, %v2090_v62  ;;  %v4138_v62 = vld [vmem:[#allocation11 + $0x2] ss:$0 sm:$0xff] }
0x130b   : > { %v2096_v61 = vmul.f32 %v5175_v20, %v2095_v0  ;;  %v3897_v20 = vld [vmem:[%s5548_s3 + $0xb8] sm:$0xff] }
0x130c   : > { %2229 = vmatpush.msra.mxu0 %v3897_v20 }
0x130e   : > { %2230 = vmatpush.msra.mxu0 %v3896_v21 }
0x1310   : > { %2231 = vmatpush.msra.mxu0 %v3895_v8 }
0x1311   : > { %v1891_v1 = vpop.permute.xlu1 %1890 }
0x1312   : > { %2184 = vmatpush.msrb.mxu3 %v1891_v1  ;;  %2232 = vmatpush.msra.mxu0 %v3894_v22  ;;  %v4139_v1 = vld [vmem:[#allocation13 + $0x2] ss:$0 sm:$0xff] }
0x1313   : > { %3889 = vmatmul.msk.f32.vlgmr.msrb.gmra.mxu3 %vm783_vm2, %v2096_v61 }
0x1314   : > { %2233 = vmatpush.msra.mxu0 %v3893_v23 }
0x1323   : > { %v2027_v2 = vpop.xlane.xlu2 %2026 }
0x1324   : > { %4222 = vrcp.f32 %v2027_v2  ;;  %v2048_v6 = vand.u32 2147483648, %v2027_v2  ;;  %v2046_v9 = vand.u32 2147483647, %v2027_v2  ;;  %vm2042_vm3 = vweird.f32 %v2027_v2 }
0x1326   : > { %v2049_v11 = vor.u32 1.1754944e-38, %v2048_v6  ;;  %vm2047_vm5 = vcmp.eq.f32.partialorder %v2046_v9, 8.507059e+37 }
0x132a   : > { %v4223_v3 = vpop.eup %4222 }
0x132b   : > { %v2038_v4 = vmul.f32 %v4223_v3, %v2027_v2  ;;  %vm2043_vm15 = vweird.f32 %v4223_v3 }
0x132c   : > { %vm2044_vm4 = vmor %vm2042_vm3, %vm2043_vm15 }
0x132d   : > { %v2039_v5 = vsub.f32 1.0, %v2038_v4 }
0x132f   : > { %v2040_v7 = vmul.f32 %v4223_v3, %v2039_v5 }
0x1331   : > { %v2041_v10 = vadd.f32 %v4223_v3, %v2040_v7 }
0x1333   : > { %v2045_v12 = vsel %vm2044_vm4, %v4223_v3, %v2041_v10  ;;  %v4140_v3 = vld [vmem:[#allocation8 + $0x2] ss:$0 sm:$0xff] }
0x1334   : > { %v2050_v13 = vsel %vm2047_vm5, %v2049_v11, %v2045_v12 }
0x1335   : > { %v2051_v14 = vmul.f32 %v5181_v24, %v2050_v13  ;;  %v3892_v24 = vld [vmem:[%s5548_s3 + $0x90] sm:$0xff] }
0x1336   : > { %2234 = vmatpush.msra.mxu0 %v3892_v24 }
0x1337   : > { %3886 = vmatmul.msk.f32.vlgmr.msrb.gmra.mxu0 %vm783_vm2, %v2051_v14 }
0x1338   : > { %2235 = vmatpush.msra.mxu0 %v3891_v25 }
0x133a   : > { %2236 = vmatpush.msra.mxu0 %v3890_v26 }
0x136d   : > { %v2140_v16 = vpop.f32.mrf.mxu1 }
0x136e   : > { %2190 = vrot.lane.b32.xlu0 %v2140_v16, %s5604_s17 }
0x1379   : > { %v2163_v18 = vpop.f32.mrf.mxu2 }
0x137a   : > { %2194 = vrot.lane.b32.xlu1 %v2163_v18, %s5603_s21 }
0x1396   : > { %v2186_v19 = vpop.f32.mrf.mxu3 }
0x1397   : > { %2198 = vrot.lane.b32.xlu0 %v2186_v19, %s5605_s24  ;;  %v3908_v19 = vld [vmem:[%s5602_s4 + $0x10] sm:$0xff] }
0x1398   : > { %2378 = vmatpush.msrb.mxu2 %v3908_v19 }
0x13b4   : > { %v2117_v29 = vpop.f32.mrf.mxu0 }
0x13e0   : > { %v2191_v27 = vpop.permute.xlu0 %2190 }
0x13e1   : > { %v2201_v30 = vsel %vm676_vm1, %v2117_v29, %v2191_v27 }
0x13ec   : > { %v2195_v28 = vpop.permute.xlu1 %2194 }
0x13ed   : > { %v2202_v31 = vsel %vm985_vm6, %v2201_v30, %v2195_v28 }
0x1409   : > { %v2199_v32 = vpop.permute.xlu0 %2198 }
0x140a   : > { %v2203_v33 = vsel %vm987_vm7, %v2202_v31, %v2199_v32 }
0x140b   : > { %3898 = vmatmul.msk.f32.vlgmr.msra.gmra.mxu0 %vm613_vm0, %v2203_v33 }
0x1488   : > { %v2238_v35 = vpop.f32.mrf.mxu0 }
0x1489   : > { %v2239_v36 = vadd.f32 %v4137_v34, %v2238_v35 }
0x148b   : > { %v2241_v37 = vadd.f32 %v2239_v36, %v5144_v41  ;;  %v3905_v41 = vld [vmem:[%s5550_s5 + $0xb0] sm:$0xff] }
0x148c   : > { %2302 = vmatpush.msrb.mxu1 %v3905_v41 }
0x148d   : > { %v2246_v38 = vsel %vm613_vm0, %v2241_v37, 0.0 }
0x148e   : > { %2247 = vadd.xlane.f32.xlu1 %v2246_v38  ;;  %2303 = vmatpush.msrb.mxu1 %v3904_v46 }
0x1490   : > { %2304 = vmatpush.msrb.mxu1 %v3903_v47 }
0x1492   : > { %2305 = vmatpush.msrb.mxu1 %v3902_v48 }
0x1494   : > { %2306 = vmatpush.msrb.mxu1 %v3901_v49 }
0x1496   : > { %2307 = vmatpush.msrb.mxu1 %v3900_v50 }
0x1498   : > { %2308 = vmatpush.msrb.mxu1 %v3899_v51 }
0x1501   : > { %v2248_v39 = vpop.xlane.xlu1 %2247 }
0x1502   : > { %v2249_v40 = vmul.f32 %v2248_v39, %v4988_v17 }
0x1504   : > { %v2250_v42 = vsub.f32 %v2241_v37, %v2249_v40 }
0x1506   : > { %v2251_v43 = vmul.f32 %v2250_v42, %v2250_v42 }
0x1508   : > { %v2252_v44 = vsel %vm613_vm0, %v2251_v43, 0.0 }
0x1509   : > { %2253 = vadd.xlane.f32.xlu0 %v2252_v44  ;;  %v4141_v44 = vld [vmem:[#allocation10 + $0x2] ss:$0 sm:$0xff] }
0x157c   : > { %v2254_v52 = vpop.xlane.xlu0 %2253 }
0x157d   : > { %v2255_v53 = vmul.f32 %v2254_v52, %v4988_v17 }
0x157f   : > { %v2256_v54 = vadd.f32 1e-05, %v2255_v53  ;;  %v2433_v53 = vld [vmem:[#allocation5 + $0x1f0] sm:$0xff] }
0x1580   : > { %2453 = vmatpush.msra.mxu3 %v2433_v53 }
0x1581   : > { %4224 = vrsqrt.f32 %v2256_v54  ;;  %vm2263_vm9 = vweird.f32 %v2256_v54 }
0x1587   : > { %v4225_v55 = vpop.eup %4224 }
0x1588   : > { %v2258_v56 = vmul.f32 %v4225_v55, %v2256_v54  ;;  %vm2264_vm8 = vweird.f32 %v4225_v55  ;;  %v2434_v54 = vld [vmem:[#allocation5 + $0x1f8] sm:$0xff] }
0x1589   : > { %vm2265_vm10 = vmor %vm2263_vm9, %vm2264_vm8  ;;  %2473 = vmatpush.msra.mxu2 %v2434_v54 }
0x158a   : > { %v2259_v57 = vmul.f32 %v4225_v55, %v2258_v56  ;;  %v2432_v56 = vld [vmem:[#allocation5 + $0x1e8] sm:$0xff] }
0x158b   : > { %2474 = vmatpush.msra.mxu2 %v2432_v56 }
0x158c   : > { %v2260_v58 = vmul.f32 0.5, %v2259_v57  ;;  %v2429_v57 = vld [vmem:[#allocation5 + $0x1d0] sm:$0xff] }
0x158e   : > { %v2261_v59 = vsub.f32 1.5, %v2260_v58  ;;  %v2430_v58 = vld [vmem:[#allocation5 + $0x1d8] sm:$0xff] }
0x158f   : > { %2475 = vmatpush.msra.mxu2 %v2430_v58 }
0x1590   : > { %v2262_v60 = vmul.f32 %v4225_v55, %v2261_v59  ;;  %v2427_v59 = vld [vmem:[#allocation5 + $0x1c0] sm:$0xff] }
0x1592   : > { %v2266_v63 = vsel %vm2265_vm10, %v4225_v55, %v2262_v60  ;;  %v2431_v55 = vld [vmem:[#allocation5 + $0x1e0] sm:$0xff]  ;;  %v2428_v60 = vld [vmem:[#allocation5 + $0x1c8] sm:$0xff] }
0x1593   : > { %v2267_v0 = vmul.f32 %v2266_v63, %v2250_v42  ;;  %2454 = vmatpush.msra.mxu3 %v2431_v55  ;;  %2476 = vmatpush.msra.mxu2 %v2428_v60  ;;  %v2426_v63 = vld [vmem:[#allocation5 + $0x1b8] sm:$0xff] }
0x1595   : > { %v2271_v61 = vmul.f32 %v4138_v62, %v2267_v0  ;;  %2455 = vmatpush.msra.mxu3 %v2429_v57  ;;  %v2425_v62 = vld [vmem:[#allocation5 + $0x1b0] sm:$0xff]  ;;  %2477 = vmatpush.msra.mxu2 %v2426_v63  ;;  %v2423_v0 = vld [vmem:[#allocation5 + $0x1a0] sm:$0xff] }
0x1597   : > { %v2275_v2 = vadd.f32 %v4139_v1, %v2271_v61  ;;  %2456 = vmatpush.msra.mxu3 %v2427_v59  ;;  %v2424_v1 = vld [vmem:[#allocation5 + $0x1a8] sm:$0xff]  ;;  %v2421_v61 = vld [vmem:[#allocation5 + $0x190] sm:$0xff] }
0x1598   : > { %2478 = vmatpush.msra.mxu2 %v2424_v1 }
0x1599   : > { %3907 = vmatmul.msk.f32.vlgmr.msrb.gmra.mxu1 %vm613_vm0, %v2275_v2  ;;  %2457 = vmatpush.msra.mxu3 %v2425_v62 }
0x159b   : > { %2458 = vmatpush.msra.mxu3 %v2423_v0 }
0x159d   : > { %2459 = vmatpush.msra.mxu3 %v2421_v61 }
0x1616   : > { %v2310_v4 = vpop.f32.mrf.mxu1 }
0x1617   : > { %v2311_v5 = vadd.f32 %v4140_v3, %v2310_v4  ;;  %v2419_v3 = vld [vmem:[#allocation5 + $0x180] sm:$0xff]  ;;  %v2420_v4 = vld [vmem:[#allocation5 + $0x188] sm:$0xff] }
0x1618   : > { %2460 = vmatpush.msra.mxu3 %v2419_v3 }
0x1619   : > { %v2314_v6 = vmul.f32 0.70710677, %v2311_v5  ;;  %v2313_v40 = vmul.f32 0.5, %v2311_v5 }
0x161b   : > { %v2317_v7 = vand.u32 2147483647, %v2314_v6  ;;  %vm2315_vm15 = vcmp.ge.f32.partialorder %v2314_v6, 0.0 }
0x161c   : > { %v2316_v38 = vsel %vm2315_vm15, 1.0, %v4653_v15 }
0x161d   : > { %v2318_v9 = vmul.f32 0.3275911, %v2317_v7  ;;  %v2344_v23 = vsub.f32 0.0, %v2317_v7 }
0x161f   : > { %v2319_v10 = vadd.f32 1.0, %v2318_v9  ;;  %v2345_v26 = vmul.f32 %v2344_v23, %v2317_v7 }
0x1621   : > { %4226 = vrcp.f32 %v2319_v10  ;;  %v2331_v14 = vand.u32 2147483648, %v2319_v10  ;;  %v2329_v18 = vand.u32 2147483647, %v2319_v10  ;;  %vm2325_vm12 = vweird.f32 %v2319_v10 }
0x1622   : > { %v2346_v29 = vmul.f32 1.442695, %v2345_v26 }
0x1623   : > { %v2332_v21 = vor.u32 1.1754944e-38, %v2331_v14  ;;  %vm2330_vm14 = vcmp.eq.f32.partialorder %v2329_v18, 8.507059e+37 }
0x1624   : > { %4228 = vpow2.f32 %v2346_v29 }
0x1627   : > { %v4227_v11 = vpop.eup %4226 }
0x1628   : > { %v2321_v12 = vmul.f32 %v4227_v11, %v2319_v10  ;;  %vm2326_vm11 = vweird.f32 %v4227_v11 }
0x1629   : > { %vm2327_vm13 = vmor %vm2325_vm12, %vm2326_vm11 }
0x162a   : > { %v2322_v13 = vsub.f32 1.0, %v2321_v12  ;;  %v4229_v35 = vpop.eup %4228 }
0x162c   : > { %v2323_v16 = vmul.f32 %v4227_v11, %v2322_v13 }
0x162e   : > { %v2324_v20 = vadd.f32 %v4227_v11, %v2323_v16  ;;  %v4142_v16 = vld [vmem:[#allocation14 + $0x2] ss:$0 sm:$0xff] }
0x1630   : > { %v2328_v8 = vsel %vm2327_vm13, %v4227_v11, %v2324_v20  ;;  %v4143_v20 = vld [vmem:[#allocation16 + $0x2] ss:$0 sm:$0xff] }
0x1631   : > { %v2333_v22 = vsel %vm2330_vm14, %v2332_v21, %v2328_v8 }
0x1632   : > { %v2335_v24 = vmul.f32 1.0614054, %v2333_v22 }
0x1634   : > { %v2336_v25 = vadd.f32 -1.4531521, %v2335_v24 }
0x1636   : > { %v2337_v27 = vmul.f32 %v2336_v25, %v2333_v22 }
0x1638   : > { %v2338_v28 = vadd.f32 1.4214138, %v2337_v27 }
0x163a   : > { %v2339_v30 = vmul.f32 %v2338_v28, %v2333_v22 }
0x163c   : > { %v2340_v31 = vadd.f32 -0.28449672, %v2339_v30 }
0x163e   : > { %v2341_v32 = vmul.f32 %v2340_v31, %v2333_v22 }
0x1640   : > { %v2342_v33 = vadd.f32 0.2548296, %v2341_v32 }
0x1642   : > { %v2343_v34 = vmul.f32 %v2342_v33, %v2333_v22  ;;  %v3910_v22 = vld [vmem:[%s5547_s2 + $0x6] sm:$0x3] }
0x1643   : > { %v2438_v23 = vperm.slane %v3910_v22, 0  ;;  %v2439_v30 = vperm.slane %v3910_v22, 1 }
0x1644   : > { %v2348_v36 = vmul.f32 %v4229_v35, %v2343_v34 }
0x1646   : > { %v2349_v37 = vsub.f32 1.0, %v2348_v36 }
0x1648   : > { %v2350_v39 = vmul.f32 %v2349_v37, %v2316_v38 }
0x164a   : > { %v2351_v42 = vadd.f32 1.0, %v2350_v39 }
0x164c   : > { %v2352_v43 = vmul.f32 %v2351_v42, %v2313_v40 }
0x164e   : > { %3909 = vmatmul.msk.f32.vlgmr.msrb.gmra.mxu2 %vm783_vm2, %v2352_v43 }
0x16d1   : > { %v2380_v45 = vpop.f32.mrf.mxu2 }
0x16d2   : > { %v2381_v41 = vadd.f32 %v4141_v44, %v2380_v45 }
0x16d4   : > { %v2383_v46 = vadd.f32 %v2381_v41, %v2275_v2  ;;  %v2422_v2 = vld [vmem:[#allocation5 + $0x198] sm:$0xff] }
0x16d5   : > { %2479 = vmatpush.msra.mxu2 %v2422_v2 }
0x16d6   : > { %v2388_v47 = vsel %vm613_vm0, %v2383_v46, 0.0 }
0x16d7   : > { %2389 = vadd.xlane.f32.xlu2 %v2388_v47  ;;  %2480 = vmatpush.msra.mxu2 %v2420_v4 }
0x174a   : > { %v2390_v48 = vpop.xlane.xlu2 %2389 }
0x174b   : > { %v2391_v49 = vmul.f32 %v2390_v48, %v4988_v17 }
0x174d   : > { %v2392_v50 = vsub.f32 %v2383_v46, %v2391_v49 }
0x174f   : > { %v2393_v51 = vmul.f32 %v2392_v50, %v2392_v50 }
0x1751   : > { %v2394_v52 = vsel %vm613_vm0, %v2393_v51, 0.0 }
0x1752   : > { %2395 = vadd.xlane.f32.xlu2 %v2394_v52 }
0x17c5   : > { %v2396_v5 = vpop.xlane.xlu2 %2395 }
0x17c6   : > { %v2397_v6 = vmul.f32 %v2396_v5, %v4988_v17 }
0x17c8   : > { %v2398_v7 = vadd.f32 1e-05, %v2397_v6 }
0x17ca   : > { %4230 = vrsqrt.f32 %v2398_v7  ;;  %vm2405_vm4 = vweird.f32 %v2398_v7 }
0x17d0   : > { %v4231_v9 = vpop.eup %4230 }
0x17d1   : > { %v2400_v10 = vmul.f32 %v4231_v9, %v2398_v7  ;;  %vm2406_vm3 = vweird.f32 %v4231_v9 }
0x17d2   : > { %vm2407_vm5 = vmor %vm2405_vm4, %vm2406_vm3 }
0x17d3   : > { %v2401_v11 = vmul.f32 %v4231_v9, %v2400_v10 }
0x17d5   : > { %v2402_v12 = vmul.f32 0.5, %v2401_v11 }
0x17d7   : > { %v2403_v13 = vsub.f32 1.5, %v2402_v12 }
0x17d9   : > { %v2404_v14 = vmul.f32 %v4231_v9, %v2403_v13 }
0x17db   : > { %v2408_v18 = vsel %vm2407_vm5, %v4231_v9, %v2404_v14 }
0x17dc   : > { %v2409_v19 = vmul.f32 %v2408_v18, %v2392_v50 }
0x17de   : > { %v2413_v21 = vmul.f32 %v4142_v16, %v2409_v19 }
0x17e0   : > { %v5261_v8 = vadd.f32 %v4143_v20, %v2413_v21 }
0x17e2   : > { %3911 = vmatmul.msk.f32.vlgmr.msra.gmra.mxu3 %vm613_vm0, %v5261_v8  ;;  %3912 = vmatmul.msk.f32.vlgmr.msra.gmra.mxu2 %vm613_vm0, %v5261_v8 }
0x1865   : > { %v2462_v24 = vpop.f32.mrf.mxu3  ;;  %v2482_v31 = vpop.f32.mrf.mxu2 }
0x1866   : > { %v2463_v25 = vadd.f32 %v2462_v24, %v2438_v23  ;;  %v2483_v32 = vadd.f32 %v2482_v31, %v2439_v30 }
0x1868   : > { %2490 = vrot.lane.b32.xlu0 %v2463_v25, %s5607_s19  ;;  %2486 = vrot.lane.b32.xlu2 %v2463_v25, %s5606_s16 }
0x1869   : > { %2488 = vrot.lane.b32.xlu1 %v2463_v25, %s5608_s13 }
0x1870   : > { %2502 = vrot.lane.b32.xlu0 %v2463_v25, %s5609_s22 }
0x18c2   : > { %v2487_v26 = vpop.permute.xlu2 %2486 }
0x18c3   : > { %2528 = vrot.lane.b32.xlu2 %v2487_v26, %s5609_s22 }
0x18da   : > { %v2491_v27 = vpop.permute.xlu0 %2490 }
0x18db   : > { %v2489_v28 = vpop.permute.xlu1 %2488 }
0x18dc   : > { %2554 = vrot.lane.b32.xlu1 %v2489_v28, %s5609_s22 }
0x18e2   : > { %v2503_v29 = vpop.permute.xlu0 %2502 }
0x18e3   : > { %3913 = vmatpush.xpose.msk.msrb.mxu0 %vm676_vm1, %v2503_v29 }
0x18e4   : > { %2580 = vrot.lane.b32.xlu1 %v2491_v27, %s5609_s22 }
0x18e6   : > { %3914 = vmatmul.msk.f32.vlgmr.msrb.gmra.mxu0 %vm676_vm1, %v2463_v25 }
0x191d   : > { %v2529_v33 = vpop.permute.xlu2 %2528 }
0x191e   : > { %3915 = vmatpush.xpose.msk.msra.mxu1 %vm676_vm1, %v2529_v33 }
0x1921   : > { %3916 = vmatmul.msk.f32.vlgmr.msra.gmra.mxu1 %vm676_vm1, %v2487_v26 }
0x1922   : > { %2724 = vmatpush.msrb.mxu1 %v2483_v32 }
0x194e   : > { %v2555_v34 = vpop.permute.xlu1 %2554 }
0x194f   : > { %3917 = vmatpush.xpose.msk.msrb.mxu3 %vm676_vm1, %v2555_v34 }
0x1952   : > { %3918 = vmatmul.msk.f32.vlgmr.msrb.gmra.mxu3 %vm676_vm1, %v2489_v28 }
0x1956   : > { %v2581_v35 = vpop.permute.xlu1 %2580 }
0x1957   : > { %3919 = vmatpush.xpose.msk.msra.mxu0 %vm676_vm1, %v2581_v35 }
0x195a   : > { %3920 = vmatmul.msk.f32.vlgmr.msra.gmra.mxu0 %vm676_vm1, %v2491_v27 }
0x1963   : > { %v2525_v39 = vpop.f32.mrf.mxu0 }
0x1964   : > { %v2606_v40 = vmul.f32 0.25, %v2525_v39 }
0x1966   : > { %v2610_v42 = vsel %vm783_vm2, %v2606_v40, -inf }
0x199e   : > { %v2551_v36 = vpop.f32.mrf.mxu1 }
0x199f   : > { %v2607_v37 = vmul.f32 0.25, %v2551_v36 }
0x19a1   : > { %v2613_v38 = vsel %vm783_vm2, %v2607_v37, -inf }
0x19a2   : > { %2614 = vmax.xlane.f32.xlu0 %v2613_v38 }
0x19aa   : > { %2611 = vmax.xlane.f32.xlu0 %v2610_v42 }
0x19d5   : > { %v2577_v43 = vpop.f32.mrf.mxu3 }
0x19d6   : > { %v2608_v44 = vmul.f32 0.25, %v2577_v43 }
0x19d7   : > { %v2603_v45 = vpop.f32.mrf.mxu0 }
0x19d8   : > { %v2609_v41 = vmul.f32 0.25, %v2603_v45  ;;  %v2616_v46 = vsel %vm783_vm2, %v2608_v44, -inf }
0x19d9   : > { %2617 = vmax.xlane.f32.xlu2 %v2616_v46 }
0x19da   : > { %v2619_v47 = vsel %vm783_vm2, %v2609_v41, -inf }
0x19db   : > { %2620 = vmax.xlane.f32.xlu1 %v2619_v47 }
0x1a15   : > { %v2615_v48 = vpop.xlane.xlu0 %2614 }
0x1a16   : > { %v2623_v49 = vsub.f32 %v2607_v37, %v2615_v48 }
0x1a18   : > { %v2628_v50 = vmul.f32 1.442695, %v2623_v49 }
0x1a1a   : > { %4232 = vpow2.f32 %v2628_v50 }
0x1a1d   : > { %v2612_v55 = vpop.xlane.xlu0 %2611 }
0x1a1e   : > { %v2622_v59 = vsub.f32 %v2606_v40, %v2612_v55 }
0x1a20   : > { %v4233_v51 = vpop.eup %4232  ;;  %v2626_v62 = vmul.f32 1.442695, %v2622_v59 }
0x1a21   : > { %v2637_v52 = vsel %vm783_vm2, %v4233_v51, 0.0 }
0x1a22   : > { %2638 = vadd.xlane.f32.xlu2 %v2637_v52 }
0x1a3a   : > { %2493 = vrot.lane.b32.xlu2 %v2483_v32, %s5606_s16 }
0x1a4c   : > { %v2618_v53 = vpop.xlane.xlu2 %2617 }
0x1a4d   : > { %v2624_v54 = vsub.f32 %v2608_v44, %v2618_v53 }
0x1a4e   : > { %v2621_v56 = vpop.xlane.xlu1 %2620 }
0x1a4f   : > { %v2630_v57 = vmul.f32 1.442695, %v2624_v54  ;;  %v2625_v58 = vsub.f32 %v2609_v41, %v2621_v56 }
0x1a51   : > { %4234 = vpow2.f32 %v2630_v57  ;;  %v2632_v60 = vmul.f32 1.442695, %v2625_v58 }
0x1a53   : > { %4236 = vpow2.f32 %v2632_v60 }
0x1a54   : > { %4238 = vpow2.f32 %v2626_v62 }
0x1a57   : > { %v5291_v63 = vpop.eup %4234 }
0x1a58   : > { %v2640_v0 = vsel %vm783_vm2, %v5291_v63, 0.0 }
0x1a59   : > { %v5295_v1 = vpop.eup %4236  ;;  %2641 = vadd.xlane.f32.xlu1 %v2640_v0  ;;  %v3931_v0 = vld [vmem:[%s5548_s3 + $0xf0] sm:$0xff] }
0x1a5a   : > { %v2643_v61 = vsel %vm783_vm2, %v5295_v1, 0.0  ;;  %v5299_v2 = vpop.eup %4238 }
0x1a5b   : > { %2644 = vadd.xlane.f32.xlu0 %v2643_v61  ;;  %v2634_v3 = vsel %vm783_vm2, %v5299_v2, 0.0  ;;  %v3929_v61 = vld [vmem:[%s5548_s3 + $0xe0] sm:$0xff] }
0x1a63   : > { %2635 = vadd.xlane.f32.xlu2 %v2634_v3  ;;  %v3927_v3 = vld [vmem:[%s5548_s3 + $0xd0] sm:$0xff] }
0x1a6f   : > { %2499 = vrot.lane.b32.xlu0 %v2483_v32, %s5607_s19 }
0x1a72   : > { %2496 = vrot.lane.b32.xlu1 %v2483_v32, %s5608_s13 }
0x1a95   : > { %v2639_v4 = vpop.xlane.xlu2 %2638 }
0x1a96   : > { %4240 = vrcp.f32 %v2639_v4  ;;  %v2672_v10 = vand.u32 2147483648, %v2639_v4  ;;  %v2670_v12 = vand.u32 2147483647, %v2639_v4  ;;  %vm2666_vm9 = vweird.f32 %v2639_v4 }
0x1a98   : > { %v2673_v14 = vor.u32 1.1754944e-38, %v2672_v10  ;;  %vm2671_vm11 = vcmp.eq.f32.partialorder %v2670_v12, 8.507059e+37 }
0x1a9c   : > { %v4241_v5 = vpop.eup %4240 }
0x1a9d   : > { %v2662_v6 = vmul.f32 %v4241_v5, %v2639_v4  ;;  %v2494_v7 = vpop.permute.xlu2 %2493  ;;  %vm2667_vm8 = vweird.f32 %v4241_v5  ;;  %v3926_v4 = vld [vmem:[%s5548_s3 + $0xc8] sm:$0xff] }
0x1a9e   : > { %2747 = vmatpush.msrb.mxu2 %v2494_v7  ;;  %vm2668_vm10 = vmor %vm2666_vm9, %vm2667_vm8 }
0x1a9f   : > { %v2663_v9 = vsub.f32 1.0, %v2662_v6 }
0x1aa1   : > { %v2664_v11 = vmul.f32 %v4241_v5, %v2663_v9 }
0x1aa3   : > { %v2665_v13 = vadd.f32 %v4241_v5, %v2664_v11 }
0x1aa5   : > { %v2669_v16 = vsel %vm2668_vm10, %v4241_v5, %v2665_v13  ;;  %v3925_v5 = vld [vmem:[%s5548_s3 + $0xc0] sm:$0xff] }
0x1aa6   : > { %v2674_v18 = vsel %vm2671_vm11, %v2673_v14, %v2669_v16  ;;  %v4144_v14 = vld [vmem:[#allocation7 + $0x3] ss:$0 sm:$0xff] }
0x1aa7   : > { %v2675_v19 = vmul.f32 %v4233_v51, %v2674_v18 }
0x1aa9   : > { %3922 = vmatmul.msk.f32.vlgmr.msrb.gmra.mxu2 %vm783_vm2, %v2675_v19 }
0x1acc   : > { %v2642_v20 = vpop.xlane.xlu1 %2641 }
0x1acd   : > { %4242 = vrcp.f32 %v2642_v20  ;;  %vm2681_vm14 = vweird.f32 %v2642_v20  ;;  %v2687_v34 = vand.u32 2147483648, %v2642_v20  ;;  %v2685_v36 = vand.u32 2147483647, %v2642_v20 }
0x1ace   : > { %v2645_v21 = vpop.xlane.xlu0 %2644 }
0x1acf   : > { %4244 = vrcp.f32 %v2645_v21  ;;  %v2702_v30 = vand.u32 2147483648, %v2645_v21  ;;  %v2700_v33 = vand.u32 2147483647, %v2645_v21  ;;  %vm2696_vm3 = vweird.f32 %v2645_v21 }
0x1ad0   : > { %v2688_v44 = vor.u32 1.1754944e-38, %v2687_v34  ;;  %vm2686_vm8 = vcmp.eq.f32.partialorder %v2685_v36, 8.507059e+37 }
0x1ad1   : > { %v2703_v39 = vor.u32 1.1754944e-38, %v2702_v30  ;;  %vm2701_vm5 = vcmp.eq.f32.partialorder %v2700_v33, 8.507059e+37  ;;  %v3936_v30 = vld [vmem:[%s5550_s5 + $0xd0] sm:$0xff] }
0x1ad3   : > { %v4243_v22 = vpop.eup %4242 }
0x1ad4   : > { %v2677_v23 = vmul.f32 %v4243_v22, %v2642_v20  ;;  %vm2682_vm12 = vweird.f32 %v4243_v22 }
0x1ad5   : > { %v4245_v24 = vpop.eup %4244  ;;  %vm5306_vm15 = vmor %vm2681_vm14, %vm2682_vm12 }
0x1ad6   : > { %v2678_v25 = vsub.f32 1.0, %v2677_v23  ;;  %v2692_v26 = vmul.f32 %v4245_v24, %v2645_v21  ;;  %v2636_v27 = vpop.xlane.xlu2 %2635  ;;  %vm2697_vm13 = vweird.f32 %v4245_v24 }
0x1ad7   : > { %4246 = vrcp.f32 %v2636_v27  ;;  %vm2698_vm4 = vmor %vm2696_vm3, %vm2697_vm13  ;;  %v2657_v48 = vand.u32 2147483648, %v2636_v27  ;;  %v2655_v51 = vand.u32 2147483647, %v2636_v27  ;;  %vm2651_vm10 = vweird.f32 %v2636_v27 }
0x1ad8   : > { %v2679_v28 = vmul.f32 %v4243_v22, %v2678_v25  ;;  %v2693_v29 = vsub.f32 1.0, %v2692_v26  ;;  %v3941_v26 = vld [vmem:[%s5550_s5 + $0xf8] sm:$0xff] }
0x1ad9   : > { %v2658_v55 = vor.u32 1.1754944e-38, %v2657_v48  ;;  %vm2656_vm12 = vcmp.eq.f32.partialorder %v2655_v51, 8.507059e+37  ;;  %2910 = vmatpush.msra.mxu2 %v3941_v26  ;;  %v4147_v48 = vld [vmem:[#allocation8 + $0x3] ss:$0 sm:$0xff] }
0x1ada   : > { %v2680_v31 = vadd.f32 %v4243_v22, %v2679_v28  ;;  %v2694_v32 = vmul.f32 %v4245_v24, %v2693_v29  ;;  %v3938_v28 = vld [vmem:[%s5550_s5 + $0xe0] sm:$0xff]  ;;  %v3937_v29 = vld [vmem:[%s5550_s5 + $0xd8] sm:$0xff] }
0x1adc   : > { %v2695_v37 = vadd.f32 %v4245_v24, %v2694_v32  ;;  %v2684_v40 = vsel %vm5306_vm15, %v4243_v22, %v2680_v31  ;;  %v3935_v31 = vld [vmem:[%s5550_s5 + $0xc8] sm:$0xff]  ;;  %v3934_v32 = vld [vmem:[%s5550_s5 + $0xc0] sm:$0xff] }
0x1add   : > { %v4247_v38 = vpop.eup %4246  ;;  %v2689_v47 = vsel %vm2686_vm8, %v2688_v44, %v2684_v40 }
0x1ade   : > { %v2699_v42 = vsel %vm2698_vm4, %v4245_v24, %v2695_v37  ;;  %v2647_v43 = vmul.f32 %v4247_v38, %v2636_v27  ;;  %vm2652_vm9 = vweird.f32 %v4247_v38  ;;  %v2690_v54 = vmul.f32 %v5291_v63, %v2689_v47  ;;  %v3932_v63 = vld [vmem:[%s5548_s3 + $0xf8] sm:$0xff]  ;;  %v3939_v27 = vld [vmem:[%s5550_s5 + $0xe8] sm:$0xff] }
0x1adf   : > { %v2704_v45 = vsel %vm2701_vm5, %v2703_v39, %v2699_v42  ;;  %vm2653_vm11 = vmor %vm2651_vm10, %vm2652_vm9  ;;  %2838 = vmatpush.msra.mxu1 %v3932_v63 }
0x1ae0   : > { %v2648_v41 = vsub.f32 1.0, %v2647_v43  ;;  %v2705_v46 = vmul.f32 %v5295_v1, %v2704_v45  ;;  %v3930_v1 = vld [vmem:[%s5548_s3 + $0xe8] sm:$0xff]  ;;  %v4145_v43 = vld [vmem:[#allocation11 + $0x3] ss:$0 sm:$0xff] }
0x1ae1   : > { %v2500_v49 = vpop.permute.xlu0 %2499  ;;  %2839 = vmatpush.msra.mxu1 %v3931_v0 }
0x1ae2   : > { %v2649_v50 = vmul.f32 %v4247_v38, %v2648_v41  ;;  %2793 = vmatpush.msrb.mxu0 %v2500_v49  ;;  %v4146_v41 = vld [vmem:[#allocation13 + $0x3] ss:$0 sm:$0xff] }
0x1ae3   : > { %3924 = vmatmul.msk.f32.vlgmr.msrb.gmra.mxu0 %vm783_vm2, %v2705_v46  ;;  %2840 = vmatpush.msra.mxu1 %v3930_v1 }
0x1ae4   : > { %v2650_v52 = vadd.f32 %v4247_v38, %v2649_v50  ;;  %v2497_v53 = vpop.permute.xlu1 %2496 }
0x1ae5   : > { %2770 = vmatpush.msra.mxu3 %v2497_v53  ;;  %2841 = vmatpush.msra.mxu1 %v3929_v61 }
0x1ae6   : > { %v2654_v56 = vsel %vm2653_vm11, %v4247_v38, %v2650_v52  ;;  %3923 = vmatmul.msk.f32.vlgmr.msra.gmra.mxu3 %vm783_vm2, %v2690_v54 }
0x1ae7   : > { %v2659_v57 = vsel %vm2656_vm12, %v2658_v55, %v2654_v56 }
0x1ae8   : > { %v2660_v58 = vmul.f32 %v5299_v2, %v2659_v57  ;;  %v3928_v2 = vld [vmem:[%s5548_s3 + $0xd8] sm:$0xff] }
0x1ae9   : > { %2842 = vmatpush.msra.mxu1 %v3928_v2 }
0x1aea   : > { %3921 = vmatmul.msk.f32.vlgmr.msrb.gmra.mxu1 %vm783_vm2, %v2660_v58 }
0x1aeb   : > { %2843 = vmatpush.msra.mxu1 %v3927_v3 }
0x1aed   : > { %2844 = vmatpush.msra.mxu1 %v3926_v4 }
0x1aef   : > { %2845 = vmatpush.msra.mxu1 %v3925_v5 }
0x1b2c   : > { %v2749_v59 = vpop.f32.mrf.mxu2 }
0x1b2d   : > { %2799 = vrot.lane.b32.xlu0 %v2749_v59, %s5604_s17 }
0x1b60   : > { %v2795_v60 = vpop.f32.mrf.mxu0 }
0x1b61   : > { %2807 = vrot.lane.b32.xlu0 %v2795_v60, %s5605_s24 }
0x1b67   : > { %v2726_v7 = vpop.f32.mrf.mxu1 }
0x1b69   : > { %v2772_v62 = vpop.f32.mrf.mxu3 }
0x1b6a   : > { %2803 = vrot.lane.b32.xlu1 %v2772_v62, %s5603_s21  ;;  %v3943_v62 = vld [vmem:[%s5602_s4 + $0x18] sm:$0xff] }
0x1b6b   : > { %2987 = vmatpush.msrb.mxu3 %v3943_v62 }
0x1b9f   : > { %v2800_v6 = vpop.permute.xlu0 %2799 }
0x1ba0   : > { %v2810_v9 = vsel %vm676_vm1, %v2726_v7, %v2800_v6 }
0x1bd3   : > { %v2808_v11 = vpop.permute.xlu0 %2807 }
0x1bdc   : > { %v2804_v10 = vpop.permute.xlu1 %2803 }
0x1bdd   : > { %v2811_v12 = vsel %vm985_vm6, %v2810_v9, %v2804_v10 }
0x1bde   : > { %v2812_v13 = vsel %vm987_vm7, %v2811_v12, %v2808_v11 }
0x1bdf   : > { %3933 = vmatmul.msk.f32.vlgmr.msra.gmra.mxu1 %vm613_vm0, %v2812_v13 }
0x1c5c   : > { %v2847_v16 = vpop.f32.mrf.mxu1 }
0x1c5d   : > { %v2848_v18 = vadd.f32 %v4144_v14, %v2847_v16 }
0x1c5f   : > { %v2850_v19 = vadd.f32 %v2848_v18, %v5261_v8  ;;  %v3940_v8 = vld [vmem:[%s5550_s5 + $0xf0] sm:$0xff] }
0x1c60   : > { %2911 = vmatpush.msra.mxu2 %v3940_v8 }
0x1c61   : > { %v2855_v20 = vsel %vm613_vm0, %v2850_v19, 0.0 }
0x1c62   : > { %2856 = vadd.xlane.f32.xlu1 %v2855_v20  ;;  %2912 = vmatpush.msra.mxu2 %v3939_v27 }
0x1c64   : > { %2913 = vmatpush.msra.mxu2 %v3938_v28 }
0x1c66   : > { %2914 = vmatpush.msra.mxu2 %v3937_v29 }
0x1c68   : > { %2915 = vmatpush.msra.mxu2 %v3936_v30 }
0x1c6a   : > { %2916 = vmatpush.msra.mxu2 %v3935_v31 }
0x1c6c   : > { %2917 = vmatpush.msra.mxu2 %v3934_v32 }
0x1cd5   : > { %v2857_v21 = vpop.xlane.xlu1 %2856 }
0x1cd6   : > { %v2858_v22 = vmul.f32 %v2857_v21, %v4988_v17 }
0x1cd8   : > { %v2859_v23 = vsub.f32 %v2850_v19, %v2858_v22 }
0x1cda   : > { %v2860_v24 = vmul.f32 %v2859_v23, %v2859_v23 }
0x1cdc   : > { %v2861_v25 = vsel %vm613_vm0, %v2860_v24, 0.0 }
0x1cdd   : > { %2862 = vadd.xlane.f32.xlu0 %v2861_v25  ;;  %v4148_v25 = vld [vmem:[#allocation10 + $0x3] ss:$0 sm:$0xff] }
0x1d50   : > { %v2863_v33 = vpop.xlane.xlu0 %2862 }
0x1d51   : > { %v2864_v34 = vmul.f32 %v2863_v33, %v4988_v17 }
0x1d53   : > { %v2865_v35 = vadd.f32 1e-05, %v2864_v34  ;;  %v3042_v34 = vld [vmem:[#allocation5 + $0x270] sm:$0xff] }
0x1d54   : > { %3062 = vmatpush.msra.mxu0 %v3042_v34 }
0x1d55   : > { %4248 = vrsqrt.f32 %v2865_v35  ;;  %vm2872_vm14 = vweird.f32 %v2865_v35 }
0x1d5b   : > { %v4249_v36 = vpop.eup %4248 }
0x1d5c   : > { %v2867_v37 = vmul.f32 %v4249_v36, %v2865_v35  ;;  %vm2873_vm13 = vweird.f32 %v4249_v36  ;;  %v3043_v35 = vld [vmem:[#allocation5 + $0x278] sm:$0xff] }
0x1d5d   : > { %vm2874_vm15 = vmor %vm2872_vm14, %vm2873_vm13  ;;  %3082 = vmatpush.msra.mxu3 %v3043_v35 }
0x1d5e   : > { %v2868_v38 = vmul.f32 %v4249_v36, %v2867_v37  ;;  %v3041_v37 = vld [vmem:[#allocation5 + $0x268] sm:$0xff] }
0x1d5f   : > { %3083 = vmatpush.msra.mxu3 %v3041_v37 }
0x1d60   : > { %v2869_v39 = vmul.f32 0.5, %v2868_v38  ;;  %v3038_v38 = vld [vmem:[#allocation5 + $0x250] sm:$0xff] }
0x1d62   : > { %v2870_v40 = vsub.f32 1.5, %v2869_v39  ;;  %v3039_v39 = vld [vmem:[#allocation5 + $0x258] sm:$0xff] }
0x1d63   : > { %3084 = vmatpush.msra.mxu3 %v3039_v39 }
0x1d64   : > { %v2871_v42 = vmul.f32 %v4249_v36, %v2870_v40  ;;  %v3036_v40 = vld [vmem:[#allocation5 + $0x240] sm:$0xff] }
0x1d66   : > { %v2875_v44 = vsel %vm2874_vm15, %v4249_v36, %v2871_v42  ;;  %v3040_v36 = vld [vmem:[#allocation5 + $0x260] sm:$0xff]  ;;  %v3037_v42 = vld [vmem:[#allocation5 + $0x248] sm:$0xff] }
0x1d67   : > { %v2876_v45 = vmul.f32 %v2875_v44, %v2859_v23  ;;  %3063 = vmatpush.msra.mxu0 %v3040_v36  ;;  %3085 = vmatpush.msra.mxu3 %v3037_v42  ;;  %v3035_v44 = vld [vmem:[#allocation5 + $0x238] sm:$0xff] }
0x1d69   : > { %v2880_v46 = vmul.f32 %v4145_v43, %v2876_v45  ;;  %3064 = vmatpush.msra.mxu0 %v3038_v38  ;;  %v3034_v43 = vld [vmem:[#allocation5 + $0x230] sm:$0xff]  ;;  %3086 = vmatpush.msra.mxu3 %v3035_v44  ;;  %v3032_v45 = vld [vmem:[#allocation5 + $0x220] sm:$0xff] }
0x1d6b   : > { %v2884_v47 = vadd.f32 %v4146_v41, %v2880_v46  ;;  %3065 = vmatpush.msra.mxu0 %v3036_v40  ;;  %v3033_v41 = vld [vmem:[#allocation5 + $0x228] sm:$0xff]  ;;  %v3030_v46 = vld [vmem:[#allocation5 + $0x210] sm:$0xff] }
0x1d6c   : > { %3087 = vmatpush.msra.mxu3 %v3033_v41 }
0x1d6d   : > { %3942 = vmatmul.msk.f32.vlgmr.msra.gmra.mxu2 %vm613_vm0, %v2884_v47  ;;  %3066 = vmatpush.msra.mxu0 %v3034_v43 }
0x1d6f   : > { %3067 = vmatpush.msra.mxu0 %v3032_v45 }
0x1d71   : > { %3068 = vmatpush.msra.mxu0 %v3030_v46 }
0x1df0   : > { %v2919_v49 = vpop.f32.mrf.mxu2 }
0x1df1   : > { %v2920_v50 = vadd.f32 %v4147_v48, %v2919_v49  ;;  %v3028_v48 = vld [vmem:[#allocation5 + $0x200] sm:$0xff]  ;;  %v3029_v49 = vld [vmem:[#allocation5 + $0x208] sm:$0xff] }
0x1df2   : > { %3069 = vmatpush.msra.mxu0 %v3028_v48 }
0x1df3   : > { %v2923_v51 = vmul.f32 0.70710677, %v2920_v50  ;;  %v2922_v22 = vmul.f32 0.5, %v2920_v50 }
0x1df5   : > { %v2926_v52 = vand.u32 2147483647, %v2923_v51  ;;  %vm2924_vm9 = vcmp.ge.f32.partialorder %v2923_v51, 0.0 }
0x1df6   : > { %v2925_v20 = vsel %vm2924_vm9, 1.0, %v4653_v15 }
0x1df7   : > { %v2927_v53 = vmul.f32 0.3275911, %v2926_v52  ;;  %v2953_v2 = vsub.f32 0.0, %v2926_v52 }
0x1df9   : > { %v2928_v54 = vadd.f32 1.0, %v2927_v53  ;;  %v2954_v5 = vmul.f32 %v2953_v2, %v2926_v52 }
0x1dfb   : > { %4250 = vrcp.f32 %v2928_v54  ;;  %v2940_v58 = vand.u32 2147483648, %v2928_v54  ;;  %v2938_v60 = vand.u32 2147483647, %v2928_v54  ;;  %vm2934_vm4 = vweird.f32 %v2928_v54 }
0x1dfc   : > { %v2955_v9 = vmul.f32 1.442695, %v2954_v5 }
0x1dfd   : > { %v2941_v0 = vor.u32 1.1754944e-38, %v2940_v58  ;;  %vm2939_vm8 = vcmp.eq.f32.partialorder %v2938_v60, 8.507059e+37 }
0x1dfe   : > { %4252 = vpow2.f32 %v2955_v9 }
0x1e01   : > { %v4251_v55 = vpop.eup %4250 }
0x1e02   : > { %v2930_v56 = vmul.f32 %v4251_v55, %v2928_v54  ;;  %vm2935_vm3 = vweird.f32 %v4251_v55 }
0x1e03   : > { %vm2936_vm5 = vmor %vm2934_vm4, %vm2935_vm3 }
0x1e04   : > { %v2931_v57 = vsub.f32 1.0, %v2930_v56  ;;  %v4253_v16 = vpop.eup %4252 }
0x1e06   : > { %v2932_v59 = vmul.f32 %v4251_v55, %v2931_v57 }
0x1e08   : > { %v2933_v63 = vadd.f32 %v4251_v55, %v2932_v59  ;;  %v4149_v59 = vld [vmem:[#allocation14 + $0x3] ss:$0 sm:$0xff] }
0x1e0a   : > { %v2937_v1 = vsel %vm2936_vm5, %v4251_v55, %v2933_v63  ;;  %v4150_v63 = vld [vmem:[#allocation16 + $0x3] ss:$0 sm:$0xff] }
0x1e0b   : > { %v2942_v61 = vsel %vm2939_vm8, %v2941_v0, %v2937_v1 }
0x1e0c   : > { %v2944_v3 = vmul.f32 1.0614054, %v2942_v61 }
0x1e0e   : > { %v2945_v4 = vadd.f32 -1.4531521, %v2944_v3 }
0x1e10   : > { %v2946_v6 = vmul.f32 %v2945_v4, %v2942_v61 }
0x1e12   : > { %v2947_v7 = vadd.f32 1.4214138, %v2946_v6 }
0x1e14   : > { %v2948_v10 = vmul.f32 %v2947_v7, %v2942_v61 }
0x1e16   : > { %v2949_v11 = vadd.f32 -0.28449672, %v2948_v10 }
0x1e18   : > { %v2950_v12 = vmul.f32 %v2949_v11, %v2942_v61 }
0x1e1a   : > { %v2951_v13 = vadd.f32 0.2548296, %v2950_v12 }
0x1e1c   : > { %v2952_v14 = vmul.f32 %v2951_v13, %v2942_v61  ;;  %v3945_v61 = vld [vmem:[%s5547_s2 + $0x8] sm:$0x3] }
0x1e1d   : > { %v3047_v2 = vperm.slane %v3945_v61, 0  ;;  %v3048_v11 = vperm.slane %v3945_v61, 1 }
0x1e1e   : > { %v2957_v18 = vmul.f32 %v4253_v16, %v2952_v14 }
0x1e20   : > { %v2958_v19 = vsub.f32 1.0, %v2957_v18 }
0x1e22   : > { %v2959_v21 = vmul.f32 %v2958_v19, %v2925_v20 }
0x1e24   : > { %v2960_v23 = vadd.f32 1.0, %v2959_v21 }
0x1e26   : > { %v2961_v24 = vmul.f32 %v2960_v23, %v2922_v22 }
0x1e28   : > { %3944 = vmatmul.msk.f32.vlgmr.msrb.gmra.mxu3 %vm783_vm2, %v2961_v24 }
0x1eab   : > { %v2989_v26 = vpop.f32.mrf.mxu3 }
0x1eac   : > { %v2990_v8 = vadd.f32 %v4148_v25, %v2989_v26 }
0x1eae   : > { %v2992_v27 = vadd.f32 %v2990_v8, %v2884_v47  ;;  %v3031_v47 = vld [vmem:[#allocation5 + $0x218] sm:$0xff] }
0x1eaf   : > { %3088 = vmatpush.msra.mxu3 %v3031_v47 }
0x1eb0   : > { %v2997_v28 = vsel %vm613_vm0, %v2992_v27, 0.0 }
0x1eb1   : > { %2998 = vadd.xlane.f32.xlu2 %v2997_v28  ;;  %3089 = vmatpush.msra.mxu3 %v3029_v49 }
0x1f24   : > { %v2999_v29 = vpop.xlane.xlu2 %2998 }
0x1f25   : > { %v3000_v30 = vmul.f32 %v2999_v29, %v4988_v17 }
0x1f27   : > { %v3001_v31 = vsub.f32 %v2992_v27, %v3000_v30 }
0x1f29   : > { %v3002_v32 = vmul.f32 %v3001_v31, %v3001_v31 }
0x1f2b   : > { %v3003_v33 = vsel %vm613_vm0, %v3002_v32, 0.0 }
0x1f2c   : > { %3004 = vadd.xlane.f32.xlu2 %v3003_v33 }
0x1f9f   : > { %v3005_v50 = vpop.xlane.xlu2 %3004 }
0x1fa0   : > { %v3006_v51 = vmul.f32 %v3005_v50, %v4988_v17 }
0x1fa2   : > { %v3007_v52 = vadd.f32 1e-05, %v3006_v51 }
0x1fa4   : > { %4254 = vrsqrt.f32 %v3007_v52  ;;  %vm3014_vm11 = vweird.f32 %v3007_v52 }
0x1faa   : > { %v4255_v53 = vpop.eup %4254 }
0x1fab   : > { %v3009_v54 = vmul.f32 %v4255_v53, %v3007_v52  ;;  %vm3015_vm10 = vweird.f32 %v4255_v53 }
0x1fac   : > { %vm3016_vm12 = vmor %vm3014_vm11, %vm3015_vm10 }
0x1fad   : > { %v3010_v55 = vmul.f32 %v4255_v53, %v3009_v54 }
0x1faf   : > { %v3011_v56 = vmul.f32 0.5, %v3010_v55 }
0x1fb1   : > { %v3012_v57 = vsub.f32 1.5, %v3011_v56 }
0x1fb3   : > { %v3013_v58 = vmul.f32 %v4255_v53, %v3012_v57 }
0x1fb5   : > { %v3017_v60 = vsel %vm3016_vm12, %v4255_v53, %v3013_v58 }
0x1fb6   : > { %v3018_v62 = vmul.f32 %v3017_v60, %v3001_v31 }
0x1fb8   : > { %v3022_v0 = vmul.f32 %v4149_v59, %v3018_v62 }
0x1fba   : > { %v5388_v1 = vadd.f32 %v4150_v63, %v3022_v0 }
0x1fbc   : > { %3946 = vmatmul.msk.f32.vlgmr.msra.gmra.mxu0 %vm613_vm0, %v5388_v1  ;;  %3947 = vmatmul.msk.f32.vlgmr.msra.gmra.mxu3 %vm613_vm0, %v5388_v1 }
0x2039   : > { %v3071_v3 = vpop.f32.mrf.mxu0 }
0x203a   : > { %v3072_v4 = vadd.f32 %v3071_v3, %v3047_v2 }
0x203c   : > { %3099 = vrot.lane.b32.xlu0 %v3072_v4, %s5607_s19  ;;  %3097 = vrot.lane.b32.xlu2 %v3072_v4, %s5608_s13 }
0x203d   : > { %3095 = vrot.lane.b32.xlu1 %v3072_v4, %s5606_s16 }
0x203f   : > { %v3091_v12 = vpop.f32.mrf.mxu3 }
0x2040   : > { %v3092_v13 = vadd.f32 %v3091_v12, %v3048_v11 }
0x2045   : > { %3111 = vrot.lane.b32.xlu1 %v3072_v4, %s5609_s22 }
0x2096   : > { %v3098_v5 = vpop.permute.xlu2 %3097 }
0x2097   : > { %3163 = vrot.lane.b32.xlu2 %v3098_v5, %s5609_s22 }
0x20ae   : > { %v3100_v7 = vpop.permute.xlu0 %3099 }
0x20af   : > { %v3096_v6 = vpop.permute.xlu1 %3095 }
0x20b0   : > { %3137 = vrot.lane.b32.xlu0 %v3096_v6, %s5609_s22 }
0x20b7   : > { %v3112_v9 = vpop.permute.xlu1 %3111 }
0x20b8   : > { %3948 = vmatpush.xpose.msk.msrb.mxu1 %vm676_vm1, %v3112_v9  ;;  %3189 = vrot.lane.b32.xlu0 %v3100_v7, %s5609_s22  ;;  %s5612_s22 = sld [smem:[#allocation34_spill]] }
0x20bb   : > { %3949 = vmatmul.msk.f32.vlgmr.msrb.gmra.mxu1 %vm676_vm1, %v3072_v4 }
0x20be   : > { %s4570_s12 = scalar_lea.hbm %s5612_s22, 16 }
0x20f1   : > { %v3164_v10 = vpop.permute.xlu2 %3163 }
0x20f2   : > { %3952 = vmatpush.xpose.msk.msrb.mxu0 %vm676_vm1, %v3164_v10 }
0x20f5   : > { %3953 = vmatmul.msk.f32.vlgmr.msrb.gmra.mxu0 %vm676_vm1, %v3098_v5 }
0x2122   : > { %v3138_v14 = vpop.permute.xlu0 %3137 }
0x2123   : > { %3950 = vmatpush.xpose.msk.msrb.mxu2 %vm676_vm1, %v3138_v14 }
0x2126   : > { %3951 = vmatmul.msk.f32.vlgmr.msrb.gmra.mxu2 %vm676_vm1, %v3096_v6 }
0x2127   : > { %3333 = vmatpush.msra.mxu2 %v3092_v13 }
0x212a   : > { %v3190_v16 = vpop.permute.xlu0 %3189 }
0x212b   : > { %3954 = vmatpush.xpose.msk.msra.mxu1 %vm676_vm1, %v3190_v16 }
0x212e   : > { %3955 = vmatmul.msk.f32.vlgmr.msra.gmra.mxu1 %vm676_vm1, %v3100_v7 }
0x2138   : > { %v3134_v21 = vpop.f32.mrf.mxu1 }
0x2139   : > { %v3215_v22 = vmul.f32 0.25, %v3134_v21 }
0x213b   : > { %v3219_v23 = vsel %vm783_vm2, %v3215_v22, -inf }
0x2172   : > { %v3186_v18 = vpop.f32.mrf.mxu0 }
0x2173   : > { %v3217_v19 = vmul.f32 0.25, %v3186_v18 }
0x2175   : > { %v3225_v20 = vsel %vm783_vm2, %v3217_v19, -inf }
0x2176   : > { %3226 = vmax.xlane.f32.xlu2 %v3225_v20 }
0x217e   : > { %3220 = vmax.xlane.f32.xlu2 %v3219_v23 }
0x21a9   : > { %v3160_v24 = vpop.f32.mrf.mxu2 }
0x21aa   : > { %v3216_v25 = vmul.f32 0.25, %v3160_v24 }
0x21ab   : > { %v3212_v26 = vpop.f32.mrf.mxu1 }
0x21ac   : > { %v3218_v8 = vmul.f32 0.25, %v3212_v26  ;;  %v3222_v27 = vsel %vm783_vm2, %v3216_v25, -inf }
0x21ad   : > { %3223 = vmax.xlane.f32.xlu1 %v3222_v27 }
0x21ae   : > { %v3228_v28 = vsel %vm783_vm2, %v3218_v8, -inf }
0x21af   : > { %3229 = vmax.xlane.f32.xlu0 %v3228_v28 }
0x21e9   : > { %v3227_v29 = vpop.xlane.xlu2 %3226 }
0x21ea   : > { %v3233_v30 = vsub.f32 %v3217_v19, %v3227_v29 }
0x21ec   : > { %v3239_v31 = vmul.f32 1.442695, %v3233_v30 }
0x21ee   : > { %4256 = vpow2.f32 %v3239_v31 }
0x21f1   : > { %v3221_v45 = vpop.xlane.xlu2 %3220 }
0x21f2   : > { %v3231_v41 = vsub.f32 %v3215_v22, %v3221_v45  ;;  %v3965_v45 = vld [vmem:[%s5548_s3 + $0x128] sm:$0xff] }
0x21f4   : > { %v4257_v32 = vpop.eup %4256  ;;  %v3235_v46 = vmul.f32 1.442695, %v3231_v41  ;;  %v3964_v41 = vld [vmem:[%s5548_s3 + $0x120] sm:$0xff] }
0x21f5   : > { %v3249_v33 = vsel %vm783_vm2, %v4257_v32, 0.0 }
0x21f6   : > { %3250 = vadd.xlane.f32.xlu2 %v3249_v33 }
0x220e   : > { %3105 = vrot.lane.b32.xlu2 %v3092_v13, %s5608_s13 }
0x2220   : > { %v3224_v34 = vpop.xlane.xlu1 %3223 }
0x2221   : > { %v3232_v35 = vsub.f32 %v3216_v25, %v3224_v34 }
0x2222   : > { %v3230_v36 = vpop.xlane.xlu0 %3229 }
0x2223   : > { %v3237_v37 = vmul.f32 1.442695, %v3232_v35  ;;  %v3234_v38 = vsub.f32 %v3218_v8, %v3230_v36 }
0x2225   : > { %4258 = vpow2.f32 %v3237_v37  ;;  %v3241_v39 = vmul.f32 1.442695, %v3234_v38 }
0x2227   : > { %4260 = vpow2.f32 %v3241_v39 }
0x2228   : > { %4262 = vpow2.f32 %v3235_v46  ;;  %v3963_v46 = vld [vmem:[%s5548_s3 + $0x118] sm:$0xff] }
0x222b   : > { %v5418_v40 = vpop.eup %4258 }
0x222c   : > { %v3246_v42 = vsel %vm783_vm2, %v5418_v40, 0.0 }
0x222d   : > { %v5422_v43 = vpop.eup %4260  ;;  %3247 = vadd.xlane.f32.xlu1 %v3246_v42 }
0x222e   : > { %v3252_v44 = vsel %vm783_vm2, %v5422_v43, 0.0  ;;  %v5428_v48 = vpop.eup %4262 }
0x222f   : > { %3253 = vadd.xlane.f32.xlu0 %v3252_v44  ;;  %v3243_v49 = vsel %vm783_vm2, %v5428_v48, 0.0  ;;  %v3966_v44 = vld [vmem:[%s5548_s3 + $0x130] sm:$0xff] }
0x2243   : > { %3108 = vrot.lane.b32.xlu0 %v3092_v13, %s5607_s19 }
0x2246   : > { %3102 = vrot.lane.b32.xlu1 %v3092_v13, %s5606_s16  ;;  %s3981_s16 = sshll.u32 %s4748_s15, 3  ;;  %s3638_s15 = scalar_lea.sflag [#allocation4], %s4878_s30 }
0x2247   : > { %s3648_s6 = scalar_lea.hbm %s5612_s22, %s3981_s16 }
0x2269   : > { %v3251_v47 = vpop.xlane.xlu2 %3250 }
0x226a   : > { %4264 = vrcp.f32 %v3251_v47  ;;  %v3296_v54 = vand.u32 2147483648, %v3251_v47  ;;  %v3294_v56 = vand.u32 2147483647, %v3251_v47  ;;  %vm3290_vm14 = vweird.f32 %v3251_v47 }
0x226c   : > { %v3297_v58 = vor.u32 1.1754944e-38, %v3296_v54  ;;  %vm3295_vm3 = vcmp.eq.f32.partialorder %v3294_v56, 8.507059e+37 }
0x2270   : > { %v4265_v50 = vpop.eup %4264  ;;  %3244 = vadd.xlane.f32.xlu1 %v3243_v49  ;;  %v3960_v49 = vld [vmem:[%s5548_s3 + $0x100] sm:$0xff] }
0x2271   : > { %v3286_v51 = vmul.f32 %v4265_v50, %v3251_v47  ;;  %v3106_v52 = vpop.permute.xlu2 %3105  ;;  %vm3291_vm13 = vweird.f32 %v4265_v50  ;;  %v3962_v47 = vld [vmem:[%s5548_s3 + $0x110] sm:$0xff] }
0x2272   : > { %3379 = vmatpush.msra.mxu0 %v3106_v52  ;;  %vm3292_vm15 = vmor %vm3290_vm14, %vm3291_vm13 }
0x2273   : > { %v3287_v53 = vsub.f32 1.0, %v3286_v51 }
0x2275   : > { %v3288_v55 = vmul.f32 %v4265_v50, %v3287_v53 }
0x2277   : > { %v3289_v57 = vadd.f32 %v4265_v50, %v3288_v55 }
0x2279   : > { %v3293_v59 = vsel %vm3292_vm15, %v4265_v50, %v3289_v57  ;;  %v4151_v57 = vld [vmem:[#allocation7 + $0x4] ss:$0 sm:$0xff] }
0x227a   : > { %v3298_v60 = vsel %vm3295_vm3, %v3297_v58, %v3293_v59 }
0x227b   : > { %v3299_v62 = vmul.f32 %v4257_v32, %v3298_v60 }
0x227d   : > { %3958 = vmatmul.msk.f32.vlgmr.msra.gmra.mxu0 %vm783_vm2, %v3299_v62 }
0x22a0   : > { %v3248_v63 = vpop.xlane.xlu1 %3247 }
0x22a1   : > { %4266 = vrcp.f32 %v3248_v63  ;;  %vm3275_vm8 = vweird.f32 %v3248_v63  ;;  %v3281_v13 = vand.u32 2147483648, %v3248_v63  ;;  %v3279_v14 = vand.u32 2147483647, %v3248_v63 }
0x22a2   : > { %v3254_v0 = vpop.xlane.xlu0 %3253 }
0x22a3   : > { %4268 = vrcp.f32 %v3254_v0  ;;  %v3311_v9 = vand.u32 2147483648, %v3254_v0  ;;  %v3309_v12 = vand.u32 2147483647, %v3254_v0  ;;  %vm3305_vm10 = vweird.f32 %v3254_v0 }
0x22a4   : > { %v3282_v21 = vor.u32 1.1754944e-38, %v3281_v13  ;;  %vm3280_vm13 = vcmp.eq.f32.partialorder %v3279_v14, 8.507059e+37 }
0x22a5   : > { %v3312_v18 = vor.u32 1.1754944e-38, %v3311_v9  ;;  %vm3310_vm12 = vcmp.eq.f32.partialorder %v3309_v12, 8.507059e+37  ;;  %v3971_v9 = vld [vmem:[%s5550_s5 + $0x110] sm:$0xff] }
0x22a7   : > { %v4267_v61 = vpop.eup %4266 }
0x22a8   : > { %v3271_v2 = vmul.f32 %v4267_v61, %v3248_v63  ;;  %vm3276_vm4 = vweird.f32 %v4267_v61 }
0x22a9   : > { %v4269_v3 = vpop.eup %4268  ;;  %vm3277_vm9 = vmor %vm3275_vm8, %vm3276_vm4 }
0x22aa   : > { %v3272_v4 = vsub.f32 1.0, %v3271_v2  ;;  %v3301_v5 = vmul.f32 %v4269_v3, %v3254_v0  ;;  %vm3306_vm5 = vweird.f32 %v4269_v3 }
0x22ab   : > { %vm3307_vm11 = vmor %vm3305_vm10, %vm3306_vm5 }
0x22ac   : > { %v3273_v6 = vmul.f32 %v4267_v61, %v3272_v4  ;;  %v3302_v7 = vsub.f32 1.0, %v3301_v5  ;;  %v3976_v4 = vld [vmem:[%s5550_s5 + $0x138] sm:$0xff]  ;;  %v3974_v5 = vld [vmem:[%s5550_s5 + $0x128] sm:$0xff] }
0x22ae   : > { %v3274_v10 = vadd.f32 %v4267_v61, %v3273_v6  ;;  %v3303_v11 = vmul.f32 %v4269_v3, %v3302_v7  ;;  %v3973_v6 = vld [vmem:[%s5550_s5 + $0x120] sm:$0xff]  ;;  %v3972_v7 = vld [vmem:[%s5550_s5 + $0x118] sm:$0xff] }
0x22b0   : > { %v3304_v16 = vadd.f32 %v4269_v3, %v3303_v11  ;;  %v3278_v19 = vsel %vm3277_vm9, %v4267_v61, %v3274_v10  ;;  %v3970_v10 = vld [vmem:[%s5550_s5 + $0x108] sm:$0xff]  ;;  %v3969_v11 = vld [vmem:[%s5550_s5 + $0x100] sm:$0xff] }
0x22b1   : > { %v3283_v24 = vsel %vm3280_vm13, %v3282_v21, %v3278_v19 }
0x22b2   : > { %v3308_v20 = vsel %vm3307_vm11, %v4269_v3, %v3304_v16  ;;  %v3284_v8 = vmul.f32 %v5418_v40, %v3283_v24 }
0x22b3   : > { %v3313_v22 = vsel %vm3310_vm12, %v3312_v18, %v3308_v20 }
0x22b4   : > { %v3314_v23 = vmul.f32 %v5422_v43, %v3313_v22  ;;  %v3967_v43 = vld [vmem:[%s5548_s3 + $0x138] sm:$0xff] }
0x22b5   : > { %v3109_v25 = vpop.permute.xlu0 %3108  ;;  %3447 = vmatpush.msrb.mxu2 %v3967_v43 }
0x22b6   : > { %3402 = vmatpush.msrb.mxu1 %v3109_v25 }
0x22b7   : > { %3959 = vmatmul.msk.f32.vlgmr.msrb.gmra.mxu1 %vm783_vm2, %v3314_v23  ;;  %3448 = vmatpush.msrb.mxu2 %v3966_v44  ;;  %v4152_v23 = vld [vmem:[#allocation11 + $0x4] ss:$0 sm:$0xff] }
0x22b8   : > { %v3103_v26 = vpop.permute.xlu1 %3102 }
0x22b9   : > { %3356 = vmatpush.msrb.mxu3 %v3103_v26  ;;  %3449 = vmatpush.msrb.mxu2 %v3965_v45  ;;  %v4153_v26 = vld [vmem:[#allocation13 + $0x4] ss:$0 sm:$0xff] }
0x22ba   : > { %3957 = vmatmul.msk.f32.vlgmr.msrb.gmra.mxu3 %vm783_vm2, %v3284_v8 }
0x22bb   : > { %3450 = vmatpush.msrb.mxu2 %v3964_v41  ;;  %3519 = vmatpush.msra.mxu3 %v3976_v4 }
0x22bd   : > { %3451 = vmatpush.msrb.mxu2 %v3963_v46 }
0x22bf   : > { %3452 = vmatpush.msrb.mxu2 %v3962_v47 }
0x22e3   : > { %v3245_v27 = vpop.xlane.xlu1 %3244 }
0x22e4   : > { %4270 = vrcp.f32 %v3245_v27  ;;  %v3266_v31 = vand.u32 2147483648, %v3245_v27  ;;  %v3264_v33 = vand.u32 2147483647, %v3245_v27  ;;  %vm3260_vm15 = vweird.f32 %v3245_v27 }
0x22e6   : > { %v3267_v35 = vor.u32 1.1754944e-38, %v3266_v31  ;;  %vm3265_vm4 = vcmp.eq.f32.partialorder %v3264_v33, 8.507059e+37 }
0x22ea   : > { %v4271_v28 = vpop.eup %4270 }
0x22eb   : > { %v3256_v29 = vmul.f32 %v4271_v28, %v3245_v27  ;;  %vm3261_vm14 = vweird.f32 %v4271_v28 }
0x22ec   : > { %vm3262_vm3 = vmor %vm3260_vm15, %vm3261_vm14 }
0x22ed   : > { %v3257_v30 = vsub.f32 1.0, %v3256_v29 }
0x22ef   : > { %v3258_v32 = vmul.f32 %v4271_v28, %v3257_v30 }
0x22f1   : > { %v3259_v34 = vadd.f32 %v4271_v28, %v3258_v32 }
0x22f3   : > { %v3263_v36 = vsel %vm3262_vm3, %v4271_v28, %v3259_v34  ;;  %v4154_v28 = vld [vmem:[#allocation8 + $0x4] ss:$0 sm:$0xff] }
0x22f4   : > { %v3268_v37 = vsel %vm3265_vm4, %v3267_v35, %v3263_v36 }
0x22f5   : > { %v3269_v38 = vmul.f32 %v5428_v48, %v3268_v37  ;;  %v3961_v48 = vld [vmem:[%s5548_s3 + $0x108] sm:$0xff] }
0x22f6   : > { %3453 = vmatpush.msrb.mxu2 %v3961_v48 }
0x22f7   : > { %3956 = vmatmul.msk.f32.vlgmr.msra.gmra.mxu2 %vm783_vm2, %v3269_v38 }
0x22f8   : > { %3454 = vmatpush.msrb.mxu2 %v3960_v49 }
0x22fa   : > { %v3381_v39 = vpop.f32.mrf.mxu0 }
0x22fb   : > { %3412 = vrot.lane.b32.xlu2 %v3381_v39, %s5603_s21  ;;  %s589_s21 = scalar_lea.vmem [#allocation17], %s5613_s8 }
0x2334   : > { %v3404_v42 = vpop.f32.mrf.mxu1 }
0x233d   : > { %v3358_v40 = vpop.f32.mrf.mxu3 }
0x233e   : > { %3408 = vrot.lane.b32.xlu0 %v3358_v40, %s5604_s17  ;;  %s3650_s17 = sshll.u32 %s589_s21, 4  ;;  %s3651_s17 = int_to_ptr.vmem [resolvable:$true] %s3650_s17 }
0x2346   : > { %3416 = vrot.lane.b32.xlu0 %v3404_v42, %s5605_s24  ;;  %v3978_v42 = vld [vmem:[%s5602_s4 + $0x20] sm:$0xff]  ;;  %s3652_s24 = sshll.u32 %s3648_s6, 4  ;;  %s3653_s24 = int_to_ptr.hbm [resolvable:$true] %s3652_s24 }
0x2347   : > { %3596 = vmatpush.msrb.mxu0 %v3978_v42  ;;  %s4564_s9 = sshra.s32 %s3653_s24, 4  ;;  %s4565_s9 = int_to_ptr.hbm [resolvable:$true] %s4564_s9 }
0x2348   : > { %s4566_s0 = scalar_lea.hbm %s4565_s9, 8  ;;  %p4571_p12 = scmp.lt.s32.totalorder %s4565_s9, %s5612_s22 }
0x2349   : > { %p4567_p1 = scmp.ne.s32.totalorder %s4565_s9, %s4566_s0  ;;  %p4572_p8 = scmp.lt.s32.totalorder %s4570_s12, %s4566_s0 }
0x234b   : > { %p4568_p3 = pnand %p4567_p1, %p4847_p13  ;;  %p4573_p7 = por %p4572_p8, %p4571_p12 }
0x234d   : > { %p4569_p5 = pneg %p4568_p3 }
0x234f   : > { %p4574_p9 = pnand %p4573_p7, %p4569_p5 }
0x2355   : > { %v3413_v53 = vpop.permute.xlu2 %3412 }
0x237a   : > { %v3335_v51 = vpop.f32.mrf.mxu2 }
0x23b0   : > { %v3409_v50 = vpop.permute.xlu0 %3408 }
0x23b1   : > { %v3419_v52 = vsel %vm676_vm1, %v3335_v51, %v3409_v50 }
0x23b2   : > { %v3420_v54 = vsel %vm985_vm6, %v3419_v52, %v3413_v53 }
0x23b8   : > { %v3417_v55 = vpop.permute.xlu0 %3416 }
0x23b9   : > { %v3421_v56 = vsel %vm987_vm7, %v3420_v54, %v3417_v55 }
0x23ba   : > { %3968 = vmatmul.msk.f32.vlgmr.msrb.gmra.mxu2 %vm613_vm0, %v3421_v56 }
0x243d   : > { %v3456_v58 = vpop.f32.mrf.mxu2 }
0x243e   : > { %v3457_v59 = vadd.f32 %v4151_v57, %v3456_v58 }
0x2440   : > { %v3459_v60 = vadd.f32 %v3457_v59, %v5388_v1  ;;  %v3975_v1 = vld [vmem:[%s5550_s5 + $0x130] sm:$0xff] }
0x2441   : > { %3520 = vmatpush.msra.mxu3 %v3975_v1 }
0x2442   : > { %v3464_v62 = vsel %vm613_vm0, %v3459_v60, 0.0 }
0x2443   : > { %3465 = vadd.xlane.f32.xlu2 %v3464_v62  ;;  %3521 = vmatpush.msra.mxu3 %v3974_v5 }
0x2445   : > { %3522 = vmatpush.msra.mxu3 %v3973_v6 }
0x2447   : > { %3523 = vmatpush.msra.mxu3 %v3972_v7 }
0x2449   : > { %3524 = vmatpush.msra.mxu3 %v3971_v9 }
0x244b   : > { %3525 = vmatpush.msra.mxu3 %v3970_v10 }
0x244d   : > { %3526 = vmatpush.msra.mxu3 %v3969_v11 }
0x24b6   : > { %v3466_v63 = vpop.xlane.xlu2 %3465 }
0x24b7   : > { %v3467_v0 = vmul.f32 %v3466_v63, %v4988_v17 }
0x24b9   : > { %v3468_v61 = vsub.f32 %v3459_v60, %v3467_v0 }
0x24bb   : > { %v3469_v2 = vmul.f32 %v3468_v61, %v3468_v61 }
0x24bd   : > { %v3470_v3 = vsel %vm613_vm0, %v3469_v2, 0.0 }
0x24be   : > { %3471 = vadd.xlane.f32.xlu0 %v3470_v3  ;;  %v4155_v3 = vld [vmem:[#allocation10 + $0x4] ss:$0 sm:$0xff] }
0x2531   : > { %v3472_v12 = vpop.xlane.xlu0 %3471 }
0x2532   : > { %v3473_v13 = vmul.f32 %v3472_v12, %v4988_v17 }
0x2534   : > { %v3474_v14 = vadd.f32 1e-05, %v3473_v13 }
0x2536   : > { %4272 = vrsqrt.f32 %v3474_v14  ;;  %vm3481_vm6 = vweird.f32 %v3474_v14 }
0x253c   : > { %v4273_v16 = vpop.eup %4272 }
0x253d   : > { %v3476_v18 = vmul.f32 %v4273_v16, %v3474_v14  ;;  %vm3482_vm1 = vweird.f32 %v4273_v16 }
0x253e   : > { %vm3483_vm7 = vmor %vm3481_vm6, %vm3482_vm1 }
0x253f   : > { %v3477_v19 = vmul.f32 %v4273_v16, %v3476_v18 }
0x2541   : > { %v3478_v20 = vmul.f32 0.5, %v3477_v19 }
0x2543   : > { %v3479_v21 = vsub.f32 1.5, %v3478_v20 }
0x2545   : > { %v3480_v22 = vmul.f32 %v4273_v16, %v3479_v21 }
0x2547   : > { %v3484_v24 = vsel %vm3483_vm7, %v4273_v16, %v3480_v22 }
0x2548   : > { %v3485_v25 = vmul.f32 %v3484_v24, %v3468_v61 }
0x254a   : > { %v3489_v8 = vmul.f32 %v4152_v23, %v3485_v25  ;;  %v4156_v23 = vld [vmem:[#allocation14 + $0x4] ss:$0 sm:$0xff]  ;;  %v4157_v25 = vld [vmem:[#allocation16 + $0x4] ss:$0 sm:$0xff] }
0x254c   : > { %v3493_v27 = vadd.f32 %v4153_v26, %v3489_v8 }
0x254e   : > { %3977 = vmatmul.msk.f32.vlgmr.msra.gmra.mxu3 %vm613_vm0, %v3493_v27 }
0x25d1   : > { %v3528_v29 = vpop.f32.mrf.mxu3 }
0x25d2   : > { %v3529_v30 = vadd.f32 %v4154_v28, %v3528_v29 }
0x25d4   : > { %v3532_v31 = vmul.f32 0.70710677, %v3529_v30  ;;  %v3531_v0 = vmul.f32 0.5, %v3529_v30 }
0x25d6   : > { %v3535_v32 = vand.u32 2147483647, %v3532_v31  ;;  %vm3533_vm11 = vcmp.ge.f32.partialorder %v3532_v31, 0.0 }
0x25d7   : > { %v3534_v62 = vsel %vm3533_vm11, 1.0, %v4653_v15 }
0x25d8   : > { %v3536_v33 = vmul.f32 0.3275911, %v3535_v32  ;;  %v3562_v46 = vsub.f32 0.0, %v3535_v32 }
0x25da   : > { %v3537_v34 = vadd.f32 1.0, %v3536_v33  ;;  %v3563_v49 = vmul.f32 %v3562_v46, %v3535_v32 }
0x25dc   : > { %4274 = vrcp.f32 %v3537_v34  ;;  %v3549_v38 = vand.u32 2147483648, %v3537_v34  ;;  %v3547_v40 = vand.u32 2147483647, %v3537_v34  ;;  %vm3543_vm8 = vweird.f32 %v3537_v34 }
0x25dd   : > { %v3564_v52 = vmul.f32 1.442695, %v3563_v49 }
0x25de   : > { %v3550_v44 = vor.u32 1.1754944e-38, %v3549_v38  ;;  %vm3548_vm10 = vcmp.eq.f32.partialorder %v3547_v40, 8.507059e+37 }
0x25df   : > { %4276 = vpow2.f32 %v3564_v52 }
0x25e2   : > { %v4275_v35 = vpop.eup %4274 }
0x25e3   : > { %v3539_v36 = vmul.f32 %v4275_v35, %v3537_v34  ;;  %vm3544_vm5 = vweird.f32 %v4275_v35 }
0x25e4   : > { %vm3545_vm9 = vmor %vm3543_vm8, %vm3544_vm5 }
0x25e5   : > { %v3540_v37 = vsub.f32 1.0, %v3539_v36  ;;  %v4277_v58 = vpop.eup %4276 }
0x25e7   : > { %v3541_v39 = vmul.f32 %v4275_v35, %v3540_v37 }
0x25e9   : > { %v3542_v43 = vadd.f32 %v4275_v35, %v3541_v39 }
0x25eb   : > { %v3546_v45 = vsel %vm3545_vm9, %v4275_v35, %v3542_v43 }
0x25ec   : > { %v3551_v41 = vsel %vm3548_vm10, %v3550_v44, %v3546_v45 }
0x25ed   : > { %v3553_v47 = vmul.f32 1.0614054, %v3551_v41 }
0x25ef   : > { %v3554_v48 = vadd.f32 -1.4531521, %v3553_v47 }
0x25f1   : > { %v3555_v50 = vmul.f32 %v3554_v48, %v3551_v41 }
0x25f3   : > { %v3556_v51 = vadd.f32 1.4214138, %v3555_v50 }
0x25f5   : > { %v3557_v53 = vmul.f32 %v3556_v51, %v3551_v41 }
0x25f7   : > { %v3558_v54 = vadd.f32 -0.28449672, %v3557_v53 }
0x25f9   : > { %v3559_v55 = vmul.f32 %v3558_v54, %v3551_v41 }
0x25fb   : > { %v3560_v56 = vadd.f32 0.2548296, %v3559_v55 }
0x25fd   : > { %v3561_v57 = vmul.f32 %v3560_v56, %v3551_v41 }
0x25ff   : > { %v3566_v59 = vmul.f32 %v4277_v58, %v3561_v57 }
0x2601   : > { %v3567_v60 = vsub.f32 1.0, %v3566_v59 }
0x2603   : > { %v3568_v63 = vmul.f32 %v3567_v60, %v3534_v62 }
0x2605   : > { %v3569_v61 = vadd.f32 1.0, %v3568_v63 }
0x2607   : > { %v3570_v2 = vmul.f32 %v3569_v61, %v3531_v0 }
0x2609   : > { %3979 = vmatmul.msk.f32.vlgmr.msrb.gmra.mxu0 %vm783_vm2, %v3570_v2 }
0x2686   : > { %v3598_v4 = vpop.f32.mrf.mxu0 }
0x2687   : > { %v3599_v1 = vadd.f32 %v4155_v3, %v3598_v4 }
0x2689   : > { %v3601_v5 = vadd.f32 %v3599_v1, %v3493_v27 }
0x268b   : > { %v3606_v6 = vsel %vm613_vm0, %v3601_v5, 0.0 }
0x268c   : > { %3607 = vadd.xlane.f32.xlu1 %v3606_v6 }
0x26ff   : > { %v3608_v7 = vpop.xlane.xlu1 %3607 }
0x2700   : > { %v3609_v9 = vmul.f32 %v3608_v7, %v4988_v17 }
0x2702   : > { %v3610_v10 = vsub.f32 %v3601_v5, %v3609_v9 }
0x2704   : > { %v3611_v11 = vmul.f32 %v3610_v10, %v3610_v10 }
0x2706   : > { %v3612_v15 = vsel %vm613_vm0, %v3611_v11, 0.0 }
0x2707   : > { %3613 = vadd.xlane.f32.xlu1 %v3612_v15 }
0x277a   : > { %v3614_v12 = vpop.xlane.xlu1 %3613 }
0x277b   : > { %v3615_v13 = vmul.f32 %v3614_v12, %v4988_v17 }
0x277d   : > { %v3616_v14 = vadd.f32 1e-05, %v3615_v13 }
0x277f   : > { %4278 = vrsqrt.f32 %v3616_v14  ;;  %vm3623_vm12 = vweird.f32 %v3616_v14 }
0x2785   : > { %v4279_v16 = vpop.eup %4278 }
0x2786   : > { %v3618_v18 = vmul.f32 %v4279_v16, %v3616_v14  ;;  %vm3624_vm2 = vweird.f32 %v4279_v16 }
0x2787   : > { %vm3625_vm13 = vmor %vm3623_vm12, %vm3624_vm2 }
0x2788   : > { %v3619_v19 = vmul.f32 %v4279_v16, %v3618_v18 }
0x278a   : > { %v3620_v20 = vmul.f32 0.5, %v3619_v19 }
0x278c   : > { %v3621_v21 = vsub.f32 1.5, %v3620_v20 }
0x278e   : > { %v3622_v22 = vmul.f32 %v4279_v16, %v3621_v21 }
0x2790   : > { %v3626_v17 = vsel %vm3625_vm13, %v4279_v16, %v3622_v22 }
0x2791   : > { %v3627_v24 = vmul.f32 %v3626_v17, %v3610_v10 }
0x2793   : > { %v3631_v26 = vmul.f32 %v4156_v23, %v3627_v24 }
0x2795   : > { %v3635_v8 = vadd.f32 %v4157_v25, %v3631_v26 }
0x2797   : > { %3636 = vst.msk [vmem:[%s589_s21] sm:$0xff] %vm613_vm0, %v3635_v8 }
0x2798   : > { %4577 = shalt.err (!%p4574_p9)
}
0x2799   : > { %4018 = dma.vmem_to_hbm [thread:$0]  (%p4847_p13), %s3651_s17, 128, %s3653_s24, %s3638_s15  }
0x279a PF: > { %s3664_s30 = sand.u32 1, %s4620_s25   ;;  %p5614_p10 = scmp.ge.s32.totalorder %s4632_s28, 2 }
0x279b   : > { %s3665_s23 = scalar_lea.sflag [#allocation4], %s3664_s30 }
0x279c   : > { %p4050_p11 = pnand %p5614_p10, %p4852_p4 }
0x279e   : > { %p4051_p0 = pneg %p4050_p11 }
0x27a0   : > { %4615 = dma.done.wait (%p4051_p0), %s3665_s23, 128  }
0x27a1   : > { %4617 = vsyncadd (%p4051_p0), %s3665_s23, 4294967168  ;;  %p30_p2 = scmp.ge.s32.totalorder %s4827_s1, 4   ;;  %s5615_s25 = smov %s4624_s26 }
0x27a2   : > { %s5616_s26 = smov %s4628_s27  ;;  %s5617_s27 = smov %s4839_s18 }
0x27a3   : > { %s5618_s28 = smov %s4827_s1  ;;  %32 = sbr.rel (!%p30_p2) target bundleno = 21 (0x15), region = 197 }
0x27a8   :  { %3671 = vsyncpa [#allocation3], 1 }
0x27a9   :  { %3673 = vsyncpa [#allocation3 + $0x1], 1 }
0x27aa   :  { %3674 = vsyncpa [#allocation6], 1 }
0x27ab   :  { %3675 = vsyncpa [#allocation9], 1 }
0x27ac   :  { %3676 = vsyncpa [#allocation12], 1 }
0x27ad   :  { %3677 = vsyncpa [#allocation15], 1 }
0x27ae   :  { %3678 = vsyncpa [#allocation4], 1 }
0x27af   :  { %3680 = vsyncpa [#allocation4 + $0x1], 1 }

</bundles_post_ra>
